<compile_context>
chip_gen: v7x
topology: tpu7x:2x2x1
jax: 0.10.0
libtpu: 0.0.40
codegen_flags: <defaults>
</compile_context>

<pallas_src>
import functools

import jax
import jax.numpy as jnp
from jax import lax
from jax.experimental import pallas as pl
from jax.experimental.pallas import tpu as pltpu

EPS = 1e-5       # nn.BatchNorm2d default
CPAD = 128       # lane width: all channel dims are zero-padded to this
WPAD_L = 8       # sublane-aligned left halo block inside the depthwise scratch


def _vmem():
    return pl.BlockSpec(memory_space=pltpu.MemorySpace.VMEM)


def _bn(y, g, b, relu6):
    """Training-mode BatchNorm over rows of (M, C).

    One sum + sum-of-squares pass (biased variance), affine folded into a per-channel
    scale/shift so the apply is y*scale + shift. Stats stay in f32.
    """
    m = y.shape[0]
    inv_m = 1.0 / m
    s1 = jnp.sum(y, axis=0, keepdims=True)
    s2 = jnp.sum(y * y, axis=0, keepdims=True)
    mean = s1 * inv_m
    var = jnp.maximum(s2 * inv_m - mean * mean, 0.0)
    scale = g * lax.rsqrt(var + EPS)
    shift = b - mean * scale
    out = y * scale + shift
    if relu6:
        out = jnp.clip(out, 0.0, 6.0)
    return out


def _block_body(x2d, prefs, yp_ref, *, N, H, W, stride, has_expand, res_connect):
    """One InvertedResidual block. x2d: (N*H*W, 128) f32 -> (N*Ho*Wo, 128) f32."""
    C = CPAD
    Ho = (H - 1) // stride + 1
    Wo = (W - 1) // stride + 1
    # Multiples of 8 keep the (M,C)<->(N,H,W,C) reshapes layout-preserving and all
    # scratch stores sublane-aligned.
    assert W % 8 == 0 and Wo % 8 == 0

    if has_expand:
        w1_ref, g1_ref, b1_ref, wd_ref, g2_ref, b2_ref, w3_ref, g3_ref, b3_ref = prefs
        # ---- stage 1: 1x1 expand on the MXU (bf16 operands, f32 accum) + BN + ReLU6 ---
        y = jnp.dot(x2d.astype(jnp.bfloat16), w1_ref[...],
                    preferred_element_type=jnp.float32)
        y = _bn(y, g1_ref[...], b1_ref[...], relu6=True)
    else:
        wd_ref, g2_ref, b2_ref, w3_ref, g3_ref, b3_ref = prefs
        y = x2d

    # ---- stage 2: depthwise 3x3 (pad=1, stride) + BN + ReLU6 ------------------------
    # Interior stored at sublane offset WPAD_L (=8): unmasked aligned vst.
    # Only the halo is zeroed (top/bottom rows + left/right 8-wide column blocks).
    Wp = WPAD_L + W + 8
    zero_row = jnp.zeros((N, 1, Wp, C), jnp.float32)
    yp_ref[:, 0:1, 0:Wp, :] = zero_row
    yp_ref[:, H + 1:H + 2, 0:Wp, :] = zero_row
    zero_col = jnp.zeros((N, H, 8, C), jnp.float32)
    yp_ref[:, 1:H + 1, 0:WPAD_L, :] = zero_col
    yp_ref[:, 1:H + 1, WPAD_L + W:Wp, :] = zero_col
    yp_ref[:, 1:H + 1, WPAD_L:WPAD_L + W, :] = y.reshape(N, H, W, C)

    wd = wd_ref[...]                                   # (9, C), loaded once
    acc = None
    for kh in range(3):
        for kw in range(3):
            w0 = WPAD_L - 1 + kw                       # scratch column of padded coord kw
            if stride == 1:
                tap = yp_ref[:, kh:kh + Ho, w0:w0 + Wo, :]
            else:
                # Only strided output positions are computed: strided sublane read along
                # W; the H stride phase is selected with a free major-dim reshape.
                tap = yp_ref[:, pl.ds(kh, stride * Ho), pl.ds(w0, Wo, stride), :]
                tap = tap.reshape(N, Ho, stride, Wo, C)[:, :, 0, :, :]
            k = kh * 3 + kw
            w_tap = wd[k:k + 1, :].reshape(1, 1, 1, C)   # value slice, no extra ref load
            contrib = tap * w_tap
            acc = contrib if acc is None else acc + contrib

    z = _bn(acc.reshape(N * Ho * Wo, C), g2_ref[...], b2_ref[...], relu6=True)

    # ---- stage 3: 1x1 project on the MXU + BN (+ residual) --------------------------
    out = jnp.dot(z.astype(jnp.bfloat16), w3_ref[...],
                  preferred_element_type=jnp.float32)
    out = _bn(out, g3_ref[...], b3_ref[...], relu6=False)
    if res_connect:
        out = out + x2d
    return out, Ho, Wo


def _bottleneck_kernel(*refs, N, H, W, block_cfgs):
    """Whole Bottleneck stack in one program; inter-block activations stay in VMEM.

    refs = (x2d, *all_block_params, o2d, yp_scratch)
      x2d : (N*H*W, 128)  channel-padded NHWC input, flattened to rows (f32)
      per block (has_expand): w1(bf16 128x128), g1, b1, wd(9x128 f32), g2, b2,
                              w3(bf16 128x128), g3, b3      (BN affine (1,128) f32)
      o2d : (N*Hf*Wf, 128) f32
      yp  : (N, H+2, W+16, 128) f32 depthwise scratch sized for the largest block
    """
    x_ref, o_ref, yp_ref = refs[0], refs[-2], refs[-1]
    x = x_ref[...]
    h, w = H, W
    i = 1
    for (stride, has_expand, res_connect) in block_cfgs:
        nparams = 9 if has_expand else 6
        x, h, w = _block_body(x, refs[i:i + nparams], yp_ref, N=N, H=h, W=w,
                              stride=stride, has_expand=has_expand,
                              res_connect=res_connect)
        i += nparams
    o_ref[...] = x


# ---------------------------------------------------------------------------
# Parameters (channel-padded to CPAD so all kernel operands are lane-dense)
# ---------------------------------------------------------------------------

def init_inverted_residual(key, in_ch, out_ch, expansion_factor):
    exp_ch = int(in_ch * expansion_factor)
    assert max(in_ch, out_ch, exp_ch) <= CPAD
    k1, k2, k3 = jax.random.split(key, 3)
    p = {}
    if expansion_factor != 1:
        # PyTorch weight (exp_ch, in_ch, 1, 1) -> stored as (in_ch, exp_ch), zero-padded
        w1 = 0.1 * jax.random.normal(k1, (in_ch, exp_ch), jnp.float32)
        p["w1"] = jnp.zeros((CPAD, CPAD), jnp.float32).at[:in_ch, :exp_ch].set(w1)
        p["g1"] = jnp.ones((1, CPAD), jnp.float32)
        p["b1"] = jnp.zeros((1, CPAD), jnp.float32)
    # PyTorch depthwise weight (exp_ch, 1, 3, 3) -> (9, exp_ch), zero-padded
    wd = 0.1 * jax.random.normal(k2, (9, exp_ch), jnp.float32)
    p["wd"] = jnp.zeros((9, CPAD), jnp.float32).at[:, :exp_ch].set(wd)
    p["g2"] = jnp.ones((1, CPAD), jnp.float32)
    p["b2"] = jnp.zeros((1, CPAD), jnp.float32)
    # PyTorch weight (out_ch, exp_ch, 1, 1) -> stored as (exp_ch, out_ch), zero-padded
    w3 = 0.1 * jax.random.normal(k3, (exp_ch, out_ch), jnp.float32)
    p["w3"] = jnp.zeros((CPAD, CPAD), jnp.float32).at[:exp_ch, :out_ch].set(w3)
    p["g3"] = jnp.ones((1, CPAD), jnp.float32)
    p["b3"] = jnp.zeros((1, CPAD), jnp.float32)
    return p


def init_bottleneck(key, in_ch, out_ch, stride, expansion_factor, repeat):
    keys = jax.random.split(key, repeat)
    params = [init_inverted_residual(keys[0], in_ch, out_ch, expansion_factor)]
    for i in range(1, repeat):
        params.append(init_inverted_residual(keys[i], out_ch, out_ch, expansion_factor))
    return params


# ---------------------------------------------------------------------------
# Bottleneck forward: one pallas_call for the whole repeat stack
# ---------------------------------------------------------------------------

def bottleneck_forward(x_nchw, params, in_ch, out_ch, stride, expansion_factor):
    N, C_in, H, W = x_nchw.shape
    assert C_in == in_ch
    has_expand = (expansion_factor != 1)

    # NCHW -> NHWC once, pad channels to 128 lanes once, flatten to (M, 128)
    x = jnp.transpose(x_nchw, (0, 2, 3, 1))
    x = jnp.pad(x, ((0, 0), (0, 0), (0, 0), (0, CPAD - in_ch)))
    x2d = x.reshape(N * H * W, CPAD)

    cfgs, flat = [], []
    cur_in, h, w = in_ch, H, W
    flops = 0
    for i, p in enumerate(params):
        s = stride if i == 0 else 1
        cfgs.append((s, has_expand, cur_in == out_ch and s == 1))
        if has_expand:
            flat += [p["w1"].astype(jnp.bfloat16), p["g1"], p["b1"]]
        flat += [p["wd"], p["g2"], p["b2"],
                 p["w3"].astype(jnp.bfloat16), p["g3"], p["b3"]]
        ho, wo = (h - 1) // s + 1, (w - 1) // s + 1
        if has_expand:
            flops += 2 * N * h * w * CPAD * CPAD
        flops += 2 * N * ho * wo * 9 * CPAD + 2 * N * ho * wo * CPAD * CPAD
        cur_in, h, w = out_ch, ho, wo
    Hf, Wf = h, w
    Mo = N * Hf * Wf

    bytes_accessed = 4 * (int(x2d.size) + Mo * CPAD) \
        + sum(int(a.size) * a.dtype.itemsize for a in flat)

    kern = functools.partial(_bottleneck_kernel, N=N, H=H, W=W,
                             block_cfgs=tuple(cfgs))

    out2d = pl.pallas_call(
        kern,
        out_shape=jax.ShapeDtypeStruct((Mo, CPAD), jnp.float32),
        in_specs=[_vmem()] * (1 + len(flat)),
        out_specs=_vmem(),
        # scratch sized for the largest (first) block; later blocks use sub-slices
        scratch_shapes=[pltpu.VMEM((N, H + 2, W + WPAD_L + 8, CPAD), jnp.float32)],
        compiler_params=pltpu.CompilerParams(vmem_limit_bytes=32 * 1024 * 1024),
        cost_estimate=pl.CostEstimate(flops=int(flops),
                                      transcendentals=3 * CPAD * len(params),
                                      bytes_accessed=int(bytes_accessed)),
    )(x2d, *flat)

    # strip channel padding, back to NCHW to match the PyTorch module output
    out = out2d.reshape(N, Hf, Wf, CPAD)[:, :, :, :out_ch]
    return jnp.transpose(out, (0, 3, 1, 2))


if __name__ == "__main__":
    key = jax.random.PRNGKey(0)
    kx, kp = jax.random.split(key)

    # Bottleneck(in_channels=4, out_channels=8, stride=2, expansion_factor=6, repeat=2)
    in_ch, out_ch, stride, expansion, repeat = 4, 8, 2, 6, 2
    x = jax.random.normal(kx, (2, in_ch, 16, 16), jnp.float32)   # NCHW like PyTorch

    params = init_bottleneck(kp, in_ch, out_ch, stride, expansion, repeat)

    fwd = jax.jit(functools.partial(bottleneck_forward, in_ch=in_ch, out_ch=out_ch,
                                    stride=stride, expansion_factor=expansion))
    out = jax.block_until_ready(fwd(x, params))

    assert out.shape == (2, out_ch, 8, 8), out.shape
    assert bool(jnp.all(jnp.isfinite(out)))
    print("KERNEL_OK")
</pallas_src>

<mosaic_0001>
module attributes {stable_mosaic.version = 11 : i64} {
  func.func @_bottleneck_kernel(%arg0: memref<512x128xf32, #tpu.memory_space<vmem>>, %arg1: memref<128x128xbf16, #tpu.memory_space<vmem>>, %arg2: memref<1x128xf32, #tpu.memory_space<vmem>>, %arg3: memref<1x128xf32, #tpu.memory_space<vmem>>, %arg4: memref<9x128xf32, #tpu.memory_space<vmem>>, %arg5: memref<1x128xf32, #tpu.memory_space<vmem>>, %arg6: memref<1x128xf32, #tpu.memory_space<vmem>>, %arg7: memref<128x128xbf16, #tpu.memory_space<vmem>>, %arg8: memref<1x128xf32, #tpu.memory_space<vmem>>, %arg9: memref<1x128xf32, #tpu.memory_space<vmem>>, %arg10: memref<128x128xbf16, #tpu.memory_space<vmem>>, %arg11: memref<1x128xf32, #tpu.memory_space<vmem>>, %arg12: memref<1x128xf32, #tpu.memory_space<vmem>>, %arg13: memref<9x128xf32, #tpu.memory_space<vmem>>, %arg14: memref<1x128xf32, #tpu.memory_space<vmem>>, %arg15: memref<1x128xf32, #tpu.memory_space<vmem>>, %arg16: memref<128x128xbf16, #tpu.memory_space<vmem>>, %arg17: memref<1x128xf32, #tpu.memory_space<vmem>>, %arg18: memref<1x128xf32, #tpu.memory_space<vmem>>, %arg19: memref<128x128xf32, #tpu.memory_space<vmem>>, %arg20: memref<2x18x32x128xf32, #tpu.memory_space<vmem>>) attributes {dimension_semantics = [], scalar_prefetch = 0 : i64, scratch_operands = 1 : i64, tpu.core_type = #tpu.core_type<tc>} {
    %c0 = arith.constant 0 : index
    %c0_0 = arith.constant 0 : index
    %0 = vector.load %arg0[%c0, %c0_0] : memref<512x128xf32, #tpu.memory_space<vmem>>, vector<512x128xf32>
    %1 = arith.truncf %0 : vector<512x128xf32> to vector<512x128xbf16>
    %c0_1 = arith.constant 0 : index
    %c0_2 = arith.constant 0 : index
    %2 = vector.load %arg1[%c0_1, %c0_2] : memref<128x128xbf16, #tpu.memory_space<vmem>>, vector<128x128xbf16>
    %cst = arith.constant dense<0.000000e+00> : vector<512x128xf32>
    %3 = tpu.matmul %1, %2, %cst {dimension_numbers = #tpu.dot_dimension_numbers<[1], [0], [0], [1], [0, 0, 1, 1], [], []>} : vector<512x128xbf16>, vector<128x128xbf16>, vector<512x128xf32> -> vector<512x128xf32>
    %c0_3 = arith.constant 0 : index
    %c0_4 = arith.constant 0 : index
    %4 = vector.load %arg2[%c0_3, %c0_4] : memref<1x128xf32, #tpu.memory_space<vmem>>, vector<1x128xf32>
    %c0_5 = arith.constant 0 : index
    %c0_6 = arith.constant 0 : index
    %5 = vector.load %arg3[%c0_5, %c0_6] : memref<1x128xf32, #tpu.memory_space<vmem>>, vector<1x128xf32>
    %cst_7 = arith.constant dense<0.000000e+00> : vector<128xf32>
    %6 = vector.multi_reduction <add>, %3, %cst_7 [0] : vector<512x128xf32> to vector<128xf32>
    %7 = vector.shape_cast %6 : vector<128xf32> to vector<1x128xf32>
    %8 = arith.mulf %3, %3 : vector<512x128xf32>
    %cst_8 = arith.constant dense<0.000000e+00> : vector<128xf32>
    %9 = vector.multi_reduction <add>, %8, %cst_8 [0] : vector<512x128xf32> to vector<128xf32>
    %10 = vector.shape_cast %9 : vector<128xf32> to vector<1x128xf32>
    %cst_9 = arith.constant 0.001953125 : f32
    %11 = vector.broadcast %cst_9 : f32 to vector<1x128xf32>
    %12 = arith.mulf %7, %11 : vector<1x128xf32>
    %cst_10 = arith.constant 0.001953125 : f32
    %13 = vector.broadcast %cst_10 : f32 to vector<1x128xf32>
    %14 = arith.mulf %10, %13 : vector<1x128xf32>
    %15 = arith.mulf %12, %12 : vector<1x128xf32>
    %16 = arith.subf %14, %15 : vector<1x128xf32>
    %cst_11 = arith.constant 0.000000e+00 : f32
    %17 = vector.broadcast %cst_11 : f32 to vector<1x128xf32>
    %18 = arith.maximumf %16, %17 : vector<1x128xf32>
    %cst_12 = arith.constant 9.99999974E-6 : f32
    %19 = vector.broadcast %cst_12 : f32 to vector<1x128xf32>
    %20 = arith.addf %18, %19 : vector<1x128xf32>
    %21 = math.rsqrt %20 : vector<1x128xf32>
    %22 = arith.mulf %4, %21 : vector<1x128xf32>
    %23 = arith.mulf %12, %22 : vector<1x128xf32>
    %24 = arith.subf %5, %23 : vector<1x128xf32>
    %25 = vector.broadcast %22 : vector<1x128xf32> to vector<512x128xf32>
    %26 = arith.mulf %3, %25 : vector<512x128xf32>
    %27 = vector.broadcast %24 : vector<1x128xf32> to vector<512x128xf32>
    %28 = arith.addf %26, %27 : vector<512x128xf32>
    %cst_13 = arith.constant 0.000000e+00 : f32
    %cst_14 = arith.constant 6.000000e+00 : f32
    %29 = vector.broadcast %cst_13 : f32 to vector<512x128xf32>
    %30 = arith.maximumf %29, %28 : vector<512x128xf32>
    %31 = vector.broadcast %cst_14 : f32 to vector<512x128xf32>
    %32 = arith.minimumf %31, %30 : vector<512x128xf32>
    %cst_15 = arith.constant 0.000000e+00 : f32
    %33 = vector.broadcast %cst_15 : f32 to vector<2x1x32x128xf32>
    %c0_16 = arith.constant 0 : index
    %c0_17 = arith.constant 0 : index
    %c0_18 = arith.constant 0 : index
    %c0_19 = arith.constant 0 : index
    %34 = vector.load %arg20[%c0_16, %c0_17, %c0_18, %c0_19] : memref<2x18x32x128xf32, #tpu.memory_space<vmem>>, vector<2x1x32x128xf32>
    tpu.vector_store %arg20[%c0_16, %c0_17, %c0_18, %c0_19], %33 {strides = array<i32>} : memref<2x18x32x128xf32, #tpu.memory_space<vmem>>, vector<2x1x32x128xf32>,
    %c0_20 = arith.constant 0 : index
    %c17 = arith.constant 17 : index
    %c0_21 = arith.constant 0 : index
    %c0_22 = arith.constant 0 : index
    %35 = vector.load %arg20[%c0_20, %c17, %c0_21, %c0_22] : memref<2x18x32x128xf32, #tpu.memory_space<vmem>>, vector<2x1x32x128xf32>
    tpu.vector_store %arg20[%c0_20, %c17, %c0_21, %c0_22], %33 {strides = array<i32>} : memref<2x18x32x128xf32, #tpu.memory_space<vmem>>, vector<2x1x32x128xf32>,
    %cst_23 = arith.constant 0.000000e+00 : f32
    %36 = vector.broadcast %cst_23 : f32 to vector<2x16x8x128xf32>
    %c0_24 = arith.constant 0 : index
    %c1 = arith.constant 1 : index
    %c0_25 = arith.constant 0 : index
    %c0_26 = arith.constant 0 : index
    %37 = vector.load %arg20[%c0_24, %c1, %c0_25, %c0_26] : memref<2x18x32x128xf32, #tpu.memory_space<vmem>>, vector<2x16x8x128xf32>
    tpu.vector_store %arg20[%c0_24, %c1, %c0_25, %c0_26], %36 {strides = array<i32>} : memref<2x18x32x128xf32, #tpu.memory_space<vmem>>, vector<2x16x8x128xf32>,
    %c0_27 = arith.constant 0 : index
    %c1_28 = arith.constant 1 : index
    %c24 = arith.constant 24 : index
    %c0_29 = arith.constant 0 : index
    %38 = vector.load %arg20[%c0_27, %c1_28, %c24, %c0_29] : memref<2x18x32x128xf32, #tpu.memory_space<vmem>>, vector<2x16x8x128xf32>
    tpu.vector_store %arg20[%c0_27, %c1_28, %c24, %c0_29], %36 {strides = array<i32>} : memref<2x18x32x128xf32, #tpu.memory_space<vmem>>, vector<2x16x8x128xf32>,
    %39 = vector.shape_cast %32 : vector<512x128xf32> to vector<2x16x16x128xf32>
    %c0_30 = arith.constant 0 : index
    %c1_31 = arith.constant 1 : index
    %c8 = arith.constant 8 : index
    %c0_32 = arith.constant 0 : index
    %40 = vector.load %arg20[%c0_30, %c1_31, %c8, %c0_32] : memref<2x18x32x128xf32, #tpu.memory_space<vmem>>, vector<2x16x16x128xf32>
    tpu.vector_store %arg20[%c0_30, %c1_31, %c8, %c0_32], %39 {strides = array<i32>} : memref<2x18x32x128xf32, #tpu.memory_space<vmem>>, vector<2x16x16x128xf32>,
    %c0_33 = arith.constant 0 : index
    %c0_34 = arith.constant 0 : index
    %41 = vector.load %arg4[%c0_33, %c0_34] : memref<9x128xf32, #tpu.memory_space<vmem>>, vector<9x128xf32>
    %c0_35 = arith.constant 0 : index
    %c0_36 = arith.constant 0 : index
    %c7 = arith.constant 7 : index
    %c0_37 = arith.constant 0 : index
    %42 = tpu.strided_load %arg20[%c0_35, %c0_36, %c7, %c0_37] {strides = array<i32: 1, 1, 2, 1>} : memref<2x18x32x128xf32, #tpu.memory_space<vmem>>, vector<2x16x8x128xf32>
    %43 = vector.shape_cast %42 : vector<2x16x8x128xf32> to vector<2x8x2x8x128xf32>
    %44 = vector.extract_strided_slice %43 {offsets = [0, 0, 0, 0, 0], sizes = [2, 8, 1, 8, 128], strides = [1, 1, 1, 1, 1]} : vector<2x8x2x8x128xf32> to vector<2x8x1x8x128xf32>
    %45 = vector.shape_cast %44 : vector<2x8x1x8x128xf32> to vector<2x8x8x128xf32>
    %46 = vector.extract_strided_slice %41 {offsets = [0, 0], sizes = [1, 128], strides = [1, 1]} : vector<9x128xf32> to vector<1x128xf32>
    %47 = vector.shape_cast %46 : vector<1x128xf32> to vector<1x1x1x128xf32>
    %48 = vector.broadcast %47 : vector<1x1x1x128xf32> to vector<2x8x8x128xf32>
    %49 = arith.mulf %45, %48 : vector<2x8x8x128xf32>
    %c0_38 = arith.constant 0 : index
    %c0_39 = arith.constant 0 : index
    %c8_40 = arith.constant 8 : index
    %c0_41 = arith.constant 0 : index
    %50 = tpu.strided_load %arg20[%c0_38, %c0_39, %c8_40, %c0_41] {strides = array<i32: 1, 1, 2, 1>} : memref<2x18x32x128xf32, #tpu.memory_space<vmem>>, vector<2x16x8x128xf32>
    %51 = vector.shape_cast %50 : vector<2x16x8x128xf32> to vector<2x8x2x8x128xf32>
    %52 = vector.extract_strided_slice %51 {offsets = [0, 0, 0, 0, 0], sizes = [2, 8, 1, 8, 128], strides = [1, 1, 1, 1, 1]} : vector<2x8x2x8x128xf32> to vector<2x8x1x8x128xf32>
    %53 = vector.shape_cast %52 : vector<2x8x1x8x128xf32> to vector<2x8x8x128xf32>
    %54 = vector.extract_strided_slice %41 {offsets = [1, 0], sizes = [1, 128], strides = [1, 1]} : vector<9x128xf32> to vector<1x128xf32>
    %55 = vector.shape_cast %54 : vector<1x128xf32> to vector<1x1x1x128xf32>
    %56 = vector.broadcast %55 : vector<1x1x1x128xf32> to vector<2x8x8x128xf32>
    %57 = arith.mulf %53, %56 : vector<2x8x8x128xf32>
    %58 = arith.addf %49, %57 : vector<2x8x8x128xf32>
    %c0_42 = arith.constant 0 : index
    %c0_43 = arith.constant 0 : index
    %c9 = arith.constant 9 : index
    %c0_44 = arith.constant 0 : index
    %59 = tpu.strided_load %arg20[%c0_42, %c0_43, %c9, %c0_44] {strides = array<i32: 1, 1, 2, 1>} : memref<2x18x32x128xf32, #tpu.memory_space<vmem>>, vector<2x16x8x128xf32>
    %60 = vector.shape_cast %59 : vector<2x16x8x128xf32> to vector<2x8x2x8x128xf32>
    %61 = vector.extract_strided_slice %60 {offsets = [0, 0, 0, 0, 0], sizes = [2, 8, 1, 8, 128], strides = [1, 1, 1, 1, 1]} : vector<2x8x2x8x128xf32> to vector<2x8x1x8x128xf32>
    %62 = vector.shape_cast %61 : vector<2x8x1x8x128xf32> to vector<2x8x8x128xf32>
    %63 = vector.extract_strided_slice %41 {offsets = [2, 0], sizes = [1, 128], strides = [1, 1]} : vector<9x128xf32> to vector<1x128xf32>
    %64 = vector.shape_cast %63 : vector<1x128xf32> to vector<1x1x1x128xf32>
    %65 = vector.broadcast %64 : vector<1x1x1x128xf32> to vector<2x8x8x128xf32>
    %66 = arith.mulf %62, %65 : vector<2x8x8x128xf32>
    %67 = arith.addf %58, %66 : vector<2x8x8x128xf32>
    %c0_45 = arith.constant 0 : index
    %c1_46 = arith.constant 1 : index
    %c7_47 = arith.constant 7 : index
    %c0_48 = arith.constant 0 : index
    %68 = tpu.strided_load %arg20[%c0_45, %c1_46, %c7_47, %c0_48] {strides = array<i32: 1, 1, 2, 1>} : memref<2x18x32x128xf32, #tpu.memory_space<vmem>>, vector<2x16x8x128xf32>
    %69 = vector.shape_cast %68 : vector<2x16x8x128xf32> to vector<2x8x2x8x128xf32>
    %70 = vector.extract_strided_slice %69 {offsets = [0, 0, 0, 0, 0], sizes = [2, 8, 1, 8, 128], strides = [1, 1, 1, 1, 1]} : vector<2x8x2x8x128xf32> to vector<2x8x1x8x128xf32>
    %71 = vector.shape_cast %70 : vector<2x8x1x8x128xf32> to vector<2x8x8x128xf32>
    %72 = vector.extract_strided_slice %41 {offsets = [3, 0], sizes = [1, 128], strides = [1, 1]} : vector<9x128xf32> to vector<1x128xf32>
    %73 = vector.shape_cast %72 : vector<1x128xf32> to vector<1x1x1x128xf32>
    %74 = vector.broadcast %73 : vector<1x1x1x128xf32> to vector<2x8x8x128xf32>
    %75 = arith.mulf %71, %74 : vector<2x8x8x128xf32>
    %76 = arith.addf %67, %75 : vector<2x8x8x128xf32>
    %c0_49 = arith.constant 0 : index
    %c1_50 = arith.constant 1 : index
    %c8_51 = arith.constant 8 : index
    %c0_52 = arith.constant 0 : index
    %77 = tpu.strided_load %arg20[%c0_49, %c1_50, %c8_51, %c0_52] {strides = array<i32: 1, 1, 2, 1>} : memref<2x18x32x128xf32, #tpu.memory_space<vmem>>, vector<2x16x8x128xf32>
    %78 = vector.shape_cast %77 : vector<2x16x8x128xf32> to vector<2x8x2x8x128xf32>
    %79 = vector.extract_strided_slice %78 {offsets = [0, 0, 0, 0, 0], sizes = [2, 8, 1, 8, 128], strides = [1, 1, 1, 1, 1]} : vector<2x8x2x8x128xf32> to vector<2x8x1x8x128xf32>
    %80 = vector.shape_cast %79 : vector<2x8x1x8x128xf32> to vector<2x8x8x128xf32>
    %81 = vector.extract_strided_slice %41 {offsets = [4, 0], sizes = [1, 128], strides = [1, 1]} : vector<9x128xf32> to vector<1x128xf32>
    %82 = vector.shape_cast %81 : vector<1x128xf32> to vector<1x1x1x128xf32>
    %83 = vector.broadcast %82 : vector<1x1x1x128xf32> to vector<2x8x8x128xf32>
    %84 = arith.mulf %80, %83 : vector<2x8x8x128xf32>
    %85 = arith.addf %76, %84 : vector<2x8x8x128xf32>
    %c0_53 = arith.constant 0 : index
    %c1_54 = arith.constant 1 : index
    %c9_55 = arith.constant 9 : index
    %c0_56 = arith.constant 0 : index
    %86 = tpu.strided_load %arg20[%c0_53, %c1_54, %c9_55, %c0_56] {strides = array<i32: 1, 1, 2, 1>} : memref<2x18x32x128xf32, #tpu.memory_space<vmem>>, vector<2x16x8x128xf32>
    %87 = vector.shape_cast %86 : vector<2x16x8x128xf32> to vector<2x8x2x8x128xf32>
    %88 = vector.extract_strided_slice %87 {offsets = [0, 0, 0, 0, 0], sizes = [2, 8, 1, 8, 128], strides = [1, 1, 1, 1, 1]} : vector<2x8x2x8x128xf32> to vector<2x8x1x8x128xf32>
    %89 = vector.shape_cast %88 : vector<2x8x1x8x128xf32> to vector<2x8x8x128xf32>
    %90 = vector.extract_strided_slice %41 {offsets = [5, 0], sizes = [1, 128], strides = [1, 1]} : vector<9x128xf32> to vector<1x128xf32>
    %91 = vector.shape_cast %90 : vector<1x128xf32> to vector<1x1x1x128xf32>
    %92 = vector.broadcast %91 : vector<1x1x1x128xf32> to vector<2x8x8x128xf32>
    %93 = arith.mulf %89, %92 : vector<2x8x8x128xf32>
    %94 = arith.addf %85, %93 : vector<2x8x8x128xf32>
    %c0_57 = arith.constant 0 : index
    %c2 = arith.constant 2 : index
    %c7_58 = arith.constant 7 : index
    %c0_59 = arith.constant 0 : index
    %95 = tpu.strided_load %arg20[%c0_57, %c2, %c7_58, %c0_59] {strides = array<i32: 1, 1, 2, 1>} : memref<2x18x32x128xf32, #tpu.memory_space<vmem>>, vector<2x16x8x128xf32>
    %96 = vector.shape_cast %95 : vector<2x16x8x128xf32> to vector<2x8x2x8x128xf32>
    %97 = vector.extract_strided_slice %96 {offsets = [0, 0, 0, 0, 0], sizes = [2, 8, 1, 8, 128], strides = [1, 1, 1, 1, 1]} : vector<2x8x2x8x128xf32> to vector<2x8x1x8x128xf32>
    %98 = vector.shape_cast %97 : vector<2x8x1x8x128xf32> to vector<2x8x8x128xf32>
    %99 = vector.extract_strided_slice %41 {offsets = [6, 0], sizes = [1, 128], strides = [1, 1]} : vector<9x128xf32> to vector<1x128xf32>
    %100 = vector.shape_cast %99 : vector<1x128xf32> to vector<1x1x1x128xf32>
    %101 = vector.broadcast %100 : vector<1x1x1x128xf32> to vector<2x8x8x128xf32>
    %102 = arith.mulf %98, %101 : vector<2x8x8x128xf32>
    %103 = arith.addf %94, %102 : vector<2x8x8x128xf32>
    %c0_60 = arith.constant 0 : index
    %c2_61 = arith.constant 2 : index
    %c8_62 = arith.constant 8 : index
    %c0_63 = arith.constant 0 : index
    %104 = tpu.strided_load %arg20[%c0_60, %c2_61, %c8_62, %c0_63] {strides = array<i32: 1, 1, 2, 1>} : memref<2x18x32x128xf32, #tpu.memory_space<vmem>>, vector<2x16x8x128xf32>
    %105 = vector.shape_cast %104 : vector<2x16x8x128xf32> to vector<2x8x2x8x128xf32>
    %106 = vector.extract_strided_slice %105 {offsets = [0, 0, 0, 0, 0], sizes = [2, 8, 1, 8, 128], strides = [1, 1, 1, 1, 1]} : vector<2x8x2x8x128xf32> to vector<2x8x1x8x128xf32>
    %107 = vector.shape_cast %106 : vector<2x8x1x8x128xf32> to vector<2x8x8x128xf32>
    %108 = vector.extract_strided_slice %41 {offsets = [7, 0], sizes = [1, 128], strides = [1, 1]} : vector<9x128xf32> to vector<1x128xf32>
    %109 = vector.shape_cast %108 : vector<1x128xf32> to vector<1x1x1x128xf32>
    %110 = vector.broadcast %109 : vector<1x1x1x128xf32> to vector<2x8x8x128xf32>
    %111 = arith.mulf %107, %110 : vector<2x8x8x128xf32>
    %112 = arith.addf %103, %111 : vector<2x8x8x128xf32>
    %c0_64 = arith.constant 0 : index
    %c2_65 = arith.constant 2 : index
    %c9_66 = arith.constant 9 : index
    %c0_67 = arith.constant 0 : index
    %113 = tpu.strided_load %arg20[%c0_64, %c2_65, %c9_66, %c0_67] {strides = array<i32: 1, 1, 2, 1>} : memref<2x18x32x128xf32, #tpu.memory_space<vmem>>, vector<2x16x8x128xf32>
    %114 = vector.shape_cast %113 : vector<2x16x8x128xf32> to vector<2x8x2x8x128xf32>
    %115 = vector.extract_strided_slice %114 {offsets = [0, 0, 0, 0, 0], sizes = [2, 8, 1, 8, 128], strides = [1, 1, 1, 1, 1]} : vector<2x8x2x8x128xf32> to vector<2x8x1x8x128xf32>
    %116 = vector.shape_cast %115 : vector<2x8x1x8x128xf32> to vector<2x8x8x128xf32>
    %117 = vector.extract_strided_slice %41 {offsets = [8, 0], sizes = [1, 128], strides = [1, 1]} : vector<9x128xf32> to vector<1x128xf32>
    %118 = vector.shape_cast %117 : vector<1x128xf32> to vector<1x1x1x128xf32>
    %119 = vector.broadcast %118 : vector<1x1x1x128xf32> to vector<2x8x8x128xf32>
    %120 = arith.mulf %116, %119 : vector<2x8x8x128xf32>
    %121 = arith.addf %112, %120 : vector<2x8x8x128xf32>
    %122 = vector.shape_cast %121 : vector<2x8x8x128xf32> to vector<128x128xf32>
    %c0_68 = arith.constant 0 : index
    %c0_69 = arith.constant 0 : index
    %123 = vector.load %arg5[%c0_68, %c0_69] : memref<1x128xf32, #tpu.memory_space<vmem>>, vector<1x128xf32>
    %c0_70 = arith.constant 0 : index
    %c0_71 = arith.constant 0 : index
    %124 = vector.load %arg6[%c0_70, %c0_71] : memref<1x128xf32, #tpu.memory_space<vmem>>, vector<1x128xf32>
    %cst_72 = arith.constant dense<0.000000e+00> : vector<128xf32>
    %125 = vector.multi_reduction <add>, %122, %cst_72 [0] : vector<128x128xf32> to vector<128xf32>
    %126 = vector.shape_cast %125 : vector<128xf32> to vector<1x128xf32>
    %127 = arith.mulf %122, %122 : vector<128x128xf32>
    %cst_73 = arith.constant dense<0.000000e+00> : vector<128xf32>
    %128 = vector.multi_reduction <add>, %127, %cst_73 [0] : vector<128x128xf32> to vector<128xf32>
    %129 = vector.shape_cast %128 : vector<128xf32> to vector<1x128xf32>
    %cst_74 = arith.constant 7.812500e-03 : f32
    %130 = vector.broadcast %cst_74 : f32 to vector<1x128xf32>
    %131 = arith.mulf %126, %130 : vector<1x128xf32>
    %cst_75 = arith.constant 7.812500e-03 : f32
    %132 = vector.broadcast %cst_75 : f32 to vector<1x128xf32>
    %133 = arith.mulf %129, %132 : vector<1x128xf32>
    %134 = arith.mulf %131, %131 : vector<1x128xf32>
    %135 = arith.subf %133, %134 : vector<1x128xf32>
    %cst_76 = arith.constant 0.000000e+00 : f32
    %136 = vector.broadcast %cst_76 : f32 to vector<1x128xf32>
    %137 = arith.maximumf %135, %136 : vector<1x128xf32>
    %cst_77 = arith.constant 9.99999974E-6 : f32
    %138 = vector.broadcast %cst_77 : f32 to vector<1x128xf32>
    %139 = arith.addf %137, %138 : vector<1x128xf32>
    %140 = math.rsqrt %139 : vector<1x128xf32>
    %141 = arith.mulf %123, %140 : vector<1x128xf32>
    %142 = arith.mulf %131, %141 : vector<1x128xf32>
    %143 = arith.subf %124, %142 : vector<1x128xf32>
    %144 = vector.broadcast %141 : vector<1x128xf32> to vector<128x128xf32>
    %145 = arith.mulf %122, %144 : vector<128x128xf32>
    %146 = vector.broadcast %143 : vector<1x128xf32> to vector<128x128xf32>
    %147 = arith.addf %145, %146 : vector<128x128xf32>
    %cst_78 = arith.constant 0.000000e+00 : f32
    %cst_79 = arith.constant 6.000000e+00 : f32
    %148 = vector.broadcast %cst_78 : f32 to vector<128x128xf32>
    %149 = arith.maximumf %148, %147 : vector<128x128xf32>
    %150 = vector.broadcast %cst_79 : f32 to vector<128x128xf32>
    %151 = arith.minimumf %150, %149 : vector<128x128xf32>
    %152 = arith.truncf %151 : vector<128x128xf32> to vector<128x128xbf16>
    %c0_80 = arith.constant 0 : index
    %c0_81 = arith.constant 0 : index
    %153 = vector.load %arg7[%c0_80, %c0_81] : memref<128x128xbf16, #tpu.memory_space<vmem>>, vector<128x128xbf16>
    %cst_82 = arith.constant dense<0.000000e+00> : vector<128x128xf32>
    %154 = tpu.matmul %152, %153, %cst_82 {dimension_numbers = #tpu.dot_dimension_numbers<[1], [0], [0], [1], [0, 0, 1, 1], [], []>} : vector<128x128xbf16>, vector<128x128xbf16>, vector<128x128xf32> -> vector<128x128xf32>
    %c0_83 = arith.constant 0 : index
    %c0_84 = arith.constant 0 : index
    %155 = vector.load %arg8[%c0_83, %c0_84] : memref<1x128xf32, #tpu.memory_space<vmem>>, vector<1x128xf32>
    %c0_85 = arith.constant 0 : index
    %c0_86 = arith.constant 0 : index
    %156 = vector.load %arg9[%c0_85, %c0_86] : memref<1x128xf32, #tpu.memory_space<vmem>>, vector<1x128xf32>
    %cst_87 = arith.constant dense<0.000000e+00> : vector<128xf32>
    %157 = vector.multi_reduction <add>, %154, %cst_87 [0] : vector<128x128xf32> to vector<128xf32>
    %158 = vector.shape_cast %157 : vector<128xf32> to vector<1x128xf32>
    %159 = arith.mulf %154, %154 : vector<128x128xf32>
    %cst_88 = arith.constant dense<0.000000e+00> : vector<128xf32>
    %160 = vector.multi_reduction <add>, %159, %cst_88 [0] : vector<128x128xf32> to vector<128xf32>
    %161 = vector.shape_cast %160 : vector<128xf32> to vector<1x128xf32>
    %cst_89 = arith.constant 7.812500e-03 : f32
    %162 = vector.broadcast %cst_89 : f32 to vector<1x128xf32>
    %163 = arith.mulf %158, %162 : vector<1x128xf32>
    %cst_90 = arith.constant 7.812500e-03 : f32
    %164 = vector.broadcast %cst_90 : f32 to vector<1x128xf32>
    %165 = arith.mulf %161, %164 : vector<1x128xf32>
    %166 = arith.mulf %163, %163 : vector<1x128xf32>
    %167 = arith.subf %165, %166 : vector<1x128xf32>
    %cst_91 = arith.constant 0.000000e+00 : f32
    %168 = vector.broadcast %cst_91 : f32 to vector<1x128xf32>
    %169 = arith.maximumf %167, %168 : vector<1x128xf32>
    %cst_92 = arith.constant 9.99999974E-6 : f32
    %170 = vector.broadcast %cst_92 : f32 to vector<1x128xf32>
    %171 = arith.addf %169, %170 : vector<1x128xf32>
    %172 = math.rsqrt %171 : vector<1x128xf32>
    %173 = arith.mulf %155, %172 : vector<1x128xf32>
    %174 = arith.mulf %163, %173 : vector<1x128xf32>
    %175 = arith.subf %156, %174 : vector<1x128xf32>
    %176 = vector.broadcast %173 : vector<1x128xf32> to vector<128x128xf32>
    %177 = arith.mulf %154, %176 : vector<128x128xf32>
    %178 = vector.broadcast %175 : vector<1x128xf32> to vector<128x128xf32>
    %179 = arith.addf %177, %178 : vector<128x128xf32>
    %180 = arith.truncf %179 : vector<128x128xf32> to vector<128x128xbf16>
    %c0_93 = arith.constant 0 : index
    %c0_94 = arith.constant 0 : index
    %181 = vector.load %arg10[%c0_93, %c0_94] : memref<128x128xbf16, #tpu.memory_space<vmem>>, vector<128x128xbf16>
    %cst_95 = arith.constant dense<0.000000e+00> : vector<128x128xf32>
    %182 = tpu.matmul %180, %181, %cst_95 {dimension_numbers = #tpu.dot_dimension_numbers<[1], [0], [0], [1], [0, 0, 1, 1], [], []>} : vector<128x128xbf16>, vector<128x128xbf16>, vector<128x128xf32> -> vector<128x128xf32>
    %c0_96 = arith.constant 0 : index
    %c0_97 = arith.constant 0 : index
    %183 = vector.load %arg11[%c0_96, %c0_97] : memref<1x128xf32, #tpu.memory_space<vmem>>, vector<1x128xf32>
    %c0_98 = arith.constant 0 : index
    %c0_99 = arith.constant 0 : index
    %184 = vector.load %arg12[%c0_98, %c0_99] : memref<1x128xf32, #tpu.memory_space<vmem>>, vector<1x128xf32>
    %cst_100 = arith.constant dense<0.000000e+00> : vector<128xf32>
    %185 = vector.multi_reduction <add>, %182, %cst_100 [0] : vector<128x128xf32> to vector<128xf32>
    %186 = vector.shape_cast %185 : vector<128xf32> to vector<1x128xf32>
    %187 = arith.mulf %182, %182 : vector<128x128xf32>
    %cst_101 = arith.constant dense<0.000000e+00> : vector<128xf32>
    %188 = vector.multi_reduction <add>, %187, %cst_101 [0] : vector<128x128xf32> to vector<128xf32>
    %189 = vector.shape_cast %188 : vector<128xf32> to vector<1x128xf32>
    %cst_102 = arith.constant 7.812500e-03 : f32
    %190 = vector.broadcast %cst_102 : f32 to vector<1x128xf32>
    %191 = arith.mulf %186, %190 : vector<1x128xf32>
    %cst_103 = arith.constant 7.812500e-03 : f32
    %192 = vector.broadcast %cst_103 : f32 to vector<1x128xf32>
    %193 = arith.mulf %189, %192 : vector<1x128xf32>
    %194 = arith.mulf %191, %191 : vector<1x128xf32>
    %195 = arith.subf %193, %194 : vector<1x128xf32>
    %cst_104 = arith.constant 0.000000e+00 : f32
    %196 = vector.broadcast %cst_104 : f32 to vector<1x128xf32>
    %197 = arith.maximumf %195, %196 : vector<1x128xf32>
    %cst_105 = arith.constant 9.99999974E-6 : f32
    %198 = vector.broadcast %cst_105 : f32 to vector<1x128xf32>
    %199 = arith.addf %197, %198 : vector<1x128xf32>
    %200 = math.rsqrt %199 : vector<1x128xf32>
    %201 = arith.mulf %183, %200 : vector<1x128xf32>
    %202 = arith.mulf %191, %201 : vector<1x128xf32>
    %203 = arith.subf %184, %202 : vector<1x128xf32>
    %204 = vector.broadcast %201 : vector<1x128xf32> to vector<128x128xf32>
    %205 = arith.mulf %182, %204 : vector<128x128xf32>
    %206 = vector.broadcast %203 : vector<1x128xf32> to vector<128x128xf32>
    %207 = arith.addf %205, %206 : vector<128x128xf32>
    %cst_106 = arith.constant 0.000000e+00 : f32
    %cst_107 = arith.constant 6.000000e+00 : f32
    %208 = vector.broadcast %cst_106 : f32 to vector<128x128xf32>
    %209 = arith.maximumf %208, %207 : vector<128x128xf32>
    %210 = vector.broadcast %cst_107 : f32 to vector<128x128xf32>
    %211 = arith.minimumf %210, %209 : vector<128x128xf32>
    %cst_108 = arith.constant 0.000000e+00 : f32
    %212 = vector.broadcast %cst_108 : f32 to vector<2x1x24x128xf32>
    %c0_109 = arith.constant 0 : index
    %c0_110 = arith.constant 0 : index
    %c0_111 = arith.constant 0 : index
    %c0_112 = arith.constant 0 : index
    %213 = vector.load %arg20[%c0_109, %c0_110, %c0_111, %c0_112] : memref<2x18x32x128xf32, #tpu.memory_space<vmem>>, vector<2x1x24x128xf32>
    tpu.vector_store %arg20[%c0_109, %c0_110, %c0_111, %c0_112], %212 {strides = array<i32>} : memref<2x18x32x128xf32, #tpu.memory_space<vmem>>, vector<2x1x24x128xf32>,
    %c0_113 = arith.constant 0 : index
    %c9_114 = arith.constant 9 : index
    %c0_115 = arith.constant 0 : index
    %c0_116 = arith.constant 0 : index
    %214 = vector.load %arg20[%c0_113, %c9_114, %c0_115, %c0_116] : memref<2x18x32x128xf32, #tpu.memory_space<vmem>>, vector<2x1x24x128xf32>
    tpu.vector_store %arg20[%c0_113, %c9_114, %c0_115, %c0_116], %212 {strides = array<i32>} : memref<2x18x32x128xf32, #tpu.memory_space<vmem>>, vector<2x1x24x128xf32>,
    %cst_117 = arith.constant 0.000000e+00 : f32
    %215 = vector.broadcast %cst_117 : f32 to vector<2x8x8x128xf32>
    %c0_118 = arith.constant 0 : index
    %c1_119 = arith.constant 1 : index
    %c0_120 = arith.constant 0 : index
    %c0_121 = arith.constant 0 : index
    %216 = vector.load %arg20[%c0_118, %c1_119, %c0_120, %c0_121] : memref<2x18x32x128xf32, #tpu.memory_space<vmem>>, vector<2x8x8x128xf32>
    tpu.vector_store %arg20[%c0_118, %c1_119, %c0_120, %c0_121], %215 {strides = array<i32>} : memref<2x18x32x128xf32, #tpu.memory_space<vmem>>, vector<2x8x8x128xf32>,
    %c0_122 = arith.constant 0 : index
    %c1_123 = arith.constant 1 : index
    %c16 = arith.constant 16 : index
    %c0_124 = arith.constant 0 : index
    %217 = vector.load %arg20[%c0_122, %c1_123, %c16, %c0_124] : memref<2x18x32x128xf32, #tpu.memory_space<vmem>>, vector<2x8x8x128xf32>
    tpu.vector_store %arg20[%c0_122, %c1_123, %c16, %c0_124], %215 {strides = array<i32>} : memref<2x18x32x128xf32, #tpu.memory_space<vmem>>, vector<2x8x8x128xf32>,
    %218 = vector.shape_cast %211 : vector<128x128xf32> to vector<2x8x8x128xf32>
    %c0_125 = arith.constant 0 : index
    %c1_126 = arith.constant 1 : index
    %c8_127 = arith.constant 8 : index
    %c0_128 = arith.constant 0 : index
    %219 = vector.load %arg20[%c0_125, %c1_126, %c8_127, %c0_128] : memref<2x18x32x128xf32, #tpu.memory_space<vmem>>, vector<2x8x8x128xf32>
    tpu.vector_store %arg20[%c0_125, %c1_126, %c8_127, %c0_128], %218 {strides = array<i32>} : memref<2x18x32x128xf32, #tpu.memory_space<vmem>>, vector<2x8x8x128xf32>,
    %c0_129 = arith.constant 0 : index
    %c0_130 = arith.constant 0 : index
    %220 = vector.load %arg13[%c0_129, %c0_130] : memref<9x128xf32, #tpu.memory_space<vmem>>, vector<9x128xf32>
    %c0_131 = arith.constant 0 : index
    %c0_132 = arith.constant 0 : index
    %c7_133 = arith.constant 7 : index
    %c0_134 = arith.constant 0 : index
    %221 = vector.load %arg20[%c0_131, %c0_132, %c7_133, %c0_134] : memref<2x18x32x128xf32, #tpu.memory_space<vmem>>, vector<2x8x8x128xf32>
    %222 = vector.extract_strided_slice %220 {offsets = [0, 0], sizes = [1, 128], strides = [1, 1]} : vector<9x128xf32> to vector<1x128xf32>
    %223 = vector.shape_cast %222 : vector<1x128xf32> to vector<1x1x1x128xf32>
    %224 = vector.broadcast %223 : vector<1x1x1x128xf32> to vector<2x8x8x128xf32>
    %225 = arith.mulf %221, %224 : vector<2x8x8x128xf32>
    %c0_135 = arith.constant 0 : index
    %c0_136 = arith.constant 0 : index
    %c8_137 = arith.constant 8 : index
    %c0_138 = arith.constant 0 : index
    %226 = vector.load %arg20[%c0_135, %c0_136, %c8_137, %c0_138] : memref<2x18x32x128xf32, #tpu.memory_space<vmem>>, vector<2x8x8x128xf32>
    %227 = vector.extract_strided_slice %220 {offsets = [1, 0], sizes = [1, 128], strides = [1, 1]} : vector<9x128xf32> to vector<1x128xf32>
    %228 = vector.shape_cast %227 : vector<1x128xf32> to vector<1x1x1x128xf32>
    %229 = vector.broadcast %228 : vector<1x1x1x128xf32> to vector<2x8x8x128xf32>
    %230 = arith.mulf %226, %229 : vector<2x8x8x128xf32>
    %231 = arith.addf %225, %230 : vector<2x8x8x128xf32>
    %c0_139 = arith.constant 0 : index
    %c0_140 = arith.constant 0 : index
    %c9_141 = arith.constant 9 : index
    %c0_142 = arith.constant 0 : index
    %232 = vector.load %arg20[%c0_139, %c0_140, %c9_141, %c0_142] : memref<2x18x32x128xf32, #tpu.memory_space<vmem>>, vector<2x8x8x128xf32>
    %233 = vector.extract_strided_slice %220 {offsets = [2, 0], sizes = [1, 128], strides = [1, 1]} : vector<9x128xf32> to vector<1x128xf32>
    %234 = vector.shape_cast %233 : vector<1x128xf32> to vector<1x1x1x128xf32>
    %235 = vector.broadcast %234 : vector<1x1x1x128xf32> to vector<2x8x8x128xf32>
    %236 = arith.mulf %232, %235 : vector<2x8x8x128xf32>
    %237 = arith.addf %231, %236 : vector<2x8x8x128xf32>
    %c0_143 = arith.constant 0 : index
    %c1_144 = arith.constant 1 : index
    %c7_145 = arith.constant 7 : index
    %c0_146 = arith.constant 0 : index
    %238 = vector.load %arg20[%c0_143, %c1_144, %c7_145, %c0_146] : memref<2x18x32x128xf32, #tpu.memory_space<vmem>>, vector<2x8x8x128xf32>
    %239 = vector.extract_strided_slice %220 {offsets = [3, 0], sizes = [1, 128], strides = [1, 1]} : vector<9x128xf32> to vector<1x128xf32>
    %240 = vector.shape_cast %239 : vector<1x128xf32> to vector<1x1x1x128xf32>
    %241 = vector.broadcast %240 : vector<1x1x1x128xf32> to vector<2x8x8x128xf32>
    %242 = arith.mulf %238, %241 : vector<2x8x8x128xf32>
    %243 = arith.addf %237, %242 : vector<2x8x8x128xf32>
    %c0_147 = arith.constant 0 : index
    %c1_148 = arith.constant 1 : index
    %c8_149 = arith.constant 8 : index
    %c0_150 = arith.constant 0 : index
    %244 = vector.load %arg20[%c0_147, %c1_148, %c8_149, %c0_150] : memref<2x18x32x128xf32, #tpu.memory_space<vmem>>, vector<2x8x8x128xf32>
    %245 = vector.extract_strided_slice %220 {offsets = [4, 0], sizes = [1, 128], strides = [1, 1]} : vector<9x128xf32> to vector<1x128xf32>
    %246 = vector.shape_cast %245 : vector<1x128xf32> to vector<1x1x1x128xf32>
    %247 = vector.broadcast %246 : vector<1x1x1x128xf32> to vector<2x8x8x128xf32>
    %248 = arith.mulf %244, %247 : vector<2x8x8x128xf32>
    %249 = arith.addf %243, %248 : vector<2x8x8x128xf32>
    %c0_151 = arith.constant 0 : index
    %c1_152 = arith.constant 1 : index
    %c9_153 = arith.constant 9 : index
    %c0_154 = arith.constant 0 : index
    %250 = vector.load %arg20[%c0_151, %c1_152, %c9_153, %c0_154] : memref<2x18x32x128xf32, #tpu.memory_space<vmem>>, vector<2x8x8x128xf32>
    %251 = vector.extract_strided_slice %220 {offsets = [5, 0], sizes = [1, 128], strides = [1, 1]} : vector<9x128xf32> to vector<1x128xf32>
    %252 = vector.shape_cast %251 : vector<1x128xf32> to vector<1x1x1x128xf32>
    %253 = vector.broadcast %252 : vector<1x1x1x128xf32> to vector<2x8x8x128xf32>
    %254 = arith.mulf %250, %253 : vector<2x8x8x128xf32>
    %255 = arith.addf %249, %254 : vector<2x8x8x128xf32>
    %c0_155 = arith.constant 0 : index
    %c2_156 = arith.constant 2 : index
    %c7_157 = arith.constant 7 : index
    %c0_158 = arith.constant 0 : index
    %256 = vector.load %arg20[%c0_155, %c2_156, %c7_157, %c0_158] : memref<2x18x32x128xf32, #tpu.memory_space<vmem>>, vector<2x8x8x128xf32>
    %257 = vector.extract_strided_slice %220 {offsets = [6, 0], sizes = [1, 128], strides = [1, 1]} : vector<9x128xf32> to vector<1x128xf32>
    %258 = vector.shape_cast %257 : vector<1x128xf32> to vector<1x1x1x128xf32>
    %259 = vector.broadcast %258 : vector<1x1x1x128xf32> to vector<2x8x8x128xf32>
    %260 = arith.mulf %256, %259 : vector<2x8x8x128xf32>
    %261 = arith.addf %255, %260 : vector<2x8x8x128xf32>
    %c0_159 = arith.constant 0 : index
    %c2_160 = arith.constant 2 : index
    %c8_161 = arith.constant 8 : index
    %c0_162 = arith.constant 0 : index
    %262 = vector.load %arg20[%c0_159, %c2_160, %c8_161, %c0_162] : memref<2x18x32x128xf32, #tpu.memory_space<vmem>>, vector<2x8x8x128xf32>
    %263 = vector.extract_strided_slice %220 {offsets = [7, 0], sizes = [1, 128], strides = [1, 1]} : vector<9x128xf32> to vector<1x128xf32>
    %264 = vector.shape_cast %263 : vector<1x128xf32> to vector<1x1x1x128xf32>
    %265 = vector.broadcast %264 : vector<1x1x1x128xf32> to vector<2x8x8x128xf32>
    %266 = arith.mulf %262, %265 : vector<2x8x8x128xf32>
    %267 = arith.addf %261, %266 : vector<2x8x8x128xf32>
    %c0_163 = arith.constant 0 : index
    %c2_164 = arith.constant 2 : index
    %c9_165 = arith.constant 9 : index
    %c0_166 = arith.constant 0 : index
    %268 = vector.load %arg20[%c0_163, %c2_164, %c9_165, %c0_166] : memref<2x18x32x128xf32, #tpu.memory_space<vmem>>, vector<2x8x8x128xf32>
    %269 = vector.extract_strided_slice %220 {offsets = [8, 0], sizes = [1, 128], strides = [1, 1]} : vector<9x128xf32> to vector<1x128xf32>
    %270 = vector.shape_cast %269 : vector<1x128xf32> to vector<1x1x1x128xf32>
    %271 = vector.broadcast %270 : vector<1x1x1x128xf32> to vector<2x8x8x128xf32>
    %272 = arith.mulf %268, %271 : vector<2x8x8x128xf32>
    %273 = arith.addf %267, %272 : vector<2x8x8x128xf32>
    %274 = vector.shape_cast %273 : vector<2x8x8x128xf32> to vector<128x128xf32>
    %c0_167 = arith.constant 0 : index
    %c0_168 = arith.constant 0 : index
    %275 = vector.load %arg14[%c0_167, %c0_168] : memref<1x128xf32, #tpu.memory_space<vmem>>, vector<1x128xf32>
    %c0_169 = arith.constant 0 : index
    %c0_170 = arith.constant 0 : index
    %276 = vector.load %arg15[%c0_169, %c0_170] : memref<1x128xf32, #tpu.memory_space<vmem>>, vector<1x128xf32>
    %cst_171 = arith.constant dense<0.000000e+00> : vector<128xf32>
    %277 = vector.multi_reduction <add>, %274, %cst_171 [0] : vector<128x128xf32> to vector<128xf32>
    %278 = vector.shape_cast %277 : vector<128xf32> to vector<1x128xf32>
    %279 = arith.mulf %274, %274 : vector<128x128xf32>
    %cst_172 = arith.constant dense<0.000000e+00> : vector<128xf32>
    %280 = vector.multi_reduction <add>, %279, %cst_172 [0] : vector<128x128xf32> to vector<128xf32>
    %281 = vector.shape_cast %280 : vector<128xf32> to vector<1x128xf32>
    %cst_173 = arith.constant 7.812500e-03 : f32
    %282 = vector.broadcast %cst_173 : f32 to vector<1x128xf32>
    %283 = arith.mulf %278, %282 : vector<1x128xf32>
    %cst_174 = arith.constant 7.812500e-03 : f32
    %284 = vector.broadcast %cst_174 : f32 to vector<1x128xf32>
    %285 = arith.mulf %281, %284 : vector<1x128xf32>
    %286 = arith.mulf %283, %283 : vector<1x128xf32>
    %287 = arith.subf %285, %286 : vector<1x128xf32>
    %cst_175 = arith.constant 0.000000e+00 : f32
    %288 = vector.broadcast %cst_175 : f32 to vector<1x128xf32>
    %289 = arith.maximumf %287, %288 : vector<1x128xf32>
    %cst_176 = arith.constant 9.99999974E-6 : f32
    %290 = vector.broadcast %cst_176 : f32 to vector<1x128xf32>
    %291 = arith.addf %289, %290 : vector<1x128xf32>
    %292 = math.rsqrt %291 : vector<1x128xf32>
    %293 = arith.mulf %275, %292 : vector<1x128xf32>
    %294 = arith.mulf %283, %293 : vector<1x128xf32>
    %295 = arith.subf %276, %294 : vector<1x128xf32>
    %296 = vector.broadcast %293 : vector<1x128xf32> to vector<128x128xf32>
    %297 = arith.mulf %274, %296 : vector<128x128xf32>
    %298 = vector.broadcast %295 : vector<1x128xf32> to vector<128x128xf32>
    %299 = arith.addf %297, %298 : vector<128x128xf32>
    %cst_177 = arith.constant 0.000000e+00 : f32
    %cst_178 = arith.constant 6.000000e+00 : f32
    %300 = vector.broadcast %cst_177 : f32 to vector<128x128xf32>
    %301 = arith.maximumf %300, %299 : vector<128x128xf32>
    %302 = vector.broadcast %cst_178 : f32 to vector<128x128xf32>
    %303 = arith.minimumf %302, %301 : vector<128x128xf32>
    %304 = arith.truncf %303 : vector<128x128xf32> to vector<128x128xbf16>
    %c0_179 = arith.constant 0 : index
    %c0_180 = arith.constant 0 : index
    %305 = vector.load %arg16[%c0_179, %c0_180] : memref<128x128xbf16, #tpu.memory_space<vmem>>, vector<128x128xbf16>
    %cst_181 = arith.constant dense<0.000000e+00> : vector<128x128xf32>
    %306 = tpu.matmul %304, %305, %cst_181 {dimension_numbers = #tpu.dot_dimension_numbers<[1], [0], [0], [1], [0, 0, 1, 1], [], []>} : vector<128x128xbf16>, vector<128x128xbf16>, vector<128x128xf32> -> vector<128x128xf32>
    %c0_182 = arith.constant 0 : index
    %c0_183 = arith.constant 0 : index
    %307 = vector.load %arg17[%c0_182, %c0_183] : memref<1x128xf32, #tpu.memory_space<vmem>>, vector<1x128xf32>
    %c0_184 = arith.constant 0 : index
    %c0_185 = arith.constant 0 : index
    %308 = vector.load %arg18[%c0_184, %c0_185] : memref<1x128xf32, #tpu.memory_space<vmem>>, vector<1x128xf32>
    %cst_186 = arith.constant dense<0.000000e+00> : vector<128xf32>
    %309 = vector.multi_reduction <add>, %306, %cst_186 [0] : vector<128x128xf32> to vector<128xf32>
    %310 = vector.shape_cast %309 : vector<128xf32> to vector<1x128xf32>
    %311 = arith.mulf %306, %306 : vector<128x128xf32>
    %cst_187 = arith.constant dense<0.000000e+00> : vector<128xf32>
    %312 = vector.multi_reduction <add>, %311, %cst_187 [0] : vector<128x128xf32> to vector<128xf32>
    %313 = vector.shape_cast %312 : vector<128xf32> to vector<1x128xf32>
    %cst_188 = arith.constant 7.812500e-03 : f32
    %314 = vector.broadcast %cst_188 : f32 to vector<1x128xf32>
    %315 = arith.mulf %310, %314 : vector<1x128xf32>
    %cst_189 = arith.constant 7.812500e-03 : f32
    %316 = vector.broadcast %cst_189 : f32 to vector<1x128xf32>
    %317 = arith.mulf %313, %316 : vector<1x128xf32>
    %318 = arith.mulf %315, %315 : vector<1x128xf32>
    %319 = arith.subf %317, %318 : vector<1x128xf32>
    %cst_190 = arith.constant 0.000000e+00 : f32
    %320 = vector.broadcast %cst_190 : f32 to vector<1x128xf32>
    %321 = arith.maximumf %319, %320 : vector<1x128xf32>
    %cst_191 = arith.constant 9.99999974E-6 : f32
    %322 = vector.broadcast %cst_191 : f32 to vector<1x128xf32>
    %323 = arith.addf %321, %322 : vector<1x128xf32>
    %324 = math.rsqrt %323 : vector<1x128xf32>
    %325 = arith.mulf %307, %324 : vector<1x128xf32>
    %326 = arith.mulf %315, %325 : vector<1x128xf32>
    %327 = arith.subf %308, %326 : vector<1x128xf32>
    %328 = vector.broadcast %325 : vector<1x128xf32> to vector<128x128xf32>
    %329 = arith.mulf %306, %328 : vector<128x128xf32>
    %330 = vector.broadcast %327 : vector<1x128xf32> to vector<128x128xf32>
    %331 = arith.addf %329, %330 : vector<128x128xf32>
    %332 = arith.addf %331, %179 : vector<128x128xf32>
    %c0_192 = arith.constant 0 : index
    %c0_193 = arith.constant 0 : index
    %333 = vector.load %arg19[%c0_192, %c0_193] : memref<128x128xf32, #tpu.memory_space<vmem>>, vector<128x128xf32>
    tpu.vector_store %arg19[%c0_192, %c0_193], %332 {strides = array<i32>} : memref<128x128xf32, #tpu.memory_space<vmem>>, vector<128x128xf32>,
    return
  }
}

</mosaic_0001>

<bundles_post_ra>
// kernel: bottleneck_forward.1
= control target key start
LH: loop header
LB: loop body
LE: loop exit
PB: predicated region body
PF: predicated region fallthrough
CT: control target
= control target key end

     0   :  { %s6842_s1 = inlined_call_operand.vmem [shape: bf16[128,128], index: 1, kind: input, shape index: {}]   ;;  %s6843_s0 = inlined_call_operand.vmem [shape: f32[512,128], index: 0, kind: input, shape index: {}]   ;;  %s6844_s4 = inlined_call_operand.vmem [shape: f32[9,128], index: 4, kind: input, shape index: {}]   ;;  %s6845_s7 = inlined_call_operand.vmem [shape: bf16[128,128], index: 7, kind: input, shape index: {}]   ;;  %s6846_s2 = inlined_call_operand.vmem [shape: f32[1,128], index: 2, kind: input, shape index: {}]   ;;  %s6847_s3 = inlined_call_operand.vmem [shape: f32[1,128], index: 3, kind: input, shape index: {}]   ;;  %s6848_s5 = inlined_call_operand.vmem [shape: f32[1,128], index: 5, kind: input, shape index: {}]   ;;  %s6849_s6 = inlined_call_operand.vmem [shape: f32[1,128], index: 6, kind: input, shape index: {}]   ;;  %s6850_s10 = inlined_call_operand.vmem [shape: bf16[128,128], index: 10, kind: input, shape index: {}]   ;;  %s6851_s8 = inlined_call_operand.vmem [shape: f32[1,128], index: 8, kind: input, shape index: {}]   ;;  %s6852_s9 = inlined_call_operand.vmem [shape: f32[1,128], index: 9, kind: input, shape index: {}]   ;;  %s6853_s16 = inlined_call_operand.vmem [shape: bf16[128,128], index: 16, kind: input, shape index: {}]   ;;  %s6854_s13 = inlined_call_operand.vmem [shape: f32[9,128], index: 13, kind: input, shape index: {}]   ;;  %s6855_s11 = inlined_call_operand.vmem [shape: f32[1,128], index: 11, kind: input, shape index: {}]   ;;  %s6856_s12 = inlined_call_operand.vmem [shape: f32[1,128], index: 12, kind: input, shape index: {}]   ;;  %s6857_s14 = inlined_call_operand.vmem [shape: f32[1,128], index: 14, kind: input, shape index: {}]   ;;  %s6858_s15 = inlined_call_operand.vmem [shape: f32[1,128], index: 15, kind: input, shape index: {}]   ;;  %s6859_s17 = inlined_call_operand.vmem [shape: f32[1,128], index: 17, kind: input, shape index: {}]   ;;  %s6860_s18 = inlined_call_operand.vmem [shape: f32[1,128], index: 18, kind: input, shape index: {}]   ;;  %s6861_s19 = inlined_call_operand.vmem [shape: f32[128,128], index: 19, kind: output, shape index: {}]  }
   0x1   :  { %7002 = sst [smem:[#allocation62_spill]] %s6842_s1 }
   0x2   :  { %7003 = sst [smem:[#allocation63_spill]] %s6843_s0  ;;  %s7006_s20 = sld [smem:[#allocation62_spill]] }
   0x3   :  { %7004 = sst [smem:[#allocation64_spill]] %s6844_s4  ;;  %s7007_s26 = sld [smem:[#allocation63_spill]] }
   0x4   :  { %7005 = sst [smem:[#allocation65_spill]] %s6845_s7  ;;  %s7009_s24 = sld [smem:[#allocation64_spill]] }
   0x5   :  { %s7044_s7 = sld [smem:[#allocation65_spill]] }
   0x8   :  { %v3858_v0 = vld [vmem:[%s7006_s20] sm:$0xff]   ;;  %v3859_v1 = vld [vmem:[%s7006_s20 + $0x8] sm:$0xff]   ;;  %v3860_v2 = vld [vmem:[%s7006_s20 + $0x10] sm:$0xff]  }
   0x9   :  { %3681 = vmatprep.subr.bf16.mxu0 %v3858_v0  ;;  %v3861_v3 = vld [vmem:[%s7006_s20 + $0x18] sm:$0xff]   ;;  %v63_v4 = vld [vmem:[%s7007_s26] sm:$0xff]  ;;  %v64_v5 = vld [vmem:[%s7007_s26 + $0x8] sm:$0xff] }
   0xa   :  { %3682 = vmatpush3.bf16.msra.mxu0 %v3858_v0  ;;  %v127_v6 = vpack.c.bf16 %v64_v5, %v63_v4  ;;  %v3862_v7 = vld [vmem:[%s7006_s20 + $0x20] sm:$0xff]   ;;  %v3863_v8 = vld [vmem:[%s7006_s20 + $0x28] sm:$0xff]   ;;  %v3864_v9 = vld [vmem:[%s7006_s20 + $0x30] sm:$0xff]  }
   0xb   :  { %3683 = vmatprep.subr.bf16.mxu0 %v3859_v1  ;;  %v3865_v10 = vld [vmem:[%s7006_s20 + $0x38] sm:$0xff]   ;;  %v65_v11 = vld [vmem:[%s7007_s26 + $0x10] sm:$0xff]  ;;  %v67_v13 = vld [vmem:[%s7007_s26 + $0x20] sm:$0xff] }
   0xc   :  { %3697 = vmatprep.mubr.bf16.mxu0 %v127_v6  ;;  %v66_v12 = vld [vmem:[%s7007_s26 + $0x18] sm:$0xff]  ;;  %v68_v14 = vld [vmem:[%s7007_s26 + $0x28] sm:$0xff]  ;;  %v69_v17 = vld [vmem:[%s7007_s26 + $0x30] sm:$0xff] }
   0xd   :  { %v128_v15 = vpack.c.bf16 %v66_v12, %v65_v11  ;;  %v129_v16 = vpack.c.bf16 %v68_v14, %v67_v13  ;;  %v70_v18 = vld [vmem:[%s7007_s26 + $0x38] sm:$0xff]  ;;  %v71_v19 = vld [vmem:[%s7007_s26 + $0x40] sm:$0xff]  ;;  %v72_v20 = vld [vmem:[%s7007_s26 + $0x48] sm:$0xff] }
   0xe   :  { %3684 = vmatpush3.bf16.msra.mxu0 %v3859_v1  ;;  %v130_v21 = vpack.c.bf16 %v70_v18, %v69_v17  ;;  %v131_v22 = vpack.c.bf16 %v72_v20, %v71_v19  ;;  %v73_v23 = vld [vmem:[%s7007_s26 + $0x50] sm:$0xff]  ;;  %v74_v24 = vld [vmem:[%s7007_s26 + $0x58] sm:$0xff]  ;;  %v75_v25 = vld [vmem:[%s7007_s26 + $0x60] sm:$0xff] }
   0xf   :  { %3685 = vmatprep.subr.bf16.mxu0 %v3860_v2  ;;  %v76_v26 = vld [vmem:[%s7007_s26 + $0x68] sm:$0xff]  ;;  %v132_v27 = vpack.c.bf16 %v74_v24, %v73_v23  ;;  %v77_v29 = vld [vmem:[%s7007_s26 + $0x70] sm:$0xff]  ;;  %v78_v30 = vld [vmem:[%s7007_s26 + $0x78] sm:$0xff]  ;;  %v6868_v24 = vmov 0.0  }
  0x10   :  { %v133_v28 = vpack.c.bf16 %v76_v26, %v75_v25  ;;  %v79_v31 = vld [vmem:[%s7007_s26 + $0x80] sm:$0xff]  ;;  %v80_v32 = vld [vmem:[%s7007_s26 + $0x88] sm:$0xff]  ;;  %v134_v33 = vpack.c.bf16 %v78_v30, %v77_v29  ;;  %v81_v35 = vld [vmem:[%s7007_s26 + $0x90] sm:$0xff]  ;;  %1012 = vst [vmem:[#allocation2 + $0x20] sm:$0xff] %v6868_v24 }
  0x11   :  { %v135_v34 = vpack.c.bf16 %v80_v32, %v79_v31  ;;  %v82_v36 = vld [vmem:[%s7007_s26 + $0x98] sm:$0xff]  ;;  %v83_v37 = vld [vmem:[%s7007_s26 + $0xa0] sm:$0xff]  ;;  %v84_v38 = vld [vmem:[%s7007_s26 + $0xa8] sm:$0xff]  ;;  %994 = vst [vmem:[#allocation2] sm:$0xff] %v6868_v24 }
  0x12   :  { %3686 = vmatpush3.bf16.msra.mxu0 %v3860_v2  ;;  %v136_v39 = vpack.c.bf16 %v82_v36, %v81_v35  ;;  %v137_v40 = vpack.c.bf16 %v84_v38, %v83_v37  ;;  %v85_v41 = vld [vmem:[%s7007_s26 + $0xb0] sm:$0xff]  ;;  %v86_v42 = vld [vmem:[%s7007_s26 + $0xb8] sm:$0xff]  ;;  %v87_v43 = vld [vmem:[%s7007_s26 + $0xc0] sm:$0xff]  ;;  %995 = vst [vmem:[#allocation2 + $0x8] sm:$0xff] %v6868_v24 }
  0x13   :  { %3687 = vmatprep.subr.bf16.mxu0 %v3861_v3  ;;  %v88_v44 = vld [vmem:[%s7007_s26 + $0xc8] sm:$0xff]  ;;  %v138_v45 = vpack.c.bf16 %v86_v42, %v85_v41  ;;  %v89_v47 = vld [vmem:[%s7007_s26 + $0xd0] sm:$0xff]  ;;  %v90_v48 = vld [vmem:[%s7007_s26 + $0xd8] sm:$0xff]  ;;  %996 = vst [vmem:[#allocation2 + $0x10] sm:$0xff] %v6868_v24  ;;  %v727_v41 = vlaneseq }
  0x14   :  { %v139_v46 = vpack.c.bf16 %v88_v44, %v87_v43  ;;  %v91_v49 = vld [vmem:[%s7007_s26 + $0xe0] sm:$0xff]  ;;  %v92_v50 = vld [vmem:[%s7007_s26 + $0xe8] sm:$0xff]  ;;  %v140_v51 = vpack.c.bf16 %v90_v48, %v89_v47  ;;  %v93_v53 = vld [vmem:[%s7007_s26 + $0xf0] sm:$0xff]  ;;  %997 = vst [vmem:[#allocation2 + $0x18] sm:$0xff] %v6868_v24 }
  0x15   :  { %v141_v52 = vpack.c.bf16 %v92_v50, %v91_v49  ;;  %v94_v54 = vld [vmem:[%s7007_s26 + $0xf8] sm:$0xff]  ;;  %v95_v55 = vld [vmem:[%s7007_s26 + $0x100] sm:$0xff]  ;;  %v96_v56 = vld [vmem:[%s7007_s26 + $0x108] sm:$0xff]  ;;  %998 = vst [vmem:[#allocation2 + $0x240] sm:$0xff] %v6868_v24  ;;  %v4261_v42 = vshrl.u32 %v727_v41, 7 }
  0x16   :  { %3688 = vmatpush3.bf16.msra.mxu0 %v3861_v3  ;;  %v142_v57 = vpack.c.bf16 %v94_v54, %v93_v53  ;;  %v143_v58 = vpack.c.bf16 %v96_v56, %v95_v55  ;;  %v97_v59 = vld [vmem:[%s7007_s26 + $0x110] sm:$0xff]  ;;  %v98_v60 = vld [vmem:[%s7007_s26 + $0x118] sm:$0xff]  ;;  %v99_v61 = vld [vmem:[%s7007_s26 + $0x120] sm:$0xff]  ;;  %999 = vst [vmem:[#allocation2 + $0x248] sm:$0xff] %v6868_v24 }
  0x17   :  { %3689 = vmatprep.subr.bf16.mxu0 %v3862_v7  ;;  %v100_v62 = vld [vmem:[%s7007_s26 + $0x128] sm:$0xff]  ;;  %v144_v63 = vpack.c.bf16 %v98_v60, %v97_v59  ;;  %v101_v1 = vld [vmem:[%s7007_s26 + $0x130] sm:$0xff]  ;;  %v102_v2 = vld [vmem:[%s7007_s26 + $0x138] sm:$0xff]  ;;  %1000 = vst [vmem:[#allocation2 + $0x250] sm:$0xff] %v6868_v24  ;;  %v6867_v43 = vsub.s32 1, %v4261_v42 }
  0x18   :  { %v145_v0 = vpack.c.bf16 %v100_v62, %v99_v61  ;;  %v103_v3 = vld [vmem:[%s7007_s26 + $0x140] sm:$0xff]  ;;  %v104_v4 = vld [vmem:[%s7007_s26 + $0x148] sm:$0xff]  ;;  %v146_v5 = vpack.c.bf16 %v102_v2, %v101_v1  ;;  %v109_v13 = vld [vmem:[%s7007_s26 + $0x170] sm:$0xff]  ;;  %1013 = vst [vmem:[#allocation2 + $0x40] sm:$0xff] %v6868_v24 }
  0x19   :  { %v147_v6 = vpack.c.bf16 %v104_v4, %v103_v3  ;;  %v110_v14 = vld [vmem:[%s7007_s26 + $0x178] sm:$0xff]  ;;  %v113_v19 = vld [vmem:[%s7007_s26 + $0x190] sm:$0xff]  ;;  %1014 = vst [vmem:[#allocation2 + $0x60] sm:$0xff] %v6868_v24  ;;  %1015 = vst [vmem:[#allocation2 + $0x80] sm:$0xff] %v6868_v24 }
  0x1a   :  { %3690 = vmatpush3.bf16.msra.mxu0 %v3862_v7  ;;  %v105_v7 = vld [vmem:[%s7007_s26 + $0x150] sm:$0xff]  ;;  %v150_v17 = vpack.c.bf16 %v110_v14, %v109_v13  ;;  %v114_v20 = vld [vmem:[%s7007_s26 + $0x198] sm:$0xff]  ;;  %1016 = vst [vmem:[#allocation2 + $0xa0] sm:$0xff] %v6868_v24  ;;  %1017 = vst [vmem:[#allocation2 + $0xc0] sm:$0xff] %v6868_v24 }
  0x1b   :  { %3691 = vmatprep.subr.bf16.mxu0 %v3863_v8  ;;  %v152_v23 = vpack.c.bf16 %v114_v20, %v113_v19  ;;  %1018 = vst [vmem:[#allocation2 + $0xe0] sm:$0xff] %v6868_v24  ;;  %1019 = vst [vmem:[#allocation2 + $0x100] sm:$0xff] %v6868_v24  ;;  %v117_v26 = vld [vmem:[%s7007_s26 + $0x1b0] sm:$0xff]  ;;  %v120_v29 = vld [vmem:[%s7007_s26 + $0x1c8] sm:$0xff] }
  0x1c   :  { %1020 = vst [vmem:[#allocation2 + $0x120] sm:$0xff] %v6868_v24  ;;  %1021 = vst [vmem:[#allocation2 + $0x140] sm:$0xff] %v6868_v24  ;;  %v121_v32 = vld [vmem:[%s7007_s26 + $0x1d0] sm:$0xff]  ;;  %v124_v35 = vld [vmem:[%s7007_s26 + $0x1e8] sm:$0xff] }
  0x1d   :  { %1022 = vst [vmem:[#allocation2 + $0x160] sm:$0xff] %v6868_v24  ;;  %1023 = vst [vmem:[#allocation2 + $0x180] sm:$0xff] %v6868_v24  ;;  %v125_v38 = vld [vmem:[%s7007_s26 + $0x1f0] sm:$0xff]  ;;  %v1140_v44 = vld [vmem:[%s7009_s24] sm:$0xff] }
  0x1e   :  { %3692 = vmatpush3.bf16.msra.mxu0 %v3863_v8  ;;  %v106_v8 = vld [vmem:[%s7007_s26 + $0x158] sm:$0xff]  ;;  %1024 = vst [vmem:[#allocation2 + $0x1a0] sm:$0xff] %v6868_v24  ;;  %1025 = vst [vmem:[#allocation2 + $0x1c0] sm:$0xff] %v6868_v24  ;;  %v4276_v48 = vrot.slane %v1140_v44, %v6867_v43  ;;  %v1159_v50 = vld [vmem:[#allocation2 + $0x247] ss:$2 sm:$0xff] }
  0x1f   :  { %3693 = vmatprep.subr.bf16.mxu0 %v3864_v9  ;;  %v148_v11 = vpack.c.bf16 %v106_v8, %v105_v7  ;;  %1026 = vst [vmem:[#allocation2 + $0x1e0] sm:$0xff] %v6868_v24  ;;  %1027 = vst [vmem:[#allocation2 + $0x200] sm:$0xff] %v6868_v24  ;;  %v1279_v54 = vld [vmem:[#allocation2 + $0x249] ss:$2 sm:$0xff] }
  0x20   :  { %1028 = vst [vmem:[#allocation2 + $0x260] sm:$0xff] %v6868_v24  ;;  %1029 = vst [vmem:[#allocation2 + $0x280] sm:$0xff] %v6868_v24 }
  0x21   :  { %1030 = vst [vmem:[#allocation2 + $0x2a0] sm:$0xff] %v6868_v24  ;;  %1031 = vst [vmem:[#allocation2 + $0x2c0] sm:$0xff] %v6868_v24 }
  0x22   :  { %3694 = vmatpush3.bf16.msra.mxu0 %v3864_v9  ;;  %v107_v9 = vld [vmem:[%s7007_s26 + $0x160] sm:$0xff]  ;;  %1032 = vst [vmem:[#allocation2 + $0x2e0] sm:$0xff] %v6868_v24  ;;  %1033 = vst [vmem:[#allocation2 + $0x300] sm:$0xff] %v6868_v24 }
  0x23   :  { %3695 = vmatprep.subr.bf16.mxu0 %v3865_v10  ;;  %1034 = vst [vmem:[#allocation2 + $0x320] sm:$0xff] %v6868_v24  ;;  %1035 = vst [vmem:[#allocation2 + $0x340] sm:$0xff] %v6868_v24 }
  0x24   :  { %1036 = vst [vmem:[#allocation2 + $0x360] sm:$0xff] %v6868_v24  ;;  %1037 = vst [vmem:[#allocation2 + $0x380] sm:$0xff] %v6868_v24 }
  0x25   :  { %1038 = vst [vmem:[#allocation2 + $0x3a0] sm:$0xff] %v6868_v24  ;;  %1039 = vst [vmem:[#allocation2 + $0x3c0] sm:$0xff] %v6868_v24 }
  0x26   :  { %3696 = vmatpush3.bf16.msra.mxu0 %v3865_v10  ;;  %v108_v10 = vld [vmem:[%s7007_s26 + $0x168] sm:$0xff]  ;;  %1040 = vst [vmem:[#allocation2 + $0x3e0] sm:$0xff] %v6868_v24  ;;  %1041 = vst [vmem:[#allocation2 + $0x400] sm:$0xff] %v6868_v24 }
  0x27   :  { %v149_v12 = vpack.c.bf16 %v108_v10, %v107_v9  ;;  %1042 = vst [vmem:[#allocation2 + $0x420] sm:$0xff] %v6868_v24  ;;  %1043 = vst [vmem:[#allocation2 + $0x440] sm:$0xff] %v6868_v24 }
  0x28   :  { %7008 = vst [vmem:[#allocation3_spill] sm:$0xff] %v4261_v42  ;;  %7012 = vst [vmem:[#allocation6_spill] sm:$0xff] %v4276_v48 }
  0x29   :  { %3698 = vmatmul.mubr.bf16.vlgmr.msra.gmra.mrb[0].mxu0 %v128_v15  ;;  %v111_v15 = vld [vmem:[%s7007_s26 + $0x180] sm:$0xff]  ;;  %2486 = vst [vmem:[#allocation2 + $0x240] sm:$0xff] %v6868_v24 }
  0x2a   :  { %3701 = vmatprep.mubr.bf16.mxu0 %v129_v16  ;;  %v112_v16 = vld [vmem:[%s7007_s26 + $0x188] sm:$0xff] }
  0x2b   :  { %v151_v18 = vpack.c.bf16 %v112_v16, %v111_v15 }
  0x31   :  { %3702 = vmatmul.mubr.bf16.gmra.mrb[4].mxu0 %v130_v21  ;;  %v115_v21 = vld [vmem:[%s7007_s26 + $0x1a0] sm:$0xff] }
  0x32   :  { %3705 = vmatprep.mubr.bf16.mxu0 %v131_v22  ;;  %v116_v22 = vld [vmem:[%s7007_s26 + $0x1a8] sm:$0xff] }
  0x33   :  { %v153_v25 = vpack.c.bf16 %v116_v22, %v115_v21 }
  0x39   :  { %3706 = vmatmul.mubr.bf16.gmra.mrb[8].mxu0 %v132_v27  ;;  %v118_v27 = vld [vmem:[%s7007_s26 + $0x1b8] sm:$0xff] }
  0x3a   :  { %3709 = vmatprep.mubr.bf16.mxu0 %v133_v28  ;;  %v119_v28 = vld [vmem:[%s7007_s26 + $0x1c0] sm:$0xff]  ;;  %v154_v30 = vpack.c.bf16 %v118_v27, %v117_v26 }
  0x3b   :  { %v155_v31 = vpack.c.bf16 %v120_v29, %v119_v28 }
  0x41   :  { %3710 = vmatmul.mubr.bf16.gmra.mrb[12].mxu0 %v134_v33  ;;  %v122_v33 = vld [vmem:[%s7007_s26 + $0x1d8] sm:$0xff] }
  0x42   :  { %3713 = vmatprep.mubr.bf16.mxu0 %v135_v34  ;;  %v123_v34 = vld [vmem:[%s7007_s26 + $0x1e0] sm:$0xff]  ;;  %v156_v36 = vpack.c.bf16 %v122_v33, %v121_v32 }
  0x43   :  { %v157_v37 = vpack.c.bf16 %v124_v35, %v123_v34 }
  0x49   :  { %3714 = vmatmul.mubr.bf16.gmra.mrb[16].mxu0 %v136_v39  ;;  %v126_v39 = vld [vmem:[%s7007_s26 + $0x1f8] sm:$0xff] }
  0x4a   :  { %3717 = vmatprep.mubr.bf16.mxu0 %v137_v40  ;;  %v158_v40 = vpack.c.bf16 %v126_v39, %v125_v38 }
  0x51   :  { %3718 = vmatmul.mubr.bf16.gmra.mrb[20].mxu0 %v138_v45  ;;  %v6866_v45 = vsub.s32 2, %v4261_v42 }
  0x52   :  { %3721 = vmatprep.mubr.bf16.mxu0 %v139_v46  ;;  %v4269_v46 = vsub.s32 0, %v4261_v42 }
  0x53   :  { %v4280_v49 = vrot.slane %v1140_v44, %v6866_v45 }
  0x54   :  { %7010 = vst [vmem:[#allocation4_spill] sm:$0xff] %v4269_v46  ;;  %v4272_v47 = vrot.slane %v1140_v44, %v4269_v46 }
  0x55   :  { %7013 = vst [vmem:[#allocation7_spill] sm:$0xff] %v4280_v49  ;;  %v1306_v55 = vmul.f32 %v4280_v49, %v1279_v54 }
  0x56   :  { %7011 = vst [vmem:[#allocation5_spill] sm:$0xff] %v4272_v47 }
  0x59   :  { %3722 = vmatmul.mubr.bf16.gmra.mrb[24].mxu0 %v140_v51  ;;  %v1211_v51 = vld [vmem:[#allocation2 + $0x248] ss:$2 sm:$0xff] }
  0x5a   :  { %3725 = vmatprep.mubr.bf16.mxu0 %v141_v52  ;;  %v1186_v52 = vmul.f32 %v4272_v47, %v1159_v50  ;;  %v1238_v53 = vmul.f32 %v4276_v48, %v1211_v51  ;;  %2487 = vst [vmem:[#allocation2 + $0x248] sm:$0xff] %v6868_v24  ;;  %2488 = vst [vmem:[#allocation2 + $0x250] sm:$0xff] %v6868_v24 }
  0x5c   :  { %v1254_v56 = vadd.f32 %v1238_v53, %v1186_v52 }
  0x61   :  { %3726 = vmatmul.mubr.bf16.gmra.mrb[28].mxu0 %v142_v57  ;;  %v4288_v57 = vadd.f32 %v1306_v55, %v1254_v56 }
  0x62   :  { %3729 = vmatprep.mubr.bf16.mxu0 %v143_v58 }
  0x63   :  { %7014 = vst [vmem:[#allocation8_spill] sm:$0xff] %v4288_v57 }
  0x69   :  { %3730 = vmatmul.mubr.bf16.gmra.mrb[32].mxu0 %v144_v63 }
  0x6a   :  { %3733 = vmatprep.mubr.bf16.mxu0 %v145_v0 }
  0x71   :  { %3734 = vmatmul.mubr.bf16.gmra.mrb[36].mxu0 %v146_v5 }
  0x72   :  { %3737 = vmatprep.mubr.bf16.mxu0 %v147_v6 }
  0x79   :  { %3738 = vmatmul.mubr.bf16.gmra.mrb[40].mxu0 %v148_v11 }
  0x7a   :  { %3741 = vmatprep.mubr.bf16.mxu0 %v149_v12 }
  0x81   :  { %3742 = vmatmul.mubr.bf16.gmra.mrb[44].mxu0 %v150_v17 }
  0x82   :  { %3745 = vmatprep.mubr.bf16.mxu0 %v151_v18 }
  0x89   :  { %3746 = vmatmul.mubr.bf16.gmra.mrb[48].mxu0 %v152_v23 }
  0x8a   :  { %3749 = vmatprep.mubr.bf16.mxu0 %v153_v25 }
  0x91   :  { %3750 = vmatmul.mubr.bf16.gmra.mrb[52].mxu0 %v154_v30 }
  0x92   :  { %3753 = vmatprep.mubr.bf16.mxu0 %v155_v31 }
  0x99   :  { %3754 = vmatmul.mubr.bf16.gmra.mrb[56].mxu0 %v156_v36 }
  0x9a   :  { %3757 = vmatprep.mubr.bf16.mxu0 %v157_v37 }
  0xa1   :  { %3758 = vmatmul.mubr.bf16.gmra.mrb[60].mxu0 %v158_v40 }
  0xfc   :  { %v4290_v58 = vpop.f32.mrb[0].mxu0 }
  0xfd   :  { %v4292_v59 = vpop.f32.mrb[1].mxu0  ;;  %v585_v1 = vmul.f32 %v4290_v58, %v4290_v58 }
  0xfe   :  { %v4294_v60 = vpop.f32.mrb[2].mxu0  ;;  %v583_v62 = vmul.f32 %v4292_v59, %v4292_v59 }
  0xff   :  { %v4296_v61 = vpop.f32.mrb[3].mxu0  ;;  %v586_v4 = vmul.f32 %v4294_v60, %v4294_v60 }
 0x100   :  { %v514_v63 = vadd.f32 %v4296_v61, %v4292_v59  ;;  %v584_v0 = vmul.f32 %v4296_v61, %v4296_v61 }
 0x102   :  { %v515_v2 = vadd.f32 %v4290_v58, %v514_v63  ;;  %v647_v3 = vadd.f32 %v584_v0, %v583_v62 }
 0x104   :  { %v648_v5 = vadd.f32 %v647_v3, %v585_v1  ;;  %v4309_v6 = vpop.f32.mrb[4].mxu0  ;;  %v516_v7 = vadd.f32 %v4294_v60, %v515_v2 }
 0x105   :  { %v4312_v8 = vpop.f32.mrb[5].mxu0  ;;  %v589_v17 = vmul.f32 %v4309_v6, %v4309_v6 }
 0x106   :  { %v517_v9 = vadd.f32 %v516_v7, %v4312_v8  ;;  %v587_v10 = vmul.f32 %v4312_v8, %v4312_v8  ;;  %v649_v11 = vadd.f32 %v648_v5, %v586_v4  ;;  %v4317_v12 = vpop.f32.mrb[6].mxu0 }
 0x107   :  { %v4319_v13 = vpop.f32.mrb[7].mxu0  ;;  %v590_v20 = vmul.f32 %v4317_v12, %v4317_v12 }
 0x108   :  { %v650_v14 = vadd.f32 %v649_v11, %v587_v10  ;;  %v518_v15 = vadd.f32 %v517_v9, %v4319_v13  ;;  %v588_v16 = vmul.f32 %v4319_v13, %v4319_v13 }
 0x10a   :  { %v519_v18 = vadd.f32 %v4309_v6, %v518_v15  ;;  %v651_v19 = vadd.f32 %v650_v14, %v588_v16 }
 0x10c   :  { %v652_v21 = vadd.f32 %v651_v19, %v589_v17  ;;  %v4329_v22 = vpop.f32.mrb[8].mxu0  ;;  %v520_v23 = vadd.f32 %v4317_v12, %v519_v18 }
 0x10d   :  { %v4332_v25 = vpop.f32.mrb[9].mxu0  ;;  %v593_v34 = vmul.f32 %v4329_v22, %v4329_v22 }
 0x10e   :  { %v521_v26 = vadd.f32 %v520_v23, %v4332_v25  ;;  %v591_v27 = vmul.f32 %v4332_v25, %v4332_v25  ;;  %v653_v28 = vadd.f32 %v652_v21, %v590_v20  ;;  %v4337_v29 = vpop.f32.mrb[10].mxu0 }
 0x10f   :  { %v4339_v30 = vpop.f32.mrb[11].mxu0  ;;  %v594_v37 = vmul.f32 %v4337_v29, %v4337_v29 }
 0x110   :  { %v654_v31 = vadd.f32 %v653_v28, %v591_v27  ;;  %v522_v32 = vadd.f32 %v521_v26, %v4339_v30  ;;  %v592_v33 = vmul.f32 %v4339_v30, %v4339_v30 }
 0x112   :  { %v523_v35 = vadd.f32 %v4329_v22, %v522_v32  ;;  %v655_v36 = vadd.f32 %v654_v31, %v592_v33 }
 0x114   :  { %v656_v38 = vadd.f32 %v655_v36, %v593_v34  ;;  %v4349_v39 = vpop.f32.mrb[12].mxu0  ;;  %v524_v40 = vadd.f32 %v4337_v29, %v523_v35 }
 0x115   :  { %v4352_v41 = vpop.f32.mrb[13].mxu0  ;;  %v597_v62 = vmul.f32 %v4349_v39, %v4349_v39 }
 0x116   :  { %v525_v44 = vadd.f32 %v524_v40, %v4352_v41  ;;  %v595_v50 = vmul.f32 %v4352_v41, %v4352_v41  ;;  %v657_v51 = vadd.f32 %v656_v38, %v594_v37  ;;  %v4357_v52 = vpop.f32.mrb[14].mxu0 }
 0x117   :  { %v4359_v53 = vpop.f32.mrb[15].mxu0  ;;  %v598_v1 = vmul.f32 %v4357_v52, %v4357_v52 }
 0x118   :  { %v658_v54 = vadd.f32 %v657_v51, %v595_v50  ;;  %v526_v55 = vadd.f32 %v525_v44, %v4359_v53  ;;  %v596_v56 = vmul.f32 %v4359_v53, %v4359_v53 }
 0x11a   :  { %v527_v63 = vadd.f32 %v4349_v39, %v526_v55  ;;  %v659_v0 = vadd.f32 %v658_v54, %v596_v56 }
 0x11c   :  { %v660_v2 = vadd.f32 %v659_v0, %v597_v62  ;;  %v4369_v3 = vpop.f32.mrb[16].mxu0  ;;  %v528_v4 = vadd.f32 %v4357_v52, %v527_v63 }
 0x11d   :  { %v4372_v5 = vpop.f32.mrb[17].mxu0  ;;  %v601_v18 = vmul.f32 %v4369_v3, %v4369_v3 }
 0x11e   :  { %v529_v7 = vadd.f32 %v528_v4, %v4372_v5  ;;  %v599_v9 = vmul.f32 %v4372_v5, %v4372_v5  ;;  %v661_v10 = vadd.f32 %v660_v2, %v598_v1  ;;  %v4377_v11 = vpop.f32.mrb[18].mxu0 }
 0x11f   :  { %v4379_v14 = vpop.f32.mrb[19].mxu0  ;;  %v602_v21 = vmul.f32 %v4377_v11, %v4377_v11 }
 0x120   :  { %v662_v15 = vadd.f32 %v661_v10, %v599_v9  ;;  %v530_v16 = vadd.f32 %v529_v7, %v4379_v14  ;;  %v600_v17 = vmul.f32 %v4379_v14, %v4379_v14 }
 0x122   :  { %v531_v19 = vadd.f32 %v4369_v3, %v530_v16  ;;  %v663_v20 = vadd.f32 %v662_v15, %v600_v17 }
 0x124   :  { %v664_v23 = vadd.f32 %v663_v20, %v601_v18  ;;  %v4389_v26 = vpop.f32.mrb[20].mxu0  ;;  %v532_v27 = vadd.f32 %v4377_v11, %v531_v19 }
 0x125   :  { %v4392_v28 = vpop.f32.mrb[21].mxu0  ;;  %v605_v40 = vmul.f32 %v4389_v26, %v4389_v26 }
 0x126   :  { %v533_v31 = vadd.f32 %v532_v27, %v4392_v28  ;;  %v603_v32 = vmul.f32 %v4392_v28, %v4392_v28  ;;  %v665_v33 = vadd.f32 %v664_v23, %v602_v21  ;;  %v4397_v34 = vpop.f32.mrb[22].mxu0 }
 0x127   :  { %v4399_v35 = vpop.f32.mrb[23].mxu0  ;;  %v606_v51 = vmul.f32 %v4397_v34, %v4397_v34 }
 0x128   :  { %v666_v36 = vadd.f32 %v665_v33, %v603_v32  ;;  %v534_v37 = vadd.f32 %v533_v31, %v4399_v35  ;;  %v604_v38 = vmul.f32 %v4399_v35, %v4399_v35 }
 0x12a   :  { %v535_v44 = vadd.f32 %v4389_v26, %v534_v37  ;;  %v667_v50 = vadd.f32 %v666_v36, %v604_v38 }
 0x12c   :  { %v668_v54 = vadd.f32 %v667_v50, %v605_v40  ;;  %v4409_v55 = vpop.f32.mrb[24].mxu0  ;;  %v536_v56 = vadd.f32 %v4397_v34, %v535_v44 }
 0x12d   :  { %v4412_v62 = vpop.f32.mrb[25].mxu0  ;;  %v609_v15 = vmul.f32 %v4409_v55, %v4409_v55 }
 0x12e   :  { %v537_v63 = vadd.f32 %v536_v56, %v4412_v62  ;;  %v607_v0 = vmul.f32 %v4412_v62, %v4412_v62  ;;  %v669_v1 = vadd.f32 %v668_v54, %v606_v51  ;;  %v4417_v2 = vpop.f32.mrb[26].mxu0 }
 0x12f   :  { %v4419_v4 = vpop.f32.mrb[27].mxu0  ;;  %v610_v18 = vmul.f32 %v4417_v2, %v4417_v2 }
 0x130   :  { %v670_v7 = vadd.f32 %v669_v1, %v607_v0  ;;  %v538_v9 = vadd.f32 %v537_v63, %v4419_v4  ;;  %v608_v10 = vmul.f32 %v4419_v4, %v4419_v4 }
 0x132   :  { %v539_v16 = vadd.f32 %v4409_v55, %v538_v9  ;;  %v671_v17 = vadd.f32 %v670_v7, %v608_v10 }
 0x134   :  { %v672_v19 = vadd.f32 %v671_v17, %v609_v15  ;;  %v4429_v20 = vpop.f32.mrb[28].mxu0  ;;  %v540_v21 = vadd.f32 %v4417_v2, %v539_v16 }
 0x135   :  { %v4432_v23 = vpop.f32.mrb[29].mxu0  ;;  %v613_v44 = vmul.f32 %v4429_v20, %v4429_v20 }
 0x136   :  { %v541_v27 = vadd.f32 %v540_v21, %v4432_v23  ;;  %v611_v31 = vmul.f32 %v4432_v23, %v4432_v23  ;;  %v673_v32 = vadd.f32 %v672_v19, %v610_v18  ;;  %v4437_v33 = vpop.f32.mrb[30].mxu0 }
 0x137   :  { %7015 = vst [vmem:[#allocation9_spill] sm:$0xff] %v4437_v33  ;;  %v4439_v36 = vpop.f32.mrb[31].mxu0  ;;  %v614_v54 = vmul.f32 %v4437_v33, %v4437_v33 }
 0x138   :  { %v674_v37 = vadd.f32 %v673_v32, %v611_v31  ;;  %v542_v38 = vadd.f32 %v541_v27, %v4439_v36  ;;  %v612_v40 = vmul.f32 %v4439_v36, %v4439_v36 }
 0x13a   :  { %v543_v50 = vadd.f32 %v4429_v20, %v542_v38  ;;  %v675_v51 = vadd.f32 %v674_v37, %v612_v40 }
 0x13c   :  { %v676_v56 = vadd.f32 %v675_v51, %v613_v44  ;;  %v4449_v63 = vpop.f32.mrb[32].mxu0  ;;  %v544_v0 = vadd.f32 %v4437_v33, %v543_v50 }
 0x13d   :  { %7016 = vst [vmem:[#allocation10_spill] sm:$0xff] %v4449_v63  ;;  %v4452_v1 = vpop.f32.mrb[33].mxu0  ;;  %v617_v21 = vmul.f32 %v4449_v63, %v4449_v63 }
 0x13e   :  { %7017 = vst [vmem:[#allocation11_spill] sm:$0xff] %v4452_v1  ;;  %v545_v7 = vadd.f32 %v544_v0, %v4452_v1  ;;  %v615_v9 = vmul.f32 %v4452_v1, %v4452_v1  ;;  %v677_v10 = vadd.f32 %v676_v56, %v614_v54  ;;  %v4457_v15 = vpop.f32.mrb[34].mxu0  ;;  %v1195_v1 = vld [vmem:[#allocation2 + $0x8] ss:$2 sm:$0xff] }
 0x13f   :  { %7018 = vst [vmem:[#allocation12_spill] sm:$0xff] %v4457_v15  ;;  %v4459_v16 = vpop.f32.mrb[35].mxu0  ;;  %v618_v32 = vmul.f32 %v4457_v15, %v4457_v15 }
 0x140   :  { %7019 = vst [vmem:[#allocation13_spill] sm:$0xff] %v4459_v16  ;;  %v678_v17 = vadd.f32 %v677_v10, %v615_v9  ;;  %v546_v18 = vadd.f32 %v545_v7, %v4459_v16  ;;  %v616_v19 = vmul.f32 %v4459_v16, %v4459_v16 }
 0x142   :  { %v547_v27 = vadd.f32 %v4449_v63, %v546_v18  ;;  %v679_v31 = vadd.f32 %v678_v17, %v616_v19 }
 0x144   :  { %v680_v37 = vadd.f32 %v679_v31, %v617_v21  ;;  %v4469_v38 = vpop.f32.mrb[36].mxu0  ;;  %v548_v40 = vadd.f32 %v4457_v15, %v547_v27 }
 0x145   :  { %7020 = vst [vmem:[#allocation14_spill] sm:$0xff] %v4469_v38  ;;  %v4472_v44 = vpop.f32.mrb[37].mxu0  ;;  %v621_v17 = vmul.f32 %v4469_v38, %v4469_v38 }
 0x146   :  { %7021 = vst [vmem:[#allocation15_spill] sm:$0xff] %v4472_v44  ;;  %v549_v50 = vadd.f32 %v548_v40, %v4472_v44  ;;  %v619_v51 = vmul.f32 %v4472_v44, %v4472_v44  ;;  %v681_v54 = vadd.f32 %v680_v37, %v618_v32  ;;  %v4477_v56 = vpop.f32.mrb[38].mxu0 }
 0x147   :  { %7022 = vst [vmem:[#allocation16_spill] sm:$0xff] %v4477_v56  ;;  %v4479_v0 = vpop.f32.mrb[39].mxu0  ;;  %v622_v21 = vmul.f32 %v4477_v56, %v4477_v56 }
 0x148   :  { %7023 = vst [vmem:[#allocation17_spill] sm:$0xff] %v4479_v0  ;;  %v682_v7 = vadd.f32 %v681_v54, %v619_v51  ;;  %v550_v9 = vadd.f32 %v549_v50, %v4479_v0  ;;  %v620_v10 = vmul.f32 %v4479_v0, %v4479_v0 }
 0x14a   :  { %v551_v18 = vadd.f32 %v4469_v38, %v550_v9  ;;  %v683_v19 = vadd.f32 %v682_v7, %v620_v10 }
 0x14c   :  { %v684_v27 = vadd.f32 %v683_v19, %v621_v17  ;;  %v4489_v31 = vpop.f32.mrb[40].mxu0  ;;  %v552_v32 = vadd.f32 %v4477_v56, %v551_v18 }
 0x14d   :  { %7024 = vst [vmem:[#allocation18_spill] sm:$0xff] %v4489_v31  ;;  %v4492_v37 = vpop.f32.mrb[41].mxu0  ;;  %v625_v18 = vmul.f32 %v4489_v31, %v4489_v31 }
 0x14e   :  { %7025 = vst [vmem:[#allocation19_spill] sm:$0xff] %v4492_v37  ;;  %v553_v40 = vadd.f32 %v552_v32, %v4492_v37  ;;  %v623_v50 = vmul.f32 %v4492_v37, %v4492_v37  ;;  %v685_v51 = vadd.f32 %v684_v27, %v622_v21  ;;  %v4497_v54 = vpop.f32.mrb[42].mxu0 }
 0x14f   :  { %7026 = vst [vmem:[#allocation20_spill] sm:$0xff] %v4497_v54  ;;  %v4499_v9 = vpop.f32.mrb[43].mxu0  ;;  %v626_v45 = vmul.f32 %v4497_v54, %v4497_v54 }
 0x150   :  { %7027 = vst [vmem:[#allocation21_spill] sm:$0xff] %v4499_v9  ;;  %v686_v7 = vadd.f32 %v685_v51, %v623_v50  ;;  %v554_v10 = vadd.f32 %v553_v40, %v4499_v9  ;;  %v624_v17 = vmul.f32 %v4499_v9, %v4499_v9 }
 0x152   :  { %v555_v19 = vadd.f32 %v4489_v31, %v554_v10  ;;  %v687_v32 = vadd.f32 %v686_v7, %v624_v17 }
 0x154   :  { %v688_v21 = vadd.f32 %v687_v32, %v625_v18  ;;  %v4509_v27 = vpop.f32.mrb[44].mxu0  ;;  %v556_v43 = vadd.f32 %v4497_v54, %v555_v19 }
 0x155   :  { %7028 = vst [vmem:[#allocation22_spill] sm:$0xff] %v4509_v27  ;;  %v4512_v50 = vpop.f32.mrb[45].mxu0  ;;  %v629_v19 = vmul.f32 %v4509_v27, %v4509_v27 }
 0x156   :  { %7029 = vst [vmem:[#allocation23_spill] sm:$0xff] %v4512_v50  ;;  %v557_v40 = vadd.f32 %v556_v43, %v4512_v50  ;;  %v627_v51 = vmul.f32 %v4512_v50, %v4512_v50  ;;  %v689_v24 = vadd.f32 %v688_v21, %v626_v45  ;;  %v4517_v57 = vpop.f32.mrb[46].mxu0 }
 0x157   :  { %7030 = vst [vmem:[#allocation24_spill] sm:$0xff] %v4517_v57  ;;  %v4519_v10 = vpop.f32.mrb[47].mxu0  ;;  %v630_v42 = vmul.f32 %v4517_v57, %v4517_v57 }
 0x158   :  { %7031 = vst [vmem:[#allocation25_spill] sm:$0xff] %v4519_v10  ;;  %v690_v7 = vadd.f32 %v689_v24, %v627_v51  ;;  %v558_v17 = vadd.f32 %v557_v40, %v4519_v10  ;;  %v628_v18 = vmul.f32 %v4519_v10, %v4519_v10 }
 0x15a   :  { %v559_v32 = vadd.f32 %v4509_v27, %v558_v17  ;;  %v691_v43 = vadd.f32 %v690_v7, %v628_v18 }
 0x15c   :  { %v692_v45 = vadd.f32 %v691_v43, %v629_v19  ;;  %v4529_v21 = vpop.f32.mrb[48].mxu0  ;;  %v560_v50 = vadd.f32 %v4517_v57, %v559_v32 }
 0x15d   :  { %7032 = vst [vmem:[#allocation26_spill] sm:$0xff] %v4529_v21  ;;  %v4532_v24 = vpop.f32.mrb[49].mxu0  ;;  %v633_v32 = vmul.f32 %v4529_v21, %v4529_v21 }
 0x15e   :  { %7033 = vst [vmem:[#allocation27_spill] sm:$0xff] %v4532_v24  ;;  %v561_v40 = vadd.f32 %v560_v50, %v4532_v24  ;;  %v631_v51 = vmul.f32 %v4532_v24, %v4532_v24  ;;  %v693_v10 = vadd.f32 %v692_v45, %v630_v42  ;;  %v4537_v54 = vpop.f32.mrb[50].mxu0 }
 0x15f   :  { %7034 = vst [vmem:[#allocation28_spill] sm:$0xff] %v4537_v54  ;;  %v4539_v17 = vpop.f32.mrb[51].mxu0  ;;  %v634_v24 = vmul.f32 %v4537_v54, %v4537_v54 }
 0x160   :  { %7035 = vst [vmem:[#allocation29_spill] sm:$0xff] %v4539_v17  ;;  %v694_v7 = vadd.f32 %v693_v10, %v631_v51  ;;  %v562_v18 = vadd.f32 %v561_v40, %v4539_v17  ;;  %v632_v19 = vmul.f32 %v4539_v17, %v4539_v17 }
 0x162   :  { %v563_v43 = vadd.f32 %v4529_v21, %v562_v18  ;;  %v695_v50 = vadd.f32 %v694_v7, %v632_v19 }
 0x164   :  { %v696_v42 = vadd.f32 %v695_v50, %v633_v32  ;;  %v4549_v45 = vpop.f32.mrb[52].mxu0  ;;  %v564_v57 = vadd.f32 %v4537_v54, %v563_v43 }
 0x165   :  { %7036 = vst [vmem:[#allocation30_spill] sm:$0xff] %v4549_v45  ;;  %v4552_v10 = vpop.f32.mrb[53].mxu0  ;;  %v637_v43 = vmul.f32 %v4549_v45, %v4549_v45 }
 0x166   :  { %7037 = vst [vmem:[#allocation31_spill] sm:$0xff] %v4552_v10  ;;  %v565_v40 = vadd.f32 %v564_v57, %v4552_v10  ;;  %v635_v51 = vmul.f32 %v4552_v10, %v4552_v10  ;;  %v697_v17 = vadd.f32 %v696_v42, %v634_v24  ;;  %v4557_v27 = vpop.f32.mrb[54].mxu0 }
 0x167   :  { %7038 = vst [vmem:[#allocation32_spill] sm:$0xff] %v4557_v27  ;;  %v4559_v18 = vpop.f32.mrb[55].mxu0  ;;  %v638_v10 = vmul.f32 %v4557_v27, %v4557_v27 }
 0x168   :  { %7039 = vst [vmem:[#allocation33_spill] sm:$0xff] %v4559_v18  ;;  %v698_v7 = vadd.f32 %v697_v17, %v635_v51  ;;  %v566_v19 = vadd.f32 %v565_v40, %v4559_v18  ;;  %v636_v32 = vmul.f32 %v4559_v18, %v4559_v18 }
 0x16a   :  { %v567_v50 = vadd.f32 %v4549_v45, %v566_v19  ;;  %v699_v57 = vadd.f32 %v698_v7, %v636_v32 }
 0x16c   :  { %v700_v24 = vadd.f32 %v699_v57, %v637_v43  ;;  %v4569_v42 = vpop.f32.mrb[56].mxu0  ;;  %v568_v54 = vadd.f32 %v4557_v27, %v567_v50 }
 0x16d   :  { %v4572_v17 = vpop.f32.mrb[57].mxu0  ;;  %v641_v50 = vmul.f32 %v4569_v42, %v4569_v42 }
 0x16e   :  { %7040 = vst [vmem:[#allocation34_spill] sm:$0xff] %v4572_v17  ;;  %v569_v40 = vadd.f32 %v568_v54, %v4572_v17  ;;  %v639_v51 = vmul.f32 %v4572_v17, %v4572_v17  ;;  %v701_v18 = vadd.f32 %v700_v24, %v638_v10  ;;  %v4577_v21 = vpop.f32.mrb[58].mxu0 }
 0x16f   :  { %v4579_v19 = vpop.f32.mrb[59].mxu0  ;;  %v642_v17 = vmul.f32 %v4577_v21, %v4577_v21 }
 0x170   :  { %7041 = vst [vmem:[#allocation35_spill] sm:$0xff] %v4579_v19  ;;  %v702_v7 = vadd.f32 %v701_v18, %v639_v51  ;;  %v570_v32 = vadd.f32 %v569_v40, %v4579_v19  ;;  %v640_v43 = vmul.f32 %v4579_v19, %v4579_v19 }
 0x172   :  { %v571_v57 = vadd.f32 %v4569_v42, %v570_v32  ;;  %v703_v54 = vadd.f32 %v702_v7, %v640_v43 }
 0x174   :  { %v704_v10 = vadd.f32 %v703_v54, %v641_v50  ;;  %v4589_v24 = vpop.f32.mrb[60].mxu0  ;;  %v572_v27 = vadd.f32 %v4577_v21, %v571_v57 }
 0x175   :  { %v4592_v18 = vpop.f32.mrb[61].mxu0  ;;  %v645_v57 = vmul.f32 %v4589_v24, %v4589_v24 }
 0x176   :  { %v573_v40 = vadd.f32 %v572_v27, %v4592_v18  ;;  %v643_v51 = vmul.f32 %v4592_v18, %v4592_v18  ;;  %v705_v19 = vadd.f32 %v704_v10, %v642_v17  ;;  %v4597_v45 = vpop.f32.mrb[62].mxu0 }
 0x177   :  { %v4599_v32 = vpop.f32.mrb[63].mxu0  ;;  %v646_v31 = vmul.f32 %v4597_v45, %v4597_v45 }
 0x178   :  { %v706_v7 = vadd.f32 %v705_v19, %v643_v51  ;;  %v574_v43 = vadd.f32 %v573_v40, %v4599_v32  ;;  %v644_v50 = vmul.f32 %v4599_v32, %v4599_v32 }
 0x17a   :  { %v575_v54 = vadd.f32 %v4589_v24, %v574_v43  ;;  %v707_v27 = vadd.f32 %v706_v7, %v644_v50  ;;  %v1143_v50 = vld [vmem:[#allocation2 + $0x7] ss:$2 sm:$0xff] }
 0x17b   :  { %v1178_v33 = vmul.f32 %v4272_v47, %v1143_v50 }
 0x17c   :  { %v576_v17 = vadd.f32 %v4597_v45, %v575_v54  ;;  %v708_v10 = vadd.f32 %v707_v27, %v645_v57  ;;  %v1230_v57 = vmul.f32 %v4276_v48, %v1195_v1  ;;  %v7042_v54 = vmov 0.0   ;;  %v3866_v1 = vld [vmem:[%s7044_s7] sm:$0xff]  }
 0x17d   :  { %2483 = vst [vmem:[#allocation2] sm:$0xff] %v7042_v54  ;;  %3761 = vmatprep.subr.bf16.mxu1 %v3866_v1 }
 0x17e   :  { %v577_v9 = vrot.slane %v576_v17, 4  ;;  %v709_v37 = vadd.f32 %v708_v10, %v646_v31  ;;  %3762 = vmatpush3.bf16.msra.mxu1 %v3866_v1 }
 0x180   :  { %v578_v19 = vadd.f32 %v577_v9, %v576_v17  ;;  %v710_v51 = vrot.slane %v709_v37, 4  ;;  %v1246_v17 = vadd.f32 %v1230_v57, %v1178_v33  ;;  %v3868_v33 = vld [vmem:[%s7044_s7 + $0x10] sm:$0xff]   ;;  %v3871_v57 = vld [vmem:[%s7044_s7 + $0x28] sm:$0xff]  }
 0x182   :  { %v579_v40 = vrot.slane %v578_v19, 2  ;;  %v711_v56 = vadd.f32 %v710_v51, %v709_v37  ;;  %v1263_v37 = vld [vmem:[#allocation2 + $0x9] ss:$2 sm:$0xff] }
 0x183   :  { %v1298_v10 = vmul.f32 %v4280_v49, %v1263_v37  ;;  %2484 = vst [vmem:[#allocation2 + $0x8] sm:$0xff] %v7042_v54  ;;  %2485 = vst [vmem:[#allocation2 + $0x10] sm:$0xff] %v7042_v54  ;;  %v7071_v49 = vld [vmem:[#allocation30_spill] sm:$0xff] }
 0x184   :  { %v580_v38 = vadd.f32 %v579_v40, %v578_v19  ;;  %v712_v0 = vrot.slane %v711_v56, 2  ;;  %v3870_v19 = vld [vmem:[%s7044_s7 + $0x20] sm:$0xff]  }
 0x185   :  { %v513_v40 = vld [vmem:[%s6847_s3] sm:$0x1] }
 0x186   :  { %v581_v44 = vrot.slane %v580_v38, 1  ;;  %v713_v15 = vadd.f32 %v712_v0, %v711_v56  ;;  %v512_v56 = vld [vmem:[%s6846_s2] sm:$0x1] }
 0x188   :  { %v582_v63 = vadd.f32 %v581_v44, %v580_v38  ;;  %v714_v16 = vrot.slane %v713_v15, 1  ;;  %v3867_v38 = vld [vmem:[%s7044_s7 + $0x8] sm:$0xff]   ;;  %v3869_v44 = vld [vmem:[%s7044_s7 + $0x18] sm:$0xff]  }
 0x189   :  { %3763 = vmatprep.subr.bf16.mxu1 %v3867_v38 }
 0x18a   :  { %v715_v43 = vadd.f32 %v714_v16, %v713_v15  ;;  %v716_v7 = vmul.f32 0.001953125, %v582_v63  ;;  %v4616_v15 = vadd.f32 %v1298_v10, %v1246_v17  ;;  %3764 = vmatpush3.bf16.msra.mxu1 %v3867_v38 }
 0x18b   :  { %3765 = vmatprep.subr.bf16.mxu1 %v3868_v33 }
 0x18c   :  { %v717_v31 = vmul.f32 0.001953125, %v715_v43  ;;  %v718_v9 = vmul.f32 %v716_v7, %v716_v7  ;;  %7043 = vst [vmem:[#allocation36_spill] sm:$0xff] %v4616_v15  ;;  %v7070_v15 = vld [vmem:[#allocation33_spill] sm:$0xff] }
 0x18e   :  { %v719_v27 = vsub.f32 %v717_v31, %v718_v9  ;;  %3766 = vmatpush3.bf16.msra.mxu1 %v3868_v33 }
 0x18f   :  { %3767 = vmatprep.subr.bf16.mxu1 %v3869_v44 }
 0x190   :  { %v720_v63 = vmax.f32 %v719_v27, 0.0 }
 0x192   :  { %v721_v16 = vadd.f32 1e-05, %v720_v63  ;;  %3768 = vmatpush3.bf16.msra.mxu1 %v3869_v44 }
 0x193   :  { %3769 = vmatprep.subr.bf16.mxu1 %v3870_v19 }
 0x194   :  { %3890 = vrsqrt.f32 %v721_v16 }
 0x196   :  { %3770 = vmatpush3.bf16.msra.mxu1 %v3870_v19 }
 0x197   :  { %3771 = vmatprep.subr.bf16.mxu1 %v3871_v57 }
 0x19a   :  { %3772 = vmatpush3.bf16.msra.mxu1 %v3871_v57 }
 0x19e   :  { %v3891_v0 = vpop.eup %3890 }
 0x19f   :  { %v723_v51 = vmul.f32 %v3891_v0, %v512_v56 }
 0x1a1   :  { %v724_v43 = vmul.f32 %v723_v51, %v716_v7  ;;  %v4640_v50 = vrot.slane %v723_v51, %v4269_v46 }
 0x1a3   :  { %v725_v54 = vsub.f32 %v513_v40, %v724_v43  ;;  %v790_v31 = vmul.f32 %v4569_v42, %v4640_v50  ;;  %v791_v9 = vmul.f32 %v4577_v21, %v4640_v50  ;;  %v792_v27 = vmul.f32 %v4640_v50, %v4592_v18 }
 0x1a4   :  { %v793_v7 = vmul.f32 %v4640_v50, %v4599_v32  ;;  %v794_v37 = vmul.f32 %v4589_v24, %v4640_v50  ;;  %v795_v17 = vmul.f32 %v4597_v45, %v4640_v50  ;;  %v4659_v10 = vmul.f32 %v4640_v50, %v4292_v59 }
 0x1a5   :  { %v4662_v42 = vrot.slane %v725_v54, %v4269_v46  ;;  %v4666_v21 = vmul.f32 %v4640_v50, %v4296_v61  ;;  %v4670_v18 = vmul.f32 %v4290_v58, %v4640_v50  ;;  %v4674_v24 = vmul.f32 %v4294_v60, %v4640_v50  ;;  %v3872_v60 = vld [vmem:[%s7044_s7 + $0x30] sm:$0xff]   ;;  %v7069_v46 = vld [vmem:[#allocation31_spill] sm:$0xff] }
 0x1a6   :  { %v4678_v59 = vmul.f32 %v4640_v50, %v4312_v8  ;;  %v4682_v45 = vmul.f32 %v4640_v50, %v4319_v13  ;;  %v4686_v61 = vmul.f32 %v4309_v6, %v4640_v50  ;;  %v4690_v58 = vmul.f32 %v4317_v12, %v4640_v50  ;;  %3773 = vmatprep.subr.bf16.mxu1 %v3872_v60 }
 0x1a7   :  { %v860_v8 = vadd.f32 %v4662_v42, %v790_v31  ;;  %v861_v32 = vadd.f32 %v4662_v42, %v791_v9  ;;  %v862_v13 = vadd.f32 %v4662_v42, %v792_v27  ;;  %v863_v63 = vadd.f32 %v4662_v42, %v793_v7  ;;  %3774 = vmatpush3.bf16.msra.mxu1 %v3872_v60  ;;  %v7046_v60 = vld [vmem:[#allocation11_spill] sm:$0xff] }
 0x1a8   :  { %v864_v6 = vadd.f32 %v4662_v42, %v794_v37  ;;  %v865_v16 = vadd.f32 %v4662_v42, %v795_v17  ;;  %v4703_v12 = vmul.f32 %v4640_v50, %v4332_v25  ;;  %v4707_v1 = vmul.f32 %v4640_v50, %v4339_v30  ;;  %v3873_v25 = vld [vmem:[%s7044_s7 + $0x38] sm:$0xff]   ;;  %v7045_v17 = vld [vmem:[#allocation9_spill] sm:$0xff] }
 0x1a9   :  { %v924_v38 = vmax.f32 %v860_v8, 0.0  ;;  %v925_v33 = vmax.f32 %v861_v32, 0.0  ;;  %v926_v44 = vmax.f32 %v862_v13, 0.0  ;;  %v927_v56 = vmax.f32 %v863_v63, 0.0  ;;  %3775 = vmatprep.subr.bf16.mxu1 %v3873_v25  ;;  %v7047_v8 = vld [vmem:[#allocation13_spill] sm:$0xff]  ;;  %v7050_v63 = vld [vmem:[#allocation15_spill] sm:$0xff] }
 0x1aa   :  { %v928_v0 = vmax.f32 %v864_v6, 0.0  ;;  %v929_v19 = vmax.f32 %v865_v16, 0.0  ;;  %v4711_v51 = vmul.f32 %v4329_v22, %v4640_v50  ;;  %v4715_v40 = vmul.f32 %v4337_v29, %v4640_v50  ;;  %v7051_v16 = vld [vmem:[#allocation17_spill] sm:$0xff] }
 0x1ab   :  { %v988_v30 = vmin.f32 %v924_v38, 6.0  ;;  %v989_v43 = vmin.f32 %v925_v33, 6.0  ;;  %v990_v54 = vmin.f32 %v926_v44, 6.0  ;;  %v991_v31 = vmin.f32 %v927_v56, 6.0  ;;  %3776 = vmatpush3.bf16.msra.mxu1 %v3873_v25  ;;  %v7052_v33 = vld [vmem:[#allocation14_spill] sm:$0xff]  ;;  %v7053_v56 = vld [vmem:[#allocation16_spill] sm:$0xff] }
 0x1ac   :  { %v992_v57 = vmin.f32 %v928_v0, 6.0  ;;  %v993_v9 = vmin.f32 %v929_v19, 6.0  ;;  %v4722_v27 = vmul.f32 %v4640_v50, %v4352_v41  ;;  %v4726_v22 = vmul.f32 %v4640_v50, %v4359_v53  ;;  %v7054_v19 = vld [vmem:[#allocation19_spill] sm:$0xff] }
 0x1ad   :  { %1134 = vst [vmem:[#allocation2 + $0x408] sm:$0xff] %v988_v30  ;;  %1135 = vst [vmem:[#allocation2 + $0x410] sm:$0xff] %v989_v43  ;;  %v4730_v29 = vmul.f32 %v4349_v39, %v4640_v50  ;;  %v4734_v7 = vmul.f32 %v4357_v52, %v4640_v50  ;;  %v4738_v41 = vmul.f32 %v4640_v50, %v4372_v5  ;;  %v7055_v30 = vld [vmem:[#allocation21_spill] sm:$0xff] }
 0x1ae   :  { %1136 = vst [vmem:[#allocation2 + $0x428] sm:$0xff] %v990_v54  ;;  %1137 = vst [vmem:[#allocation2 + $0x430] sm:$0xff] %v991_v31  ;;  %v4742_v53 = vmul.f32 %v4640_v50, %v4379_v14  ;;  %v4746_v37 = vmul.f32 %v4369_v3, %v4640_v50  ;;  %v4750_v39 = vmul.f32 %v4377_v11, %v4640_v50  ;;  %v7056_v54 = vld [vmem:[#allocation18_spill] sm:$0xff] }
 0x1af   :  { %1138 = vst [vmem:[#allocation2 + $0x448] sm:$0xff] %v992_v57  ;;  %1139 = vst [vmem:[#allocation2 + $0x450] sm:$0xff] %v993_v9  ;;  %v4754_v52 = vmul.f32 %v4640_v50, %v4392_v28  ;;  %v4758_v5 = vmul.f32 %v4640_v50, %v4399_v35  ;;  %v4762_v14 = vmul.f32 %v4389_v26, %v4640_v50  ;;  %v7057_v57 = vld [vmem:[#allocation20_spill] sm:$0xff] }
 0x1b0   :  { %v4766_v3 = vmul.f32 %v4397_v34, %v4640_v50  ;;  %v4770_v11 = vmul.f32 %v4640_v50, %v4412_v62  ;;  %v4774_v28 = vmul.f32 %v4640_v50, %v4419_v4  ;;  %v4778_v35 = vmul.f32 %v4409_v55, %v4640_v50 }
 0x1b1   :  { %v4782_v26 = vmul.f32 %v4417_v2, %v4640_v50  ;;  %v4786_v34 = vmul.f32 %v4640_v50, %v4432_v23  ;;  %v4790_v62 = vmul.f32 %v4640_v50, %v4439_v36  ;;  %v4794_v4 = vmul.f32 %v4429_v20, %v4640_v50  ;;  %v7048_v36 = vld [vmem:[#allocation10_spill] sm:$0xff]  ;;  %v7049_v20 = vld [vmem:[#allocation12_spill] sm:$0xff] }
 0x1b2   :  { %v4798_v55 = vmul.f32 %v7045_v17, %v4640_v50  ;;  %v4802_v2 = vmul.f32 %v4640_v50, %v7046_v60  ;;  %v4806_v23 = vmul.f32 %v4640_v50, %v7047_v8  ;;  %v4810_v32 = vmul.f32 %v7048_v36, %v4640_v50  ;;  %v7058_v17 = vld [vmem:[#allocation23_spill] sm:$0xff]  ;;  %v7059_v8 = vld [vmem:[#allocation25_spill] sm:$0xff] }
 0x1b3   :  { %v4814_v13 = vmul.f32 %v7049_v20, %v4640_v50  ;;  %v4818_v6 = vmul.f32 %v4640_v50, %v7050_v63  ;;  %v4822_v38 = vmul.f32 %v4640_v50, %v7051_v16  ;;  %v4826_v44 = vmul.f32 %v7052_v33, %v4640_v50  ;;  %v7060_v20 = vld [vmem:[#allocation22_spill] sm:$0xff]  ;;  %v7061_v16 = vld [vmem:[#allocation24_spill] sm:$0xff] }
 0x1b4   :  { %v4830_v0 = vmul.f32 %v7053_v56, %v4640_v50  ;;  %v4834_v25 = vmul.f32 %v4640_v50, %v7054_v19  ;;  %v4838_v43 = vmul.f32 %v4640_v50, %v7055_v30  ;;  %v4842_v31 = vmul.f32 %v7056_v54, %v4640_v50  ;;  %v7062_v56 = vld [vmem:[#allocation27_spill] sm:$0xff]  ;;  %v7063_v30 = vld [vmem:[#allocation29_spill] sm:$0xff] }
 0x1b5   :  { %v4846_v9 = vmul.f32 %v7057_v57, %v4640_v50  ;;  %v4850_v60 = vmul.f32 %v4640_v50, %v7058_v17  ;;  %v4854_v36 = vmul.f32 %v4640_v50, %v7059_v8  ;;  %v4858_v63 = vmul.f32 %v7060_v20, %v4640_v50  ;;  %v7065_v57 = vld [vmem:[#allocation26_spill] sm:$0xff]  ;;  %v7067_v8 = vld [vmem:[#allocation28_spill] sm:$0xff] }
 0x1b6   :  { %v4862_v33 = vmul.f32 %v7061_v16, %v4640_v50  ;;  %v4866_v19 = vmul.f32 %v4640_v50, %v7062_v56  ;;  %v4870_v54 = vmul.f32 %v4640_v50, %v7063_v30  ;;  %v4874_v17 = vmul.f32 %v7065_v57, %v4640_v50 }
 0x1b7   :  { %v4878_v20 = vmul.f32 %v7067_v8, %v4640_v50  ;;  %v4882_v16 = vmul.f32 %v4640_v50, %v7069_v46  ;;  %v4886_v56 = vmul.f32 %v4640_v50, %v7070_v15  ;;  %v4890_v30 = vmul.f32 %v7071_v49, %v4640_v50 }
 0x1b8   :  { %7064 = vst [vmem:[#allocation9_spill] sm:$0xff] %v4870_v54  ;;  %7066 = vst [vmem:[#allocation11_spill] sm:$0xff] %v4874_v17  ;;  %v7072_v54 = vld [vmem:[#allocation32_spill] sm:$0xff]  ;;  %v7073_v17 = vld [vmem:[#allocation34_spill] sm:$0xff]  ;;  %v4906_v15 = vadd.f32 %v4662_v42, %v4659_v10  ;;  %v4910_v49 = vadd.f32 %v4662_v42, %v4666_v21  ;;  %v4926_v10 = vadd.f32 %v4662_v42, %v4682_v45 }
 0x1b9   :  { %7068 = vst [vmem:[#allocation13_spill] sm:$0xff] %v4878_v20  ;;  %v4894_v57 = vmul.f32 %v7072_v54, %v4640_v50  ;;  %v4898_v8 = vmul.f32 %v4640_v50, %v7073_v17  ;;  %v7075_v20 = vld [vmem:[#allocation35_spill] sm:$0xff]  ;;  %v4914_v54 = vadd.f32 %v4662_v42, %v4670_v18  ;;  %v4918_v17 = vadd.f32 %v4662_v42, %v4674_v24 }
 0x1ba   :  { %v4902_v46 = vmul.f32 %v4640_v50, %v7075_v20  ;;  %v4922_v50 = vadd.f32 %v4662_v42, %v4678_v59  ;;  %v4930_v21 = vadd.f32 %v4662_v42, %v4686_v61  ;;  %v4934_v18 = vadd.f32 %v4662_v42, %v4690_v58  ;;  %v1225_v20 = vld [vmem:[#allocation2 + $0x408] ss:$2 sm:$0xff] }
 0x1bb   :  { %7074 = vst [vmem:[#allocation10_spill] sm:$0xff] %v4898_v8  ;;  %v1173_v8 = vld [vmem:[#allocation2 + $0x407] ss:$2 sm:$0xff]  ;;  %v4938_v24 = vadd.f32 %v4662_v42, %v4703_v12  ;;  %v4942_v59 = vadd.f32 %v4662_v42, %v4707_v1  ;;  %v4946_v45 = vadd.f32 %v4662_v42, %v4711_v51  ;;  %v4950_v61 = vadd.f32 %v4662_v42, %v4715_v40 }
 0x1bc   :  { %v4954_v58 = vadd.f32 %v4662_v42, %v4722_v27  ;;  %v4958_v12 = vadd.f32 %v4662_v42, %v4726_v22  ;;  %v4962_v1 = vadd.f32 %v4662_v42, %v4730_v29  ;;  %v1193_v51 = vmul.f32 %v4272_v47, %v1173_v8 }
 0x1bd   :  { %7076 = vst [vmem:[#allocation12_spill] sm:$0xff] %v4946_v45  ;;  %v4967_v45 = vadd.f32 %v4662_v42, %v4734_v7  ;;  %v4971_v40 = vadd.f32 %v4662_v42, %v4738_v41  ;;  %v4975_v27 = vadd.f32 %v4662_v42, %v4742_v53  ;;  %v4979_v22 = vadd.f32 %v4662_v42, %v4746_v37 }
 0x1be   :  { %v4983_v29 = vadd.f32 %v4662_v42, %v4750_v39  ;;  %v4987_v7 = vadd.f32 %v4662_v42, %v4754_v52  ;;  %v4991_v41 = vadd.f32 %v4662_v42, %v4758_v5  ;;  %v1245_v8 = vmul.f32 %v4276_v48, %v1225_v20 }
 0x1bf   :  { %v4996_v53 = vadd.f32 %v4662_v42, %v4762_v14  ;;  %v5000_v37 = vadd.f32 %v4662_v42, %v4766_v3  ;;  %v5004_v39 = vadd.f32 %v4662_v42, %v4770_v11  ;;  %v5008_v52 = vadd.f32 %v4662_v42, %v4774_v28 }
 0x1c0   :  { %v5012_v5 = vadd.f32 %v4662_v42, %v4778_v35  ;;  %v5016_v14 = vadd.f32 %v4662_v42, %v4782_v26  ;;  %v5020_v3 = vadd.f32 %v4662_v42, %v4786_v34  ;;  %v5025_v11 = vadd.f32 %v4662_v42, %v4790_v62  ;;  %v7089_v47 = vld [vmem:[#allocation13_spill] sm:$0xff] }
 0x1c1   :  { %v5029_v28 = vadd.f32 %v4662_v42, %v4794_v4  ;;  %v5033_v35 = vadd.f32 %v4662_v42, %v4798_v55  ;;  %v5037_v26 = vadd.f32 %v4662_v42, %v4802_v2  ;;  %v5041_v34 = vadd.f32 %v4662_v42, %v4806_v23 }
 0x1c2   :  { %v5045_v62 = vadd.f32 %v4662_v42, %v4810_v32  ;;  %v5049_v4 = vadd.f32 %v4662_v42, %v4814_v13  ;;  %v5051_v48 = vadd.f32 %v1245_v8, %v1193_v51  ;;  %v5055_v55 = vadd.f32 %v4662_v42, %v4818_v6  ;;  %v7085_v51 = vld [vmem:[#allocation9_spill] sm:$0xff]  ;;  %v7087_v8 = vld [vmem:[#allocation11_spill] sm:$0xff] }
 0x1c3   :  { %v5059_v2 = vadd.f32 %v4662_v42, %v4822_v38  ;;  %v5063_v23 = vadd.f32 %v4662_v42, %v4826_v44  ;;  %v5067_v32 = vadd.f32 %v4662_v42, %v4830_v0  ;;  %v5071_v13 = vadd.f32 %v4662_v42, %v4834_v25 }
 0x1c4   :  { %7078 = vst [vmem:[#allocation15_spill] sm:$0xff] %v5051_v48  ;;  %v5075_v6 = vadd.f32 %v4662_v42, %v4838_v43  ;;  %v5079_v38 = vadd.f32 %v4662_v42, %v4842_v31  ;;  %v5083_v44 = vadd.f32 %v4662_v42, %v4846_v9  ;;  %v5087_v0 = vadd.f32 %v4662_v42, %v4850_v60  ;;  %v7095_v48 = vld [vmem:[#allocation10_spill] sm:$0xff] }
 0x1c5   :  { %v5091_v25 = vadd.f32 %v4662_v42, %v4854_v36  ;;  %v5095_v43 = vadd.f32 %v4662_v42, %v4858_v63  ;;  %v5099_v31 = vadd.f32 %v4662_v42, %v4862_v33  ;;  %v5103_v9 = vadd.f32 %v4662_v42, %v4866_v19 }
 0x1c6   :  { %7079 = vst [vmem:[#allocation17_spill] sm:$0xff] %v5079_v38  ;;  %7080 = vst [vmem:[#allocation14_spill] sm:$0xff] %v5083_v44  ;;  %v5107_v60 = vadd.f32 %v4662_v42, %v7085_v51  ;;  %v5111_v36 = vadd.f32 %v4662_v42, %v7087_v8  ;;  %v5115_v63 = vadd.f32 %v4662_v42, %v7089_v47  ;;  %v866_v20 = vmax.f32 %v4906_v15, 0.0 }
 0x1c7   :  { %7081 = vst [vmem:[#allocation16_spill] sm:$0xff] %v5087_v0  ;;  %7082 = vst [vmem:[#allocation19_spill] sm:$0xff] %v5091_v25  ;;  %v5119_v33 = vadd.f32 %v4662_v42, %v4882_v16  ;;  %v5123_v19 = vadd.f32 %v4662_v42, %v4886_v56  ;;  %v5127_v51 = vadd.f32 %v4662_v42, %v4890_v30  ;;  %v867_v56 = vmax.f32 %v4910_v49, 0.0 }
 0x1c8   :  { %7083 = vst [vmem:[#allocation21_spill] sm:$0xff] %v5099_v31  ;;  %7084 = vst [vmem:[#allocation18_spill] sm:$0xff] %v5103_v9  ;;  %v5131_v8 = vadd.f32 %v4662_v42, %v4894_v57  ;;  %v5135_v47 = vadd.f32 %v4662_v42, %v7095_v48  ;;  %v5139_v16 = vadd.f32 %v4662_v42, %v4902_v46  ;;  %v869_v30 = vmax.f32 %v4918_v17, 0.0  ;;  %v7097_v46 = vld [vmem:[#allocation12_spill] sm:$0xff] }
 0x1c9   :  { %7086 = vst [vmem:[#allocation20_spill] sm:$0xff] %v5107_v60  ;;  %7088 = vst [vmem:[#allocation23_spill] sm:$0xff] %v5111_v36  ;;  %v871_v57 = vmax.f32 %v4926_v10, 0.0  ;;  %v873_v48 = vmax.f32 %v4934_v18, 0.0  ;;  %v875_v42 = vmax.f32 %v4942_v59, 0.0  ;;  %v876_v15 = vmax.f32 %v7097_v46, 0.0 }
 0x1ca   :  { %7090 = vst [vmem:[#allocation25_spill] sm:$0xff] %v5115_v63  ;;  %7091 = vst [vmem:[#allocation22_spill] sm:$0xff] %v5119_v33  ;;  %v877_v49 = vmax.f32 %v4950_v61, 0.0  ;;  %v879_v17 = vmax.f32 %v4958_v12, 0.0  ;;  %v923_v18 = vmax.f32 %v5139_v16, 0.0  ;;  %v930_v31 = vmin.f32 %v866_v20, 6.0 }
 0x1cb   :  { %7092 = vst [vmem:[#allocation24_spill] sm:$0xff] %v5123_v19  ;;  %7093 = vst [vmem:[#allocation27_spill] sm:$0xff] %v5127_v51  ;;  %v868_v19 = vmax.f32 %v4914_v54, 0.0  ;;  %v870_v51 = vmax.f32 %v4922_v50, 0.0  ;;  %v878_v54 = vmax.f32 %v4954_v58, 0.0  ;;  %v880_v50 = vmax.f32 %v4962_v1, 0.0 }
 0x1cc   :  { %7094 = vst [vmem:[#allocation29_spill] sm:$0xff] %v5131_v8  ;;  %7096 = vst [vmem:[#allocation26_spill] sm:$0xff] %v5135_v47  ;;  %v872_v8 = vmax.f32 %v4930_v21, 0.0  ;;  %v874_v47 = vmax.f32 %v4938_v24, 0.0  ;;  %v931_v24 = vmin.f32 %v867_v56, 6.0  ;;  %v933_v59 = vmin.f32 %v869_v30, 6.0 }
 0x1cd   :  { %v932_v9 = vmin.f32 %v868_v19, 6.0  ;;  %v934_v60 = vmin.f32 %v870_v51, 6.0  ;;  %v935_v46 = vmin.f32 %v871_v57, 6.0  ;;  %v937_v61 = vmin.f32 %v873_v48, 6.0  ;;  %1076 = vst [vmem:[#allocation2 + $0x28] sm:$0xff] %v930_v31 }
 0x1ce   :  { %v936_v36 = vmin.f32 %v872_v8, 6.0  ;;  %v938_v63 = vmin.f32 %v874_v47, 6.0  ;;  %v939_v58 = vmin.f32 %v875_v42, 6.0  ;;  %v940_v33 = vmin.f32 %v876_v15, 6.0  ;;  %1077 = vst [vmem:[#allocation2 + $0x30] sm:$0xff] %v931_v24  ;;  %1079 = vst [vmem:[#allocation2 + $0x50] sm:$0xff] %v933_v59 }
 0x1cf   :  { %1078 = vst [vmem:[#allocation2 + $0x48] sm:$0xff] %v932_v9  ;;  %v941_v1 = vmin.f32 %v877_v49, 6.0  ;;  %v942_v10 = vmin.f32 %v878_v54, 6.0  ;;  %v943_v12 = vmin.f32 %v879_v17, 6.0  ;;  %v944_v21 = vmin.f32 %v880_v50, 6.0  ;;  %1080 = vst [vmem:[#allocation2 + $0x68] sm:$0xff] %v934_v60 }
 0x1d0   :  { %1081 = vst [vmem:[#allocation2 + $0x70] sm:$0xff] %v935_v46  ;;  %1082 = vst [vmem:[#allocation2 + $0x88] sm:$0xff] %v936_v36  ;;  %v7102_v20 = vmax.f32 %v4967_v45, 0.0  ;;  %v7103_v51 = vmax.f32 %v4971_v40, 0.0  ;;  %v7104_v47 = vmax.f32 %v4975_v27, 0.0  ;;  %v7105_v31 = vmax.f32 %v4979_v22, 0.0 }
 0x1d1   :  { %1083 = vst [vmem:[#allocation2 + $0x90] sm:$0xff] %v937_v61  ;;  %1084 = vst [vmem:[#allocation2 + $0xa8] sm:$0xff] %v938_v63  ;;  %v7106_v60 = vmax.f32 %v4983_v29, 0.0  ;;  %v7107_v36 = vmax.f32 %v4987_v7, 0.0  ;;  %v7108_v57 = vmax.f32 %v4991_v41, 0.0  ;;  %v7109_v48 = vmax.f32 %v4996_v53, 0.0 }
 0x1d2   :  { %v7098_v38 = vld [vmem:[#allocation24_spill] sm:$0xff]  ;;  %v7099_v44 = vld [vmem:[#allocation27_spill] sm:$0xff]  ;;  %v945_v19 = vmin.f32 %v7102_v20, 6.0  ;;  %v946_v8 = vmin.f32 %v7103_v51, 6.0  ;;  %v947_v56 = vmin.f32 %v7104_v47, 6.0  ;;  %v948_v9 = vmin.f32 %v7105_v31, 6.0 }
 0x1d3   :  { %v7100_v0 = vld [vmem:[#allocation29_spill] sm:$0xff]  ;;  %v7101_v25 = vld [vmem:[#allocation26_spill] sm:$0xff]  ;;  %1085 = vst [vmem:[#allocation2 + $0xb0] sm:$0xff] %v939_v58  ;;  %1086 = vst [vmem:[#allocation2 + $0xc8] sm:$0xff] %v940_v33  ;;  %v949_v30 = vmin.f32 %v7106_v60, 6.0  ;;  %v950_v45 = vmin.f32 %v7107_v36, 6.0 }
 0x1d4   :  { %v951_v40 = vmin.f32 %v7108_v57, 6.0  ;;  %v952_v27 = vmin.f32 %v7109_v48, 6.0  ;;  %1087 = vst [vmem:[#allocation2 + $0xd0] sm:$0xff] %v941_v1  ;;  %1088 = vst [vmem:[#allocation2 + $0xe8] sm:$0xff] %v942_v10  ;;  %v7110_v22 = vmax.f32 %v5000_v37, 0.0  ;;  %v7111_v33 = vmax.f32 %v5004_v39, 0.0 }
 0x1d5   :  { %1089 = vst [vmem:[#allocation2 + $0xf0] sm:$0xff] %v943_v12  ;;  %1090 = vst [vmem:[#allocation2 + $0x108] sm:$0xff] %v944_v21  ;;  %v7112_v42 = vmax.f32 %v5008_v52, 0.0  ;;  %v7113_v15 = vmax.f32 %v5012_v5, 0.0  ;;  %v7114_v53 = vmax.f32 %v5016_v14, 0.0  ;;  %v7115_v54 = vmax.f32 %v5020_v3, 0.0 }
 0x1d6   :  { %v953_v63 = vmin.f32 %v7110_v22, 6.0  ;;  %v954_v29 = vmin.f32 %v7111_v33, 6.0  ;;  %1091 = vst [vmem:[#allocation2 + $0x110] sm:$0xff] %v945_v19  ;;  %1092 = vst [vmem:[#allocation2 + $0x128] sm:$0xff] %v946_v8  ;;  %v7116_v17 = vmax.f32 %v5025_v11, 0.0  ;;  %v7117_v50 = vmax.f32 %v5029_v28, 0.0 }
 0x1d7   :  { %v955_v7 = vmin.f32 %v7112_v42, 6.0  ;;  %v956_v41 = vmin.f32 %v7113_v15, 6.0  ;;  %1093 = vst [vmem:[#allocation2 + $0x130] sm:$0xff] %v947_v56  ;;  %1094 = vst [vmem:[#allocation2 + $0x148] sm:$0xff] %v948_v9  ;;  %v957_v49 = vmin.f32 %v7114_v53, 6.0  ;;  %v958_v37 = vmin.f32 %v7115_v54, 6.0 }
 0x1d8   :  { %v959_v39 = vmin.f32 %v7116_v17, 6.0  ;;  %v960_v52 = vmin.f32 %v7117_v50, 6.0  ;;  %1095 = vst [vmem:[#allocation2 + $0x150] sm:$0xff] %v949_v30  ;;  %1096 = vst [vmem:[#allocation2 + $0x168] sm:$0xff] %v950_v45  ;;  %v7118_v5 = vmax.f32 %v5033_v35, 0.0  ;;  %v7119_v21 = vmax.f32 %v5037_v26, 0.0 }
 0x1d9   :  { %1097 = vst [vmem:[#allocation2 + $0x170] sm:$0xff] %v951_v40  ;;  %1098 = vst [vmem:[#allocation2 + $0x188] sm:$0xff] %v952_v27  ;;  %v7120_v24 = vmax.f32 %v5041_v34, 0.0  ;;  %v7121_v59 = vmax.f32 %v5045_v62, 0.0  ;;  %v7122_v28 = vmax.f32 %v5049_v4, 0.0  ;;  %v7123_v61 = vmax.f32 %v5055_v55, 0.0 }
 0x1da   :  { %v961_v10 = vmin.f32 %v7118_v5, 6.0  ;;  %v962_v14 = vmin.f32 %v7119_v21, 6.0  ;;  %1099 = vst [vmem:[#allocation2 + $0x190] sm:$0xff] %v953_v63  ;;  %1100 = vst [vmem:[#allocation2 + $0x1a8] sm:$0xff] %v954_v29  ;;  %v7124_v58 = vmax.f32 %v5059_v2, 0.0  ;;  %v7125_v12 = vmax.f32 %v5063_v23, 0.0 }
 0x1db   :  { %v963_v3 = vmin.f32 %v7120_v24, 6.0  ;;  %v964_v11 = vmin.f32 %v7121_v59, 6.0  ;;  %1101 = vst [vmem:[#allocation2 + $0x1b0] sm:$0xff] %v955_v7  ;;  %1102 = vst [vmem:[#allocation2 + $0x1c8] sm:$0xff] %v956_v41  ;;  %v965_v46 = vmin.f32 %v7122_v28, 6.0  ;;  %v966_v35 = vmin.f32 %v7123_v61, 6.0 }
 0x1dc   :  { %v967_v26 = vmin.f32 %v7124_v58, 6.0  ;;  %v968_v34 = vmin.f32 %v7125_v12, 6.0  ;;  %1103 = vst [vmem:[#allocation2 + $0x1d0] sm:$0xff] %v957_v49  ;;  %1104 = vst [vmem:[#allocation2 + $0x1e8] sm:$0xff] %v958_v37  ;;  %v5247_v62 = vld [vmem:[#allocation2 + $0x27] ss:$2 sm:$0xff] }
 0x1dd   :  { %1105 = vst [vmem:[#allocation2 + $0x1f0] sm:$0xff] %v959_v39  ;;  %1106 = vst [vmem:[#allocation2 + $0x208] sm:$0xff] %v960_v52  ;;  %v7127_v1 = vmax.f32 %v5067_v32, 0.0  ;;  %v7128_v4 = vmax.f32 %v5071_v13, 0.0  ;;  %v7129_v55 = vmax.f32 %v5075_v6, 0.0  ;;  %v7130_v2 = vld [vmem:[#allocation17_spill] sm:$0xff] }
 0x1de   :  { %7126 = vst [vmem:[#allocation28_spill] sm:$0xff] %v5247_v62  ;;  %v7131_v8 = vmax.f32 %v7130_v2, 0.0  ;;  %1107 = vst [vmem:[#allocation2 + $0x210] sm:$0xff] %v961_v10  ;;  %v5257_v23 = vld [vmem:[#allocation2 + $0x67] ss:$2 sm:$0xff]  ;;  %v5259_v56 = vld [vmem:[#allocation2 + $0x18] sm:$0xff] }
 0x1df   :  { %v969_v20 = vmin.f32 %v7127_v1, 6.0  ;;  %v970_v19 = vmin.f32 %v7128_v4, 6.0  ;;  %v971_v51 = vmin.f32 %v7129_v55, 6.0  ;;  %1108 = vst [vmem:[#allocation2 + $0x268] sm:$0xff] %v962_v14  ;;  %1109 = vst [vmem:[#allocation2 + $0x270] sm:$0xff] %v963_v3  ;;  %v7133_v32 = vld [vmem:[#allocation14_spill] sm:$0xff] }
 0x1e0   :  { %v972_v47 = vmin.f32 %v7131_v8, 6.0  ;;  %1110 = vst [vmem:[#allocation2 + $0x288] sm:$0xff] %v964_v11  ;;  %7132 = vst [vmem:[#allocation31_spill] sm:$0xff] %v5257_v23  ;;  %v7134_v31 = vmax.f32 %v7133_v32, 0.0  ;;  %v7135_v9 = vld [vmem:[#allocation16_spill] sm:$0xff]  ;;  %v7137_v30 = vld [vmem:[#allocation19_spill] sm:$0xff] }
 0x1e1   :  { %2496 = vst [vmem:[#allocation2 + $0x20] sm:$0xff] %v5259_v56  ;;  %v7136_v60 = vmax.f32 %v7135_v9, 0.0  ;;  %v7138_v36 = vmax.f32 %v7137_v30, 0.0  ;;  %v7139_v57 = vmax.f32 %v5095_v43, 0.0  ;;  %1111 = vst [vmem:[#allocation2 + $0x290] sm:$0xff] %v965_v46  ;;  %v7140_v27 = vld [vmem:[#allocation21_spill] sm:$0xff] }
 0x1e2   :  { %v973_v13 = vmin.f32 %v7134_v31, 6.0  ;;  %1112 = vst [vmem:[#allocation2 + $0x2a8] sm:$0xff] %v966_v35  ;;  %1113 = vst [vmem:[#allocation2 + $0x2b0] sm:$0xff] %v967_v26  ;;  %v1293_v48 = vld [vmem:[#allocation2 + $0x409] ss:$2 sm:$0xff]  ;;  %v7141_v22 = vmax.f32 %v7140_v27, 0.0 }
 0x1e3   :  { %v974_v6 = vmin.f32 %v7136_v60, 6.0  ;;  %v975_v45 = vmin.f32 %v7138_v36, 6.0  ;;  %v976_v40 = vmin.f32 %v7139_v57, 6.0  ;;  %1114 = vst [vmem:[#allocation2 + $0x2c8] sm:$0xff] %v968_v34  ;;  %2498 = vst [vmem:[#allocation2 + $0x60] sm:$0xff] %v5259_v56  ;;  %v7142_v33 = vld [vmem:[#allocation18_spill] sm:$0xff] }
 0x1e4   :  { %v977_v63 = vmin.f32 %v7141_v22, 6.0  ;;  %v7143_v29 = vmax.f32 %v7142_v33, 0.0  ;;  %v7144_v7 = vld [vmem:[#allocation20_spill] sm:$0xff]  ;;  %v7146_v53 = vld [vmem:[#allocation23_spill] sm:$0xff]  ;;  %1115 = vst [vmem:[#allocation2 + $0x2d0] sm:$0xff] %v969_v20  ;;  %1116 = vst [vmem:[#allocation2 + $0x2e8] sm:$0xff] %v970_v19 }
 0x1e5   :  { %v7145_v15 = vmax.f32 %v7144_v7, 0.0  ;;  %v7147_v49 = vmax.f32 %v7146_v53, 0.0  ;;  %1117 = vst [vmem:[#allocation2 + $0x2f0] sm:$0xff] %v971_v51  ;;  %1118 = vst [vmem:[#allocation2 + $0x308] sm:$0xff] %v972_v47  ;;  %v7148_v54 = vld [vmem:[#allocation25_spill] sm:$0xff]  ;;  %v7150_v39 = vld [vmem:[#allocation22_spill] sm:$0xff] }
 0x1e6   :  { %v978_v42 = vmin.f32 %v7143_v29, 6.0  ;;  %v7149_v37 = vmax.f32 %v7148_v54, 0.0  ;;  %v7151_v50 = vmax.f32 %v7150_v39, 0.0  ;;  %v7152_v5 = vmax.f32 %v7098_v38, 0.0  ;;  %1119 = vst [vmem:[#allocation2 + $0x310] sm:$0xff] %v973_v13  ;;  %1120 = vst [vmem:[#allocation2 + $0x328] sm:$0xff] %v974_v6 }
 0x1e7   :  { %v979_v41 = vmin.f32 %v7145_v15, 6.0  ;;  %v980_v43 = vmin.f32 %v7147_v49, 6.0  ;;  %v7153_v21 = vmax.f32 %v7099_v44, 0.0  ;;  %1121 = vst [vmem:[#allocation2 + $0x330] sm:$0xff] %v975_v45  ;;  %1122 = vst [vmem:[#allocation2 + $0x348] sm:$0xff] %v976_v40  ;;  %v7154_v24 = vmax.f32 %v7100_v0, 0.0 }
 0x1e8   :  { %v981_v17 = vmin.f32 %v7149_v37, 6.0  ;;  %v982_v52 = vmin.f32 %v7151_v50, 6.0  ;;  %v983_v10 = vmin.f32 %v7152_v5, 6.0  ;;  %v7155_v59 = vmax.f32 %v7101_v25, 0.0  ;;  %1123 = vst [vmem:[#allocation2 + $0x350] sm:$0xff] %v977_v63  ;;  %1124 = vst [vmem:[#allocation2 + $0x368] sm:$0xff] %v978_v42 }
 0x1e9   :  { %v984_v14 = vmin.f32 %v7153_v21, 6.0  ;;  %v985_v3 = vmin.f32 %v7154_v24, 6.0  ;;  %v987_v28 = vmin.f32 %v923_v18, 6.0  ;;  %1125 = vst [vmem:[#allocation2 + $0x370] sm:$0xff] %v979_v41  ;;  %1126 = vst [vmem:[#allocation2 + $0x388] sm:$0xff] %v980_v43  ;;  %v3903_v38 = vld [vmem:[%s7009_s24] sm:$0xff] }
 0x1ea   :  { %v986_v11 = vmin.f32 %v7155_v59, 6.0  ;;  %v7156_v44 = vld [vmem:[#allocation3_spill] sm:$0xff]  ;;  %1127 = vst [vmem:[#allocation2 + $0x390] sm:$0xff] %v981_v17  ;;  %1128 = vst [vmem:[#allocation2 + $0x3a8] sm:$0xff] %v982_v52  ;;  %v1429_v1 = vld [vmem:[#allocation2 + $0x428] ss:$2 sm:$0xff] }
 0x1eb   :  { %v7157_v46 = vsub.s32 3, %v7156_v44  ;;  %v6924_v0 = vsub.s32 4, %v7156_v44  ;;  %v7158_v35 = vld [vmem:[#allocation7_spill] sm:$0xff]  ;;  %1129 = vst [vmem:[#allocation2 + $0x3b0] sm:$0xff] %v983_v10  ;;  %1130 = vst [vmem:[#allocation2 + $0x3c8] sm:$0xff] %v984_v14  ;;  %v6921_v26 = vsub.s32 5, %v7156_v44 }
 0x1ec   :  { %v1313_v25 = vmul.f32 %v7158_v35, %v1293_v48  ;;  %v1361_v16 = vld [vmem:[#allocation2 + $0x427] ss:$2 sm:$0xff]  ;;  %1131 = vst [vmem:[#allocation2 + $0x3d0] sm:$0xff] %v985_v3  ;;  %1132 = vst [vmem:[#allocation2 + $0x3e8] sm:$0xff] %v986_v11  ;;  %v6923_v20 = vsub.s32 6, %v7156_v44  ;;  %v6922_v55 = vsub.s32 7, %v7156_v44 }
 0x1ed   :  { %v5298_v61 = vrot.slane %v3903_v38, %v7157_v46  ;;  %1133 = vst [vmem:[#allocation2 + $0x3f0] sm:$0xff] %v987_v28  ;;  %v7159_v18 = vld [vmem:[#allocation15_spill] sm:$0xff]  ;;  %v5306_v12 = vrot.slane %v3903_v38, %v6924_v0  ;;  %v5312_v19 = vrot.slane %v3903_v38, %v6921_v26  ;;  %v1497_v51 = vld [vmem:[#allocation2 + $0x429] ss:$2 sm:$0xff]  ;;  %v1199_v9 = vld [vmem:[#allocation2 + $0x88] ss:$2 sm:$0xff] }
 0x1ee   :  { %v1329_v58 = vadd.f32 %v1313_v25, %v7159_v18  ;;  %v1147_v8 = vld [vmem:[#allocation2 + $0x87] ss:$2 sm:$0xff]  ;;  %v1201_v60 = vld [vmem:[#allocation2 + $0xc8] ss:$2 sm:$0xff]  ;;  %v5318_v6 = vrot.slane %v3903_v38, %v6923_v20  ;;  %v7161_v43 = vld [vmem:[#allocation6_spill] sm:$0xff]  ;;  %v5345_v21 = vrot.slane %v3903_v38, %v6922_v55 }
 0x1ef   :  { %v1381_v34 = vmul.f32 %v5298_v61, %v1361_v16  ;;  %v1449_v2 = vmul.f32 %v5306_v12, %v1429_v1  ;;  %v1149_v47 = vld [vmem:[#allocation2 + $0xc7] ss:$2 sm:$0xff]  ;;  %v1203_v40 = vld [vmem:[#allocation2 + $0x108] ss:$2 sm:$0xff]  ;;  %v1517_v22 = vmul.f32 %v5312_v19, %v1497_v51  ;;  %v1232_v54 = vmul.f32 %v7161_v43, %v1199_v9 }
 0x1f0   :  { %v1151_v32 = vld [vmem:[#allocation2 + $0x107] ss:$2 sm:$0xff]  ;;  %v1205_v48 = vld [vmem:[#allocation2 + $0x148] ss:$2 sm:$0xff]  ;;  %v1233_v37 = vmul.f32 %v7161_v43, %v1201_v60  ;;  %v1234_v50 = vmul.f32 %v7161_v43, %v1203_v40 }
 0x1f1   :  { %v1397_v4 = vadd.f32 %v1381_v34, %v1329_v58  ;;  %v1566_v31 = vld [vmem:[#allocation2 + $0x447] ss:$2 sm:$0xff]  ;;  %v1207_v63 = vld [vmem:[#allocation2 + $0x188] ss:$2 sm:$0xff]  ;;  %v5363_v58 = vmul.f32 %v7161_v43, %v1205_v48 }
 0x1f2   :  { %v1153_v13 = vld [vmem:[#allocation2 + $0x147] ss:$2 sm:$0xff]  ;;  %v1209_v33 = vld [vmem:[#allocation2 + $0x1c8] ss:$2 sm:$0xff]  ;;  %v5350_v24 = vmul.f32 %v5318_v6, %v1566_v31 }
 0x1f3   :  { %v1465_v30 = vadd.f32 %v1449_v2, %v1397_v4  ;;  %v1564_v36 = vld [vmem:[#allocation2 + $0x407] ss:$2 sm:$0xff]  ;;  %v1213_v49 = vld [vmem:[#allocation2 + $0x288] ss:$2 sm:$0xff]  ;;  %7164 = vst [vmem:[#allocation32_spill] sm:$0xff] %v5363_v58 }
 0x1f4   :  { %v1155_v45 = vld [vmem:[#allocation2 + $0x187] ss:$2 sm:$0xff]  ;;  %7163 = vst [vmem:[#allocation30_spill] sm:$0xff] %v5350_v24  ;;  %v1215_v11 = vld [vmem:[#allocation2 + $0x2c8] ss:$2 sm:$0xff]  ;;  %v5366_v1 = vmul.f32 %v5318_v6, %v1564_v36  ;;  %v1239_v36 = vmul.f32 %v7161_v43, %v1213_v49 }
 0x1f5   :  { %v1157_v57 = vld [vmem:[#allocation2 + $0x1c7] ss:$2 sm:$0xff]  ;;  %v5347_v14 = vadd.f32 %v1517_v22, %v1465_v30  ;;  %v1217_v18 = vld [vmem:[#allocation2 + $0x308] ss:$2 sm:$0xff] }
 0x1f6   :  { %v5320_v27 = vld [vmem:[#allocation2 + $0xa7] ss:$2 sm:$0xff]  ;;  %7165 = vst [vmem:[#allocation34_spill] sm:$0xff] %v5366_v1  ;;  %v1219_v51 = vld [vmem:[#allocation2 + $0x348] ss:$2 sm:$0xff] }
 0x1f7   :  { %v5323_v29 = vld [vmem:[#allocation2 + $0xe7] ss:$2 sm:$0xff]  ;;  %2500 = vst [vmem:[#allocation2 + $0xa0] sm:$0xff] %v5259_v56  ;;  %7162 = vst [vmem:[#allocation33_spill] sm:$0xff] %v5347_v14  ;;  %v1221_v2 = vld [vmem:[#allocation2 + $0x388] ss:$2 sm:$0xff] }
 0x1f8   :  { %v5325_v42 = vld [vmem:[#allocation2 + $0x127] ss:$2 sm:$0xff]  ;;  %2502 = vst [vmem:[#allocation2 + $0xe0] sm:$0xff] %v5259_v56  ;;  %v1223_v30 = vld [vmem:[#allocation2 + $0x3c8] ss:$2 sm:$0xff] }
 0x1f9   :  { %v1161_v7 = vld [vmem:[#allocation2 + $0x287] ss:$2 sm:$0xff]  ;;  %2490 = vst [vmem:[#allocation2 + $0x120] sm:$0xff] %v5259_v56  ;;  %v5380_v22 = vld [vmem:[#allocation2 + $0x28] ss:$2 sm:$0xff]  ;;  %v1244_v44 = vmul.f32 %v7161_v43, %v1223_v30 }
 0x1fa   :  { %v7160_v15 = vld [vmem:[#allocation5_spill] sm:$0xff]  ;;  %7166 = vst [vmem:[#allocation35_spill] sm:$0xff] %v5380_v22  ;;  %v7171_v30 = vld [vmem:[#allocation8_spill] sm:$0xff] }
 0x1fb   :  { %v1180_v41 = vmul.f32 %v7160_v15, %v1147_v8  ;;  %v1181_v53 = vmul.f32 %v7160_v15, %v1149_v47  ;;  %v1347_v17 = vld [vmem:[#allocation2 + $0x267] ss:$2 sm:$0xff]  ;;  %v1182_v39 = vmul.f32 %v7160_v15, %v1151_v32  ;;  %v5353_v59 = vmul.f32 %v7160_v15, %v1153_v13  ;;  %v5388_v49 = vld [vmem:[#allocation2 + $0xa8] ss:$2 sm:$0xff] }
 0x1fc   :  { %v5336_v52 = vld [vmem:[#allocation2 + $0x2a7] ss:$2 sm:$0xff]  ;;  %2504 = vst [vmem:[#allocation2 + $0x260] sm:$0xff] %v5259_v56  ;;  %v1184_v25 = vmul.f32 %v7160_v15, %v1155_v45  ;;  %v1185_v16 = vmul.f32 %v7160_v15, %v1157_v57  ;;  %v1236_v8 = vmul.f32 %v7161_v43, %v1207_v63  ;;  %v1237_v47 = vmul.f32 %v7161_v43, %v1209_v33  ;;  %v5396_v55 = vld [vmem:[#allocation2 + $0x128] ss:$2 sm:$0xff] }
 0x1fd   :  { %v5338_v5 = vld [vmem:[#allocation2 + $0x2e7] ss:$2 sm:$0xff]  ;;  %2506 = vst [vmem:[#allocation2 + $0x2a0] sm:$0xff] %v5259_v56  ;;  %v5371_v32 = vadd.f32 %v1232_v54, %v1180_v41  ;;  %v5373_v31 = vadd.f32 %v1233_v37, %v1181_v53  ;;  %v1187_v60 = vmul.f32 %v7160_v15, %v1161_v7  ;;  %v5377_v45 = vadd.f32 %v1234_v50, %v1182_v39  ;;  %v5386_v54 = vld [vmem:[#allocation2 + $0x68] ss:$2 sm:$0xff] }
 0x1fe   :  { %v5340_v10 = vld [vmem:[#allocation2 + $0x327] ss:$2 sm:$0xff]  ;;  %2508 = vst [vmem:[#allocation2 + $0x2e0] sm:$0xff] %v5259_v56  ;;  %v1374_v48 = vmul.f32 %v5298_v61, %v1347_v17  ;;  %v1240_v41 = vmul.f32 %v7161_v43, %v1215_v11  ;;  %v1241_v53 = vmul.f32 %v7161_v43, %v1217_v18  ;;  %7167 = vst [vmem:[#allocation9_spill] sm:$0xff] %v5386_v54  ;;  %v5390_v37 = vld [vmem:[#allocation2 + $0xe8] ss:$2 sm:$0xff] }
 0x1ff   :  { %v1163_v3 = vld [vmem:[#allocation2 + $0x2c7] ss:$2 sm:$0xff]  ;;  %2510 = vst [vmem:[#allocation2 + $0x320] sm:$0xff] %v5259_v56  ;;  %v1242_v50 = vmul.f32 %v7161_v43, %v1219_v51  ;;  %v1415_v18 = vld [vmem:[#allocation2 + $0x268] ss:$2 sm:$0xff]  ;;  %v5402_v24 = vadd.f32 %v1236_v8, %v1184_v25  ;;  %v1255_v25 = vadd.f32 %v1239_v36, %v1187_v60 }
 0x200   :  { %v5355_v28 = vld [vmem:[#allocation2 + $0x367] ss:$2 sm:$0xff]  ;;  %v1188_v63 = vmul.f32 %v7160_v15, %v1163_v3  ;;  %v1243_v3 = vmul.f32 %v7161_v43, %v1221_v2  ;;  %v5405_v2 = vld [vmem:[#allocation2 + $0x2a8] ss:$2 sm:$0xff]  ;;  %v1390_v22 = vadd.f32 %v1374_v48, %v7171_v30 }
 0x201   :  { %v1165_v38 = vld [vmem:[#allocation2 + $0x307] ss:$2 sm:$0xff]  ;;  %2493 = vst [vmem:[#allocation2 + $0x360] sm:$0xff] %v5259_v56  ;;  %7169 = vst [vmem:[#allocation13_spill] sm:$0xff] %v5402_v24  ;;  %v5407_v1 = vld [vmem:[#allocation2 + $0x2e8] ss:$2 sm:$0xff] }
 0x202   :  { %v1167_v46 = vld [vmem:[#allocation2 + $0x347] ss:$2 sm:$0xff]  ;;  %v1189_v33 = vmul.f32 %v7160_v15, %v1165_v38  ;;  %v5418_v24 = vld [vmem:[#allocation2 + $0x328] ss:$2 sm:$0xff] }
 0x203   :  { %v1267_v34 = vld [vmem:[#allocation2 + $0x89] ss:$2 sm:$0xff]  ;;  %v1190_v39 = vmul.f32 %v7160_v15, %v1167_v46 }
 0x204   :  { %v1169_v4 = vld [vmem:[#allocation2 + $0x387] ss:$2 sm:$0xff]  ;;  %v1300_v51 = vmul.f32 %v7158_v35, %v1267_v34  ;;  %v1257_v58 = vadd.f32 %v1241_v53, %v1189_v33 }
 0x205   :  { %v1269_v13 = vld [vmem:[#allocation2 + $0xc9] ss:$2 sm:$0xff]  ;;  %v1191_v17 = vmul.f32 %v7160_v15, %v1169_v4  ;;  %v1258_v48 = vadd.f32 %v1242_v50, %v1190_v39 }
 0x206   :  { %v1171_v9 = vld [vmem:[#allocation2 + $0x3c7] ss:$2 sm:$0xff]  ;;  %v1301_v8 = vmul.f32 %v7158_v35, %v1269_v13 }
 0x207   :  { %v1271_v57 = vld [vmem:[#allocation2 + $0x109] ss:$2 sm:$0xff]  ;;  %v1192_v0 = vmul.f32 %v7160_v15, %v1171_v9  ;;  %v1253_v9 = vadd.f32 %v1237_v47, %v1185_v16 }
 0x208   :  { %v1273_v40 = vld [vmem:[#allocation2 + $0x149] ss:$2 sm:$0xff]  ;;  %v1302_v16 = vmul.f32 %v7158_v35, %v1271_v57 }
 0x209   :  { %v1275_v7 = vld [vmem:[#allocation2 + $0x189] ss:$2 sm:$0xff]  ;;  %v5427_v47 = vmul.f32 %v7158_v35, %v1273_v40  ;;  %v5441_v40 = vld [vmem:[#allocation2 + $0x368] ss:$2 sm:$0xff]  ;;  %v1260_v30 = vadd.f32 %v1244_v44, %v1192_v0 }
 0x20a   :  { %v1277_v38 = vld [vmem:[#allocation2 + $0x1c9] ss:$2 sm:$0xff]  ;;  %v5439_v57 = vmul.f32 %v7158_v35, %v1275_v7 }
 0x20b   :  { %v1281_v26 = vld [vmem:[#allocation2 + $0x289] ss:$2 sm:$0xff]  ;;  %7172 = vst [vmem:[#allocation12_spill] sm:$0xff] %v5427_v47  ;;  %v1305_v39 = vmul.f32 %v7158_v35, %v1277_v38 }
 0x20c   :  { %v1283_v11 = vld [vmem:[#allocation2 + $0x2c9] ss:$2 sm:$0xff]  ;;  %7173 = vst [vmem:[#allocation24_spill] sm:$0xff] %v5439_v57 }
 0x20d   :  { %v5398_v20 = vld [vmem:[#allocation2 + $0x29] ss:$2 sm:$0xff]  ;;  %v1308_v7 = vmul.f32 %v7158_v35, %v1283_v11 }
 0x20e   :  { %7168 = vst [vmem:[#allocation11_spill] sm:$0xff] %v5398_v20  ;;  %v1285_v46 = vld [vmem:[#allocation2 + $0x309] ss:$2 sm:$0xff]  ;;  %2512 = vst [vmem:[#allocation2 + $0x30] sm:$0xff] %v5259_v56 }
 0x20f   :  { %v1287_v4 = vld [vmem:[#allocation2 + $0x349] ss:$2 sm:$0xff] }
 0x210   :  { %v1289_v14 = vld [vmem:[#allocation2 + $0x389] ss:$2 sm:$0xff]  ;;  %v1310_v57 = vmul.f32 %v7158_v35, %v1287_v4  ;;  %v1318_v4 = vadd.f32 %v1302_v16, %v5377_v45 }
 0x211   :  { %v5409_v54 = vld [vmem:[#allocation2 + $0x69] ss:$2 sm:$0xff]  ;;  %v1311_v44 = vmul.f32 %v7158_v35, %v1289_v14 }
 0x212   :  { %7170 = vst [vmem:[#allocation10_spill] sm:$0xff] %v5409_v54  ;;  %v5411_v23 = vld [vmem:[#allocation2 + $0xa9] ss:$2 sm:$0xff]  ;;  %2514 = vst [vmem:[#allocation2 + $0x70] sm:$0xff] %v5259_v56  ;;  %v1256_v54 = vadd.f32 %v1240_v41, %v1188_v63  ;;  %v1259_v63 = vadd.f32 %v1243_v3, %v1191_v17  ;;  %v1442_v41 = vmul.f32 %v5306_v12, %v1415_v18 }
 0x213   :  { %v5413_v20 = vld [vmem:[#allocation2 + $0xe9] ss:$2 sm:$0xff]  ;;  %2516 = vst [vmem:[#allocation2 + $0xb0] sm:$0xff] %v5259_v56  ;;  %v1307_v17 = vmul.f32 %v7158_v35, %v1281_v26  ;;  %v1309_v18 = vmul.f32 %v7158_v35, %v1285_v46  ;;  %v1317_v46 = vadd.f32 %v1301_v8, %v5373_v31 }
 0x214   :  { %v5420_v34 = vld [vmem:[#allocation2 + $0x129] ss:$2 sm:$0xff]  ;;  %2518 = vst [vmem:[#allocation2 + $0xf0] sm:$0xff] %v5259_v56  ;;  %v1458_v0 = vadd.f32 %v1442_v41, %v1390_v22  ;;  %v5476_v22 = vadd.f32 %v1305_v39, %v1253_v9  ;;  %v1327_v8 = vadd.f32 %v1311_v44, %v1259_v63  ;;  %v1368_v9 = vmul.f32 %v5298_v61, %v5320_v27  ;;  %v5490_v39 = vld [vmem:[#allocation2 + $0x2c8] ss:$2 sm:$0xff] }
 0x215   :  { %v1483_v62 = vld [vmem:[#allocation2 + $0x269] ss:$2 sm:$0xff]  ;;  %2491 = vst [vmem:[#allocation2 + $0x128] sm:$0xff] %v5259_v56  ;;  %2492 = vst [vmem:[#allocation2 + $0x130] sm:$0xff] %v5259_v56  ;;  %v1323_v41 = vadd.f32 %v1307_v17, %v1255_v25  ;;  %v1325_v45 = vadd.f32 %v1309_v18, %v1257_v58  ;;  %v5492_v58 = vld [vmem:[#allocation2 + $0x308] ss:$2 sm:$0xff]  ;;  %v1375_v27 = vmul.f32 %v5298_v61, %v5336_v52 }
 0x216   :  { %v5429_v13 = vld [vmem:[#allocation2 + $0x2a9] ss:$2 sm:$0xff]  ;;  %2520 = vst [vmem:[#allocation2 + $0x270] sm:$0xff] %v5259_v56  ;;  %v1510_v31 = vmul.f32 %v5312_v19, %v1483_v62  ;;  %v1370_v62 = vmul.f32 %v5298_v61, %v5325_v42  ;;  %7180 = vst [vmem:[#allocation19_spill] sm:$0xff] %v5490_v39  ;;  %v5519_v44 = vld [vmem:[#allocation2 + $0x348] ss:$2 sm:$0xff] }
 0x217   :  { %v5431_v60 = vld [vmem:[#allocation2 + $0x2e9] ss:$2 sm:$0xff]  ;;  %2522 = vst [vmem:[#allocation2 + $0x2b0] sm:$0xff] %v5259_v56  ;;  %7181 = vst [vmem:[#allocation21_spill] sm:$0xff] %v5492_v58  ;;  %v1425_v58 = vld [vmem:[#allocation2 + $0x3a8] ss:$2 sm:$0xff] }
 0x218   :  { %v5433_v36 = vld [vmem:[#allocation2 + $0x329] ss:$2 sm:$0xff]  ;;  %2524 = vst [vmem:[#allocation2 + $0x2f0] sm:$0xff] %v5259_v56  ;;  %v1526_v25 = vadd.f32 %v1510_v31, %v1458_v0  ;;  %7185 = vst [vmem:[#allocation25_spill] sm:$0xff] %v5519_v44  ;;  %v1427_v39 = vld [vmem:[#allocation2 + $0x3e8] ss:$2 sm:$0xff] }
 0x219   :  { %v1291_v33 = vld [vmem:[#allocation2 + $0x3c9] ss:$2 sm:$0xff]  ;;  %2526 = vst [vmem:[#allocation2 + $0x330] sm:$0xff] %v5259_v56 }
 0x21a   :  { %v5444_v53 = vld [vmem:[#allocation2 + $0x369] ss:$2 sm:$0xff]  ;;  %v1312_v11 = vmul.f32 %v7158_v35, %v1291_v33  ;;  %v5482_v35 = vld [vmem:[#allocation2 + $0x108] ss:$2 sm:$0xff] }
 0x21b   :  { %7174 = vst [vmem:[#allocation27_spill] sm:$0xff] %v5444_v53  ;;  %v5452_v50 = vld [vmem:[#allocation2 + $0xc7] ss:$2 sm:$0xff]  ;;  %2494 = vst [vmem:[#allocation2 + $0x368] sm:$0xff] %v5259_v56  ;;  %v1620_v53 = vld [vmem:[#allocation2 + $0x288] ss:$2 sm:$0xff] }
 0x21c   :  { %7175 = vst [vmem:[#allocation29_spill] sm:$0xff] %v5452_v50  ;;  %v5454_v3 = vld [vmem:[#allocation2 + $0x107] ss:$2 sm:$0xff]  ;;  %2495 = vst [vmem:[#allocation2 + $0x370] sm:$0xff] %v5259_v56  ;;  %v1328_v16 = vadd.f32 %v1312_v11, %v1260_v30 }
 0x21d   :  { %7176 = vst [vmem:[#allocation26_spill] sm:$0xff] %v5454_v3  ;;  %v1552_v38 = vld [vmem:[#allocation2 + $0x287] ss:$2 sm:$0xff]  ;;  %2501 = vst [vmem:[#allocation2 + $0xc0] sm:$0xff] %v5259_v56  ;;  %v1316_v3 = vadd.f32 %v1300_v51, %v5371_v32  ;;  %v1326_v51 = vadd.f32 %v1310_v57, %v1258_v48 }
 0x21e   :  { %v5461_v47 = vld [vmem:[#allocation2 + $0x2c7] ss:$2 sm:$0xff]  ;;  %2503 = vst [vmem:[#allocation2 + $0x100] sm:$0xff] %v5259_v56  ;;  %2505 = vst [vmem:[#allocation2 + $0x280] sm:$0xff] %v5259_v56  ;;  %v1579_v52 = vmul.f32 %v5318_v6, %v1552_v38  ;;  %v1391_v38 = vadd.f32 %v1375_v27, %v1323_v41  ;;  %v5559_v27 = vld [vmem:[#allocation2 + $0x48] ss:$2 sm:$0xff] }
 0x21f   :  { %7177 = vst [vmem:[#allocation17_spill] sm:$0xff] %v5461_v47  ;;  %v5463_v26 = vld [vmem:[#allocation2 + $0x307] ss:$2 sm:$0xff]  ;;  %2507 = vst [vmem:[#allocation2 + $0x2c0] sm:$0xff] %v5259_v56  ;;  %v1384_v11 = vadd.f32 %v1368_v9, %v1316_v3  ;;  %v1436_v3 = vmul.f32 %v5306_v12, %v5388_v49  ;;  %v1444_v49 = vmul.f32 %v5306_v12, %v5407_v1  ;;  %v1197_v9 = vld [vmem:[#allocation2 + $0x48] ss:$2 sm:$0xff] }
 0x220   :  { %7178 = vst [vmem:[#allocation14_spill] sm:$0xff] %v5463_v26  ;;  %v1343_v50 = vld [vmem:[#allocation2 + $0x1a7] ss:$2 sm:$0xff]  ;;  %2509 = vst [vmem:[#allocation2 + $0x300] sm:$0xff] %v5259_v56  ;;  %v1324_v26 = vadd.f32 %v1308_v7, %v1256_v54  ;;  %v1369_v54 = vmul.f32 %v5298_v61, %v5323_v29  ;;  %v1376_v29 = vmul.f32 %v5298_v61, %v5338_v5 }
 0x221   :  { %v5471_v14 = vld [vmem:[#allocation2 + $0x347] ss:$2 sm:$0xff]  ;;  %v5497_v63 = vmul.f32 %v5298_v61, %v1343_v50  ;;  %v1377_v7 = vmul.f32 %v5298_v61, %v5340_v10  ;;  %v1378_v50 = vmul.f32 %v5298_v61, %v5355_v28 }
 0x222   :  { %7179 = vst [vmem:[#allocation16_spill] sm:$0xff] %v5471_v14  ;;  %v1345_v33 = vld [vmem:[#allocation2 + $0x1e7] ss:$2 sm:$0xff]  ;;  %2511 = vst [vmem:[#allocation2 + $0x340] sm:$0xff] %v5259_v56  ;;  %v5480_v14 = vld [vmem:[#allocation2 + $0xc8] ss:$2 sm:$0xff]  ;;  %v1385_v28 = vadd.f32 %v1369_v54, %v1317_v46  ;;  %v1392_v31 = vadd.f32 %v1376_v29, %v1324_v26  ;;  %v1437_v46 = vmul.f32 %v5306_v12, %v5390_v37 }
 0x223   :  { %v1357_v47 = vld [vmem:[#allocation2 + $0x3a7] ss:$2 sm:$0xff]  ;;  %v5500_v57 = vmul.f32 %v5298_v61, %v1345_v33  ;;  %v1386_v33 = vadd.f32 %v1370_v62, %v1318_v4  ;;  %v1438_v4 = vmul.f32 %v5306_v12, %v5396_v55  ;;  %v1445_v37 = vmul.f32 %v5306_v12, %v5418_v24 }
 0x224   :  { %v1359_v32 = vld [vmem:[#allocation2 + $0x3e7] ss:$2 sm:$0xff]  ;;  %v1379_v18 = vmul.f32 %v5298_v61, %v1357_v47  ;;  %v1413_v47 = vld [vmem:[#allocation2 + $0x1e8] ss:$2 sm:$0xff]  ;;  %v1446_v55 = vmul.f32 %v5306_v12, %v5441_v40  ;;  %v1453_v54 = vadd.f32 %v1437_v46, %v1385_v28 }
 0x225   :  { %v5494_v48 = vld [vmem:[#allocation2 + $0xc9] ss:$2 sm:$0xff]  ;;  %v1380_v10 = vmul.f32 %v5298_v61, %v1359_v32  ;;  %v5539_v26 = vmul.f32 %v5306_v12, %v1413_v47  ;;  %v1454_v1 = vadd.f32 %v1438_v4, %v1386_v33  ;;  %v7189_v33 = vld [vmem:[#allocation27_spill] sm:$0xff] }
 0x226   :  { %v5506_v42 = vld [vmem:[#allocation2 + $0x109] ss:$2 sm:$0xff]  ;;  %2517 = vst [vmem:[#allocation2 + $0xd0] sm:$0xff] %v5259_v56  ;;  %v1395_v44 = vadd.f32 %v1379_v18, %v1327_v8  ;;  %v1447_v8 = vmul.f32 %v5306_v12, %v1425_v58  ;;  %v5564_v58 = vld [vmem:[#allocation2 + $0x88] ss:$2 sm:$0xff] }
 0x227   :  { %7182 = vst [vmem:[#allocation18_spill] sm:$0xff] %v5506_v42  ;;  %v5508_v30 = vld [vmem:[#allocation2 + $0x289] ss:$2 sm:$0xff]  ;;  %2519 = vst [vmem:[#allocation2 + $0x110] sm:$0xff] %v5259_v56  ;;  %v1647_v42 = vmul.f32 %v5345_v21, %v1620_v53  ;;  %v1443_v53 = vmul.f32 %v5306_v12, %v5405_v2  ;;  %v1452_v2 = vadd.f32 %v1436_v3, %v1384_v11 }
 0x228   :  { %7183 = vst [vmem:[#allocation20_spill] sm:$0xff] %v5508_v30  ;;  %v5510_v17 = vld [vmem:[#allocation2 + $0x2c9] ss:$2 sm:$0xff]  ;;  %2521 = vst [vmem:[#allocation2 + $0x290] sm:$0xff] %v5259_v56  ;;  %v1396_v30 = vadd.f32 %v1380_v10, %v1328_v16  ;;  %v1448_v16 = vmul.f32 %v5306_v12, %v1427_v39  ;;  %v1504_v10 = vmul.f32 %v5312_v19, %v5411_v23 }
 0x229   :  { %7184 = vst [vmem:[#allocation23_spill] sm:$0xff] %v5510_v17  ;;  %v5521_v5 = vld [vmem:[#allocation2 + $0x309] ss:$2 sm:$0xff]  ;;  %2523 = vst [vmem:[#allocation2 + $0x2d0] sm:$0xff] %v5259_v56  ;;  %v1394_v17 = vadd.f32 %v1378_v50, %v1326_v51  ;;  %v1459_v62 = vadd.f32 %v1443_v53, %v1391_v38  ;;  %v1463_v50 = vadd.f32 %v1447_v8, %v1395_v44 }
 0x22a   :  { %7186 = vst [vmem:[#allocation22_spill] sm:$0xff] %v5521_v5  ;;  %v5523_v0 = vld [vmem:[#allocation2 + $0x349] ss:$2 sm:$0xff]  ;;  %2525 = vst [vmem:[#allocation2 + $0x310] sm:$0xff] %v5259_v56  ;;  %v1393_v5 = vadd.f32 %v1377_v7, %v1325_v45  ;;  %v1505_v11 = vmul.f32 %v5312_v19, %v5413_v20  ;;  %v1511_v44 = vmul.f32 %v5312_v19, %v5429_v13 }
 0x22b   :  { %7187 = vst [vmem:[#allocation15_spill] sm:$0xff] %v5523_v0  ;;  %2527 = vst [vmem:[#allocation2 + $0x350] sm:$0xff] %v5259_v56  ;;  %v1595_v0 = vadd.f32 %v1579_v52, %v1526_v25  ;;  %v1145_v41 = vld [vmem:[#allocation2 + $0x47] ss:$2 sm:$0xff]  ;;  %v1460_v25 = vadd.f32 %v1444_v49, %v1392_v31  ;;  %v1462_v7 = vadd.f32 %v1446_v55, %v1394_v17 }
 0x22c   :  { %v5541_v32 = vld [vmem:[#allocation2 + $0x47] ss:$2 sm:$0xff]  ;;  %v1179_v40 = vmul.f32 %v7160_v15, %v1145_v41  ;;  %v1464_v52 = vadd.f32 %v1448_v16, %v1396_v30  ;;  %v1506_v17 = vmul.f32 %v5312_v19, %v5420_v34  ;;  %v1231_v30 = vmul.f32 %v7161_v43, %v1197_v9 }
 0x22d   :  { %v5543_v45 = vld [vmem:[#allocation2 + $0x87] ss:$2 sm:$0xff]  ;;  %v5551_v51 = vadd.f32 %v1647_v42, %v1595_v0  ;;  %2497 = vst [vmem:[#allocation2 + $0x40] sm:$0xff] %v5259_v56  ;;  %v1461_v42 = vadd.f32 %v1445_v37, %v1393_v5  ;;  %v1512_v5 = vmul.f32 %v5312_v19, %v5431_v60  ;;  %v1513_v20 = vmul.f32 %v5312_v19, %v5433_v36 }
 0x22e   :  { %2499 = vst [vmem:[#allocation2 + $0x80] sm:$0xff] %v5259_v56  ;;  %v1265_v24 = vld [vmem:[#allocation2 + $0x49] ss:$2 sm:$0xff]  ;;  %v1514_v34 = vmul.f32 %v5312_v19, %v7189_v33  ;;  %v1247_v31 = vadd.f32 %v1231_v30, %v1179_v40  ;;  %v7191_v60 = vld [vmem:[#allocation7_spill] sm:$0xff]  ;;  %v1520_v8 = vadd.f32 %v1504_v10, %v1452_v2  ;;  %v1521_v16 = vadd.f32 %v1505_v11, %v1453_v54 }
 0x22f   :  { %v5561_v29 = vld [vmem:[#allocation2 + $0x49] ss:$2 sm:$0xff]  ;;  %v1299_v3 = vmul.f32 %v7191_v60, %v1265_v24  ;;  %v7196_v37 = vld [vmem:[#allocation35_spill] sm:$0xff]  ;;  %v1522_v24 = vadd.f32 %v1506_v17, %v1454_v1  ;;  %v5609_v54 = vadd.f32 %v1513_v20, %v1461_v42  ;;  %v1389_v42 = vadd.f32 %v5500_v57, %v5476_v22 }
 0x230   :  { %v1493_v18 = vld [vmem:[#allocation2 + $0x3a9] ss:$2 sm:$0xff]  ;;  %2513 = vst [vmem:[#allocation2 + $0x50] sm:$0xff] %v5259_v56  ;;  %v1434_v55 = vmul.f32 %v5306_v12, %v7196_v37  ;;  %v5613_v11 = vadd.f32 %v1514_v34, %v1462_v7  ;;  %v1572_v34 = vmul.f32 %v5318_v6, %v5543_v45  ;;  %v1639_v37 = vmul.f32 %v5345_v21, %v5559_v27 }
 0x231   :  { %v5566_v39 = vld [vmem:[#allocation2 + $0x89] ss:$2 sm:$0xff]  ;;  %v1315_v9 = vadd.f32 %v1299_v3, %v1247_v31  ;;  %v7200_v3 = vld [vmem:[#allocation10_spill] sm:$0xff]  ;;  %v1640_v45 = vmul.f32 %v5345_v21, %v5564_v58  ;;  %v1641_v27 = vmul.f32 %v5345_v21, %v5480_v14 }
 0x232   :  { %v1495_v0 = vld [vmem:[#allocation2 + $0x3e9] ss:$2 sm:$0xff]  ;;  %2515 = vst [vmem:[#allocation2 + $0x90] sm:$0xff] %v5259_v56  ;;  %v1515_v56 = vmul.f32 %v5312_v19, %v1493_v18  ;;  %v7197_v18 = vld [vmem:[#allocation31_spill] sm:$0xff] }
 0x233   :  { %v1341_v15 = vld [vmem:[#allocation2 + $0x167] ss:$2 sm:$0xff]  ;;  %v1516_v13 = vmul.f32 %v5312_v19, %v1495_v0  ;;  %v1367_v40 = vmul.f32 %v5298_v61, %v7197_v18  ;;  %v1409_v0 = vld [vmem:[#allocation2 + $0x168] ss:$2 sm:$0xff] }
 0x234   :  { %v7188_v28 = vld [vmem:[#allocation32_spill] sm:$0xff]  ;;  %v7193_v4 = vld [vmem:[#allocation13_spill] sm:$0xff]  ;;  %v1371_v36 = vmul.f32 %v5298_v61, %v1341_v15  ;;  %v5603_v15 = vadd.f32 %v1511_v44, %v1459_v62  ;;  %v1439_v1 = vmul.f32 %v5306_v12, %v1409_v0  ;;  %v1503_v62 = vmul.f32 %v5312_v19, %v7200_v3 }
 0x235   :  { %v1251_v23 = vadd.f32 %v7188_v28, %v5353_v59  ;;  %v7190_v47 = vld [vmem:[#allocation28_spill] sm:$0xff]  ;;  %v1383_v60 = vadd.f32 %v1367_v40, %v1315_v9  ;;  %v5619_v44 = vadd.f32 %v1515_v56, %v1463_v50 }
 0x236   :  { %v1366_v38 = vmul.f32 %v5298_v61, %v7190_v47  ;;  %v7192_v43 = vld [vmem:[#allocation12_spill] sm:$0xff] }
 0x237   :  { %v1319_v46 = vadd.f32 %v7192_v43, %v1251_v23  ;;  %v7194_v59 = vld [vmem:[#allocation24_spill] sm:$0xff]  ;;  %v7198_v23 = vld [vmem:[#allocation11_spill] sm:$0xff]  ;;  %v7199_v43 = vld [vmem:[#allocation9_spill] sm:$0xff] }
 0x238   :  { %v1320_v41 = vadd.f32 %v7194_v59, %v7193_v4  ;;  %v7195_v53 = vld [vmem:[#allocation36_spill] sm:$0xff]  ;;  %v1502_v33 = vmul.f32 %v5312_v19, %v7198_v23  ;;  %v1435_v2 = vmul.f32 %v5306_v12, %v7199_v43  ;;  %v7201_v4 = vld [vmem:[#allocation29_spill] sm:$0xff] }
 0x239   :  { %v1382_v49 = vadd.f32 %v1366_v38, %v7195_v53  ;;  %v1387_v30 = vadd.f32 %v1371_v36, %v1319_v46  ;;  %v1411_v47 = vld [vmem:[#allocation2 + $0x1a8] ss:$2 sm:$0xff]  ;;  %v5605_v38 = vadd.f32 %v1512_v5, %v1460_v25  ;;  %v1477_v31 = vld [vmem:[#allocation2 + $0x169] ss:$2 sm:$0xff]  ;;  %v1571_v25 = vmul.f32 %v5318_v6, %v5541_v32  ;;  %v7202_v32 = vld [vmem:[#allocation26_spill] sm:$0xff] }
 0x23a   :  { %v1388_v61 = vadd.f32 %v5497_v63, %v1320_v41  ;;  %v1451_v17 = vadd.f32 %v1435_v2, %v1383_v60  ;;  %v1440_v63 = vmul.f32 %v5306_v12, %v1411_v47  ;;  %v1544_v20 = vld [vmem:[#allocation2 + $0x147] ss:$2 sm:$0xff]  ;;  %v1573_v59 = vmul.f32 %v5318_v6, %v7201_v4  ;;  %v1612_v0 = vld [vmem:[#allocation2 + $0x148] ss:$2 sm:$0xff] }
 0x23b   :  { %v1450_v28 = vadd.f32 %v1434_v55, %v1382_v49  ;;  %v1455_v5 = vadd.f32 %v1439_v1, %v1387_v30  ;;  %v1479_v46 = vld [vmem:[#allocation2 + $0x1a9] ss:$2 sm:$0xff]  ;;  %v5628_v36 = vadd.f32 %v1516_v13, %v1464_v52  ;;  %v1574_v50 = vmul.f32 %v5318_v6, %v7202_v32  ;;  %v5640_v52 = vld [vmem:[%s7009_s24 + $0x8] ss:$0 sm:$0xff] }
 0x23c   :  { %v1519_v7 = vadd.f32 %v1503_v62, %v1451_v17  ;;  %v1456_v56 = vadd.f32 %v1440_v63, %v1388_v61  ;;  %v1507_v22 = vmul.f32 %v5312_v19, %v1477_v31  ;;  %v1481_v12 = vld [vmem:[#allocation2 + $0x1e9] ss:$2 sm:$0xff]  ;;  %v1589_v49 = vadd.f32 %v1573_v59, %v1520_v8  ;;  %v1614_v1 = vld [vmem:[#allocation2 + $0x188] ss:$2 sm:$0xff] }
 0x23d   :  { %v1518_v10 = vadd.f32 %v1502_v33, %v1450_v28  ;;  %v1546_v57 = vld [vmem:[#allocation2 + $0x187] ss:$2 sm:$0xff]  ;;  %v1575_v13 = vmul.f32 %v5318_v6, %v1544_v20  ;;  %v1457_v55 = vadd.f32 %v5539_v26, %v1389_v42  ;;  %v1508_v9 = vmul.f32 %v5312_v19, %v1479_v46  ;;  %v1618_v20 = vld [vmem:[#allocation2 + $0x208] ss:$2 sm:$0xff] }
 0x23e   :  { %v1588_v53 = vadd.f32 %v1572_v34, %v1519_v7  ;;  %v1523_v18 = vadd.f32 %v1507_v22, %v1455_v5  ;;  %v1590_v40 = vadd.f32 %v1574_v50, %v1521_v16  ;;  %v1548_v8 = vld [vmem:[#allocation2 + $0x1c7] ss:$2 sm:$0xff]  ;;  %v1509_v23 = vmul.f32 %v5312_v19, %v1481_v12  ;;  %v7205_v34 = vld [vmem:[#allocation18_spill] sm:$0xff] }
 0x23f   :  { %v1587_v41 = vadd.f32 %v1571_v25, %v1518_v10  ;;  %v1591_v28 = vadd.f32 %v1575_v13, %v1522_v24  ;;  %v1524_v33 = vadd.f32 %v1508_v9, %v1456_v56  ;;  %v1576_v47 = vmul.f32 %v5318_v6, %v1546_v57  ;;  %v1550_v60 = vld [vmem:[#allocation2 + $0x207] ss:$2 sm:$0xff]  ;;  %v1616_v10 = vld [vmem:[#allocation2 + $0x1c8] ss:$2 sm:$0xff] }
 0x240   :  { %v1656_v58 = vadd.f32 %v1640_v45, %v1588_v53  ;;  %v1642_v26 = vmul.f32 %v5345_v21, %v5482_v35  ;;  %v1657_v43 = vadd.f32 %v1641_v27, %v1589_v49  ;;  %v1707_v16 = vmul.f32 %v5640_v52, %v5561_v29  ;;  %v7203_v29 = vld [vmem:[#allocation17_spill] sm:$0xff] }
 0x241   :  { %v1655_v30 = vadd.f32 %v1639_v37, %v1587_v41  ;;  %v1708_v2 = vmul.f32 %v5640_v52, %v5566_v39  ;;  %v1525_v14 = vadd.f32 %v1509_v23, %v1457_v55  ;;  %v1577_v61 = vmul.f32 %v5318_v6, %v1548_v8  ;;  %v7204_v39 = vld [vmem:[#allocation14_spill] sm:$0xff]  ;;  %v1680_v5 = vld [vmem:[#allocation2 + $0x149] ss:$2 sm:$0xff] }
 0x242   :  { %v1592_v24 = vadd.f32 %v1576_v47, %v1523_v18  ;;  %v1643_v19 = vmul.f32 %v5345_v21, %v1612_v0  ;;  %v1658_v17 = vadd.f32 %v1642_v26, %v1590_v40  ;;  %v1709_v31 = vmul.f32 %v5640_v52, %v5494_v48  ;;  %v1682_v32 = vld [vmem:[#allocation2 + $0x189] ss:$2 sm:$0xff] }
 0x243   :  { %v5659_v35 = vadd.f32 %v1707_v16, %v1655_v30  ;;  %v5661_v3 = vadd.f32 %v1708_v2, %v1656_v58  ;;  %v1580_v62 = vmul.f32 %v5318_v6, %v7203_v29  ;;  %v1581_v25 = vmul.f32 %v5318_v6, %v7204_v39  ;;  %v1560_v22 = vld [vmem:[#allocation2 + $0x387] ss:$2 sm:$0xff] }
 0x244   :  { %v1578_v42 = vmul.f32 %v5318_v6, %v1550_v60  ;;  %v1593_v63 = vadd.f32 %v1577_v61, %v1524_v33  ;;  %v1644_v46 = vmul.f32 %v5345_v21, %v1614_v1  ;;  %v1659_v7 = vadd.f32 %v1643_v19, %v1591_v28  ;;  %v7206_v37 = vld [vmem:[#allocation16_spill] sm:$0xff]  ;;  %v7207_v61 = vld [vmem:[#allocation19_spill] sm:$0xff]  ;;  %v7208_v29 = vld [vmem:[#allocation21_spill] sm:$0xff] }
 0x245   :  { %v1710_v48 = vmul.f32 %v5640_v52, %v7205_v34  ;;  %v5671_v4 = vadd.f32 %v1709_v31, %v1657_v43  ;;  %v1645_v41 = vmul.f32 %v5345_v21, %v1616_v10  ;;  %v1741_v50 = vadd.f32 %v5661_v3, %v5659_v35  ;;  %v1684_v9 = vld [vmem:[#allocation2 + $0x1c9] ss:$2 sm:$0xff] }
 0x246   :  { %v1594_v59 = vadd.f32 %v1578_v42, %v1525_v14  ;;  %v1763_v56 = vmul.f32 %v5661_v3, %v5661_v3  ;;  %v1660_v12 = vadd.f32 %v1644_v46, %v1592_v24  ;;  %v1711_v57 = vmul.f32 %v5640_v52, %v1680_v5  ;;  %v1562_v40 = vld [vmem:[#allocation2 + $0x3c7] ss:$2 sm:$0xff] }
 0x247   :  { %v5679_v53 = vadd.f32 %v1710_v48, %v1658_v17  ;;  %v1762_v49 = vmul.f32 %v5659_v35, %v5659_v35  ;;  %v1582_v45 = vmul.f32 %v5318_v6, %v7206_v37  ;;  %v1646_v13 = vmul.f32 %v5345_v21, %v1618_v20  ;;  %v1686_v33 = vld [vmem:[#allocation2 + $0x209] ss:$2 sm:$0xff]  ;;  %v1632_v37 = vld [vmem:[#allocation2 + $0x408] ss:$2 sm:$0xff] }
 0x248   :  { %v1661_v55 = vadd.f32 %v1645_v41, %v1593_v63  ;;  %v1742_v18 = vadd.f32 %v1741_v50, %v5671_v4  ;;  %v1712_v8 = vmul.f32 %v5640_v52, %v1682_v32  ;;  %v5688_v0 = vadd.f32 %v1711_v57, %v1659_v7  ;;  %v7210_v7 = vld [vmem:[#allocation25_spill] sm:$0xff]  ;;  %v7211_v41 = vld [vmem:[#allocation23_spill] sm:$0xff] }
 0x249   :  { %v1764_v27 = vmul.f32 %v5671_v4, %v5671_v4  ;;  %v1778_v30 = vadd.f32 %v1763_v56, %v1762_v49  ;;  %v1583_v58 = vmul.f32 %v5318_v6, %v1560_v22  ;;  %v1596_v28 = vadd.f32 %v1580_v62, %v5603_v15  ;;  %v7209_v62 = vld [vmem:[#allocation20_spill] sm:$0xff] }
 0x24a   :  { %v1662_v23 = vadd.f32 %v1646_v13, %v1594_v59  ;;  %v1743_v47 = vadd.f32 %v1742_v18, %v5679_v53  ;;  %v1713_v60 = vmul.f32 %v5640_v52, %v1684_v9  ;;  %v5696_v26 = vadd.f32 %v1712_v8, %v1660_v12  ;;  %v1630_v59 = vld [vmem:[#allocation2 + $0x3c8] ss:$2 sm:$0xff]  ;;  %v7212_v13 = vld [vmem:[#allocation22_spill] sm:$0xff] }
 0x24b   :  { %v1765_v43 = vmul.f32 %v5679_v53, %v5679_v53  ;;  %v1779_v16 = vadd.f32 %v1778_v30, %v1764_v27  ;;  %v1584_v2 = vmul.f32 %v5318_v6, %v1562_v40  ;;  %v1597_v14 = vadd.f32 %v1581_v25, %v5605_v38  ;;  %v1628_v25 = vld [vmem:[#allocation2 + $0x388] ss:$2 sm:$0xff]  ;;  %v7213_v40 = vld [vmem:[#allocation34_spill] sm:$0xff] }
 0x24c   :  { %v1648_v24 = vmul.f32 %v5345_v21, %v7207_v61  ;;  %v1744_v15 = vadd.f32 %v1743_v47, %v5688_v0  ;;  %v1714_v1 = vmul.f32 %v5640_v52, %v1686_v33  ;;  %v5706_v19 = vadd.f32 %v1713_v60, %v1661_v55 }
 0x24d   :  { %v1766_v10 = vmul.f32 %v5688_v0, %v5688_v0  ;;  %v1780_v17 = vadd.f32 %v1779_v16, %v1765_v43  ;;  %v1598_v31 = vadd.f32 %v1582_v45, %v5609_v54  ;;  %v1649_v6 = vmul.f32 %v5345_v21, %v7208_v29  ;;  %v1696_v45 = vld [vmem:[#allocation2 + $0x389] ss:$2 sm:$0xff]  ;;  %v7216_v16 = vld [vmem:[#allocation30_spill] sm:$0xff] }
 0x24e   :  { %v1715_v38 = vmul.f32 %v5640_v52, %v7209_v62  ;;  %v1745_v39 = vadd.f32 %v1744_v15, %v5696_v26  ;;  %v1664_v42 = vadd.f32 %v1648_v24, %v1596_v28  ;;  %v5716_v63 = vadd.f32 %v1714_v1, %v1662_v23  ;;  %v7214_v28 = vld [vmem:[#allocation15_spill] sm:$0xff]  ;;  %v7215_v43 = vld [vmem:[#allocation33_spill] sm:$0xff] }
 0x24f   :  { %v1767_v5 = vmul.f32 %v5696_v26, %v5696_v26  ;;  %v1781_v20 = vadd.f32 %v1780_v17, %v1766_v10  ;;  %v1599_v46 = vadd.f32 %v1583_v58, %v5613_v11  ;;  %v1650_v54 = vmul.f32 %v5345_v21, %v7210_v7  ;;  %v1634_v58 = vld [vmem:[#allocation2 + $0x448] ss:$2 sm:$0xff]  ;;  %v1700_v29 = vld [vmem:[#allocation2 + $0x409] ss:$2 sm:$0xff] }
 0x250   :  { %v1665_v34 = vadd.f32 %v1649_v6, %v1597_v14  ;;  %v1746_v48 = vadd.f32 %v1745_v39, %v5706_v19  ;;  %v1716_v32 = vmul.f32 %v5640_v52, %v7211_v41  ;;  %v5727_v50 = vadd.f32 %v1715_v38, %v5551_v51  ;;  %v1698_v14 = vld [vmem:[#allocation2 + $0x3c9] ss:$2 sm:$0xff] }
 0x251   :  { %v1768_v56 = vmul.f32 %v5706_v19, %v5706_v19  ;;  %v1782_v22 = vadd.f32 %v1781_v20, %v1767_v5  ;;  %v1600_v12 = vadd.f32 %v1584_v2, %v5619_v44  ;;  %v1651_v11 = vmul.f32 %v5345_v21, %v1628_v25  ;;  %v1702_v20 = vld [vmem:[#allocation2 + $0x449] ss:$2 sm:$0xff] }
 0x252   :  { %v1666_v57 = vadd.f32 %v1650_v54, %v1598_v31  ;;  %v1747_v49 = vadd.f32 %v1746_v48, %v5716_v63  ;;  %v1717_v55 = vmul.f32 %v5640_v52, %v7212_v13  ;;  %v5736_v9 = vadd.f32 %v1716_v32, %v1664_v42 }
 0x253   :  { %v1769_v51 = vmul.f32 %v5716_v63, %v5716_v63  ;;  %v1783_v18 = vadd.f32 %v1782_v22, %v1768_v56  ;;  %v1601_v8 = vadd.f32 %v7213_v40, %v5628_v36  ;;  %v1652_v44 = vmul.f32 %v5345_v21, %v1630_v59 }
 0x254   :  { %v1667_v27 = vadd.f32 %v1651_v11, %v1599_v46  ;;  %v1748_v30 = vadd.f32 %v1747_v49, %v5727_v50  ;;  %v1718_v23 = vmul.f32 %v5640_v52, %v7214_v28  ;;  %v5746_v33 = vadd.f32 %v1717_v55, %v1665_v34 }
 0x255   :  { %v1770_v47 = vmul.f32 %v5727_v50, %v5727_v50  ;;  %v1784_v60 = vadd.f32 %v1783_v18, %v1769_v51  ;;  %v1602_v2 = vadd.f32 %v7216_v16, %v7215_v43  ;;  %v1653_v36 = vmul.f32 %v5345_v21, %v1632_v37 }
 0x256   :  { %v1719_v61 = vmul.f32 %v5640_v52, %v1696_v45  ;;  %v1749_v24 = vadd.f32 %v1748_v30, %v5736_v9  ;;  %v5755_v15 = vadd.f32 %v1718_v23, %v1666_v57  ;;  %v1668_v1 = vadd.f32 %v1652_v44, %v1600_v12 }
 0x257   :  { %v1771_v10 = vmul.f32 %v5736_v9, %v5736_v9  ;;  %v1785_v17 = vadd.f32 %v1784_v60, %v1770_v47  ;;  %v1654_v31 = vmul.f32 %v5345_v21, %v1634_v58  ;;  %v1669_v6 = vadd.f32 %v1653_v36, %v1601_v8 }
 0x258   :  { %v1750_v62 = vadd.f32 %v1749_v24, %v5746_v33  ;;  %v1720_v38 = vmul.f32 %v5640_v52, %v1698_v14  ;;  %v5762_v39 = vadd.f32 %v1719_v61, %v1667_v27  ;;  %v1772_v25 = vmul.f32 %v5746_v33, %v5746_v33 }
 0x259   :  { %v1786_v42 = vadd.f32 %v1785_v17, %v1771_v10  ;;  %v1670_v5 = vadd.f32 %v1654_v31, %v1602_v2  ;;  %v1721_v7 = vmul.f32 %v5640_v52, %v1700_v29  ;;  %v1773_v21 = vmul.f32 %v5755_v15, %v5755_v15  ;;  %v1740_v31 = vld [vmem:[%s6849_s6] sm:$0x1] }
 0x25a   :  { %v1751_v46 = vadd.f32 %v1750_v62, %v5755_v15  ;;  %v1736_v54 = vadd.f32 %v1720_v38, %v1668_v1  ;;  %v1722_v59 = vmul.f32 %v5640_v52, %v1702_v20  ;;  %v1774_v41 = vmul.f32 %v5762_v39, %v5762_v39  ;;  %v1739_v1 = vld [vmem:[%s6848_s5] sm:$0x1] }
 0x25b   :  { %v1787_v34 = vadd.f32 %v1786_v42, %v1772_v25  ;;  %v5774_v32 = vadd.f32 %v1721_v7, %v1669_v6  ;;  %v7217_v6 = vld [vmem:[#allocation4_spill] sm:$0xff] }
 0x25c   :  { %v1752_v48 = vadd.f32 %v1751_v46, %v5762_v39  ;;  %v5776_v12 = vadd.f32 %v1722_v59, %v1670_v5  ;;  %v1775_v11 = vmul.f32 %v1736_v54, %v1736_v54 }
 0x25d   :  { %v1788_v56 = vadd.f32 %v1787_v34, %v1773_v21  ;;  %v1776_v37 = vmul.f32 %v5774_v32, %v5774_v32 }
 0x25e   :  { %v1753_v22 = vadd.f32 %v1752_v48, %v1736_v54  ;;  %v1777_v52 = vmul.f32 %v5776_v12, %v5776_v12 }
 0x25f   :  { %v1789_v57 = vadd.f32 %v1788_v56, %v1774_v41 }
 0x260   :  { %v1754_v49 = vadd.f32 %v1753_v22, %v5774_v32 }
 0x261   :  { %v1790_v45 = vadd.f32 %v1789_v57, %v1775_v11 }
 0x262   :  { %v1755_v13 = vadd.f32 %v1754_v49, %v5776_v12 }
 0x263   :  { %v1791_v55 = vadd.f32 %v1790_v45, %v1776_v37 }
 0x264   :  { %v1756_v51 = vrot.slane %v1755_v13, 4 }
 0x265   :  { %v1792_v18 = vadd.f32 %v1791_v55, %v1777_v52 }
 0x266   :  { %v1757_v40 = vadd.f32 %v1756_v51, %v1755_v13 }
 0x267   :  { %v1793_v8 = vrot.slane %v1792_v18, 4 }
 0x268   :  { %v1758_v44 = vrot.slane %v1757_v40, 2 }
 0x269   :  { %v1794_v27 = vadd.f32 %v1793_v8, %v1792_v18 }
 0x26a   :  { %v1759_v30 = vadd.f32 %v1758_v44, %v1757_v40 }
 0x26b   :  { %v1795_v58 = vrot.slane %v1794_v27, 2 }
 0x26c   :  { %v1760_v28 = vrot.slane %v1759_v30, 1 }
 0x26d   :  { %v1796_v23 = vadd.f32 %v1795_v58, %v1794_v27 }
 0x26e   :  { %v1761_v47 = vadd.f32 %v1760_v28, %v1759_v30 }
 0x26f   :  { %v1797_v60 = vrot.slane %v1796_v23, 1 }
 0x270   :  { %v1799_v43 = vmul.f32 0.0078125, %v1761_v47 }
 0x271   :  { %v1798_v16 = vadd.f32 %v1797_v60, %v1796_v23 }
 0x272   :  { %v1801_v2 = vmul.f32 %v1799_v43, %v1799_v43 }
 0x273   :  { %v1800_v36 = vmul.f32 0.0078125, %v1798_v16 }
 0x275   :  { %v1802_v14 = vsub.f32 %v1800_v36, %v1801_v2 }
 0x277   :  { %v1803_v61 = vmax.f32 %v1802_v14, 0.0 }
 0x279   :  { %v1804_v24 = vadd.f32 1e-05, %v1803_v61 }
 0x27b   :  { %3892 = vrsqrt.f32 %v1804_v24 }
 0x285   :  { %v3893_v10 = vpop.eup %3892 }
 0x286   :  { %v1806_v17 = vmul.f32 %v3893_v10, %v1739_v1 }
 0x288   :  { %v1807_v29 = vmul.f32 %v1806_v17, %v1799_v43  ;;  %v5791_v62 = vrot.slane %v1806_v17, %v7217_v6 }
 0x28a   :  { %v1808_v38 = vsub.f32 %v1740_v31, %v1807_v29  ;;  %v1815_v25 = vmul.f32 %v5791_v62, %v5659_v35  ;;  %v1816_v42 = vmul.f32 %v5791_v62, %v5661_v3  ;;  %v1820_v5 = vmul.f32 %v5791_v62, %v5696_v26 }
 0x28b   :  { %v1817_v46 = vmul.f32 %v5791_v62, %v5671_v4  ;;  %v1818_v7 = vmul.f32 %v5791_v62, %v5679_v53  ;;  %v1824_v21 = vmul.f32 %v5791_v62, %v5736_v9  ;;  %v1819_v35 = vmul.f32 %v5791_v62, %v5688_v0 }
 0x28c   :  { %v5800_v20 = vrot.slane %v1808_v38, %v7217_v6  ;;  %v1821_v3 = vmul.f32 %v5791_v62, %v5706_v19  ;;  %v1828_v26 = vmul.f32 %v5791_v62, %v1736_v54  ;;  %v1822_v0 = vmul.f32 %v5791_v62, %v5716_v63 }
 0x28d   :  { %v1823_v19 = vmul.f32 %v5791_v62, %v5727_v50  ;;  %v1827_v63 = vmul.f32 %v5791_v62, %v5762_v39  ;;  %v1825_v39 = vmul.f32 %v5791_v62, %v5746_v33  ;;  %v1826_v43 = vmul.f32 %v5791_v62, %v5755_v15 }
 0x28e   :  { %v1837_v34 = vadd.f32 %v5800_v20, %v1815_v25  ;;  %v1838_v48 = vadd.f32 %v5800_v20, %v1816_v42  ;;  %v1839_v4 = vadd.f32 %v5800_v20, %v1817_v46  ;;  %v1840_v59 = vadd.f32 %v5800_v20, %v1818_v7 }
 0x28f   :  { %v1841_v53 = vadd.f32 %v5800_v20, %v1819_v35  ;;  %v1842_v9 = vadd.f32 %v5800_v20, %v1820_v5  ;;  %v1843_v49 = vadd.f32 %v5800_v20, %v1821_v3  ;;  %v1844_v37 = vadd.f32 %v5800_v20, %v1822_v0  ;;  %v3880_v0 = vld [vmem:[%s6850_s10 + $0x30] sm:$0xff]  }
 0x290   :  { %v1853_v41 = vmax.f32 %v1837_v34, 0.0  ;;  %v1854_v54 = vmax.f32 %v1838_v48, 0.0  ;;  %v1855_v56 = vmax.f32 %v1839_v4, 0.0  ;;  %v1856_v22 = vmax.f32 %v1840_v59, 0.0 }
 0x291   :  { %v1857_v11 = vmax.f32 %v1841_v53, 0.0  ;;  %v1858_v57 = vmax.f32 %v1842_v9, 0.0  ;;  %v1845_v8 = vadd.f32 %v5800_v20, %v1823_v19  ;;  %v1846_v44 = vadd.f32 %v5800_v20, %v1824_v21  ;;  %v3878_v53 = vld [vmem:[%s6850_s10 + $0x20] sm:$0xff]   ;;  %v3879_v9 = vld [vmem:[%s6850_s10 + $0x28] sm:$0xff]   ;;  %v3881_v19 = vld [vmem:[%s6850_s10 + $0x38] sm:$0xff]  }
 0x292   :  { %v1869_v45 = vmin.f32 %v1853_v41, 6.0  ;;  %v1870_v13 = vmin.f32 %v1854_v54, 6.0  ;;  %v1871_v52 = vmin.f32 %v1855_v56, 6.0  ;;  %v1872_v55 = vmin.f32 %v1856_v22, 6.0 }
 0x293   :  { %v1873_v51 = vmin.f32 %v1857_v11, 6.0  ;;  %v1874_v18 = vmin.f32 %v1858_v57, 6.0  ;;  %v1859_v30 = vmax.f32 %v1843_v49, 0.0  ;;  %v1860_v58 = vmax.f32 %v1844_v37, 0.0 }
 0x294   :  { %v1885_v50 = vpack.c.bf16 %v1870_v13, %v1869_v45  ;;  %v1886_v40 = vpack.c.bf16 %v1872_v55, %v1871_v52  ;;  %v1861_v28 = vmax.f32 %v1845_v8, 0.0  ;;  %v1862_v23 = vmax.f32 %v1846_v44, 0.0 }
 0x295   :  { %v1887_v27 = vpack.c.bf16 %v1874_v18, %v1873_v51  ;;  %v1849_v47 = vadd.f32 %v5800_v20, %v1827_v63  ;;  %v1850_v60 = vadd.f32 %v5800_v20, %v1828_v26  ;;  %v1875_v61 = vmin.f32 %v1859_v30, 6.0 }
 0x296   :  { %3777 = vmatprep.mubr.bf16.mxu1 %v1885_v50  ;;  %v1877_v16 = vmin.f32 %v1861_v28, 6.0  ;;  %v1878_v2 = vmin.f32 %v1862_v23, 6.0  ;;  %v1876_v24 = vmin.f32 %v1860_v58, 6.0  ;;  %v1847_v1 = vadd.f32 %v5800_v20, %v1825_v39 }
 0x297   :  { %3778 = vmatmul.mubr.bf16.vlgmr.msra.gmra.mrb[0].mxu1 %v1886_v40  ;;  %v1865_v36 = vmax.f32 %v1849_v47, 0.0  ;;  %v1866_v14 = vmax.f32 %v1850_v60, 0.0  ;;  %v1848_v10 = vadd.f32 %v5800_v20, %v1826_v43  ;;  %v1829_v15 = vmul.f32 %v5791_v62, %v5774_v32  ;;  %v3874_v32 = vld [vmem:[%s6850_s10] sm:$0xff]  }
 0x298   :  { %3781 = vmatprep.mubr.bf16.mxu1 %v1887_v27  ;;  %v1889_v17 = vpack.c.bf16 %v1878_v2, %v1877_v16  ;;  %v1888_v25 = vpack.c.bf16 %v1876_v24, %v1875_v61  ;;  %v1863_v33 = vmax.f32 %v1847_v1, 0.0  ;;  %v1830_v5 = vmul.f32 %v5791_v62, %v5776_v12  ;;  %3793 = vmatprep.subr.bf16.mxu1 %v3874_v32  ;;  %v3875_v12 = vld [vmem:[%s6850_s10 + $0x8] sm:$0xff]   ;;  %v3876_v62 = vld [vmem:[%s6850_s10 + $0x10] sm:$0xff]  }
 0x299   :  { %v1881_v31 = vmin.f32 %v1865_v36, 6.0  ;;  %v1882_v29 = vmin.f32 %v1866_v14, 6.0  ;;  %v1864_v42 = vmax.f32 %v1848_v10, 0.0  ;;  %v1851_v21 = vadd.f32 %v5800_v20, %v1829_v15  ;;  %3794 = vmatpush3.bf16.msra.mxu1 %v3874_v32 }
 0x29a   :  { %v1879_v46 = vmin.f32 %v1863_v33, 6.0  ;;  %v1852_v35 = vadd.f32 %v5800_v20, %v1830_v5  ;;  %3795 = vmatprep.subr.bf16.mxu1 %v3875_v12  ;;  %v3877_v20 = vld [vmem:[%s6850_s10 + $0x18] sm:$0xff]  }
 0x29b   :  { %v1891_v38 = vpack.c.bf16 %v1882_v29, %v1881_v31  ;;  %v1880_v7 = vmin.f32 %v1864_v42, 6.0  ;;  %v1867_v26 = vmax.f32 %v1851_v21, 0.0 }
 0x29c   :  { %v1868_v34 = vmax.f32 %v1852_v35, 0.0 }
 0x29d   :  { %v1890_v3 = vpack.c.bf16 %v1880_v7, %v1879_v46  ;;  %v1883_v48 = vmin.f32 %v1867_v26, 6.0  ;;  %3796 = vmatpush3.bf16.msra.mxu1 %v3875_v12 }
 0x29e   :  { %v1884_v4 = vmin.f32 %v1868_v34, 6.0  ;;  %3797 = vmatprep.subr.bf16.mxu1 %v3876_v62 }
 0x29f   :  { %3782 = vmatmul.mubr.bf16.gmra.mrb[4].mxu1 %v1888_v25 }
 0x2a0   :  { %3785 = vmatprep.mubr.bf16.mxu1 %v1889_v17  ;;  %v1892_v59 = vpack.c.bf16 %v1884_v4, %v1883_v48 }
 0x2a1   :  { %3798 = vmatpush3.bf16.msra.mxu1 %v3876_v62 }
 0x2a2   :  { %3799 = vmatprep.subr.bf16.mxu1 %v3877_v20 }
 0x2a5   :  { %3800 = vmatpush3.bf16.msra.mxu1 %v3877_v20 }
 0x2a6   :  { %3801 = vmatprep.subr.bf16.mxu1 %v3878_v53 }
 0x2a7   :  { %3786 = vmatmul.mubr.bf16.gmra.mrb[8].mxu1 %v1890_v3 }
 0x2a8   :  { %3789 = vmatprep.mubr.bf16.mxu1 %v1891_v38 }
 0x2a9   :  { %3802 = vmatpush3.bf16.msra.mxu1 %v3878_v53 }
 0x2aa   :  { %3803 = vmatprep.subr.bf16.mxu1 %v3879_v9 }
 0x2ad   :  { %3804 = vmatpush3.bf16.msra.mxu1 %v3879_v9 }
 0x2ae   :  { %3805 = vmatprep.subr.bf16.mxu1 %v3880_v0 }
 0x2af   :  { %3790 = vmatmul.mubr.bf16.gmra.mrb[12].mxu1 %v1892_v59 }
 0x2b1   :  { %3806 = vmatpush3.bf16.msra.mxu1 %v3880_v0 }
 0x2b2   :  { %3807 = vmatprep.subr.bf16.mxu1 %v3881_v19 }
 0x2b5   :  { %3808 = vmatpush3.bf16.msra.mxu1 %v3881_v19 }
 0x36a   :  { %v5867_v41 = vpop.f32.mrb[0].mxu1 }
 0x36b   :  { %v5869_v54 = vpop.f32.mrb[1].mxu1  ;;  %v2079_v37 = vmul.f32 %v5867_v41, %v5867_v41 }
 0x36c   :  { %v5871_v56 = vpop.f32.mrb[2].mxu1  ;;  %v2077_v11 = vmul.f32 %v5869_v54, %v5869_v54 }
 0x36d   :  { %v5873_v22 = vpop.f32.mrb[3].mxu1  ;;  %v2080_v52 = vmul.f32 %v5871_v56, %v5871_v56 }
 0x36e   :  { %v2056_v57 = vadd.f32 %v5873_v22, %v5869_v54  ;;  %v2078_v49 = vmul.f32 %v5873_v22, %v5873_v22 }
 0x370   :  { %v2057_v45 = vadd.f32 %v5867_v41, %v2056_v57  ;;  %v2093_v13 = vadd.f32 %v2078_v49, %v2077_v11 }
 0x372   :  { %v2094_v55 = vadd.f32 %v2093_v13, %v2079_v37  ;;  %v5886_v51 = vpop.f32.mrb[4].mxu1  ;;  %v2058_v18 = vadd.f32 %v5871_v56, %v2057_v45 }
 0x373   :  { %v5889_v63 = vpop.f32.mrb[5].mxu1  ;;  %v2083_v23 = vmul.f32 %v5886_v51, %v5886_v51 }
 0x374   :  { %v2059_v50 = vadd.f32 %v2058_v18, %v5889_v63  ;;  %v2081_v40 = vmul.f32 %v5889_v63, %v5889_v63  ;;  %v2095_v8 = vadd.f32 %v2094_v55, %v2080_v52  ;;  %v5894_v44 = vpop.f32.mrb[6].mxu1 }
 0x375   :  { %v5896_v27 = vpop.f32.mrb[7].mxu1  ;;  %v2084_v39 = vmul.f32 %v5894_v44, %v5894_v44 }
 0x376   :  { %v2096_v30 = vadd.f32 %v2095_v8, %v2081_v40  ;;  %v2060_v58 = vadd.f32 %v2059_v50, %v5896_v27  ;;  %v2082_v28 = vmul.f32 %v5896_v27, %v5896_v27 }
 0x378   :  { %v2061_v47 = vadd.f32 %v5886_v51, %v2060_v58  ;;  %v2097_v60 = vadd.f32 %v2096_v30, %v2082_v28 }
 0x37a   :  { %v2098_v43 = vadd.f32 %v2097_v60, %v2083_v23  ;;  %v5906_v16 = vpop.f32.mrb[8].mxu1  ;;  %v2062_v2 = vadd.f32 %v5894_v44, %v2061_v47  ;;  %v2054_v60 = vld [vmem:[%s6851_s8] sm:$0x1] }
 0x37b   :  { %v5909_v36 = vpop.f32.mrb[9].mxu1  ;;  %v2087_v38 = vmul.f32 %v5906_v16, %v5906_v16 }
 0x37c   :  { %v2063_v14 = vadd.f32 %v2062_v2, %v5909_v36  ;;  %v2085_v61 = vmul.f32 %v5909_v36, %v5909_v36  ;;  %v2099_v24 = vadd.f32 %v2098_v43, %v2084_v39  ;;  %v5914_v1 = vpop.f32.mrb[10].mxu1  ;;  %v2055_v2 = vld [vmem:[%s6852_s9] sm:$0x1] }
 0x37d   :  { %v5916_v10 = vpop.f32.mrb[11].mxu1  ;;  %v2088_v42 = vmul.f32 %v5914_v1, %v5914_v1 }
 0x37e   :  { %v2100_v17 = vadd.f32 %v2099_v24, %v2085_v61  ;;  %v2064_v31 = vadd.f32 %v2063_v14, %v5916_v10  ;;  %v2086_v29 = vmul.f32 %v5916_v10, %v5916_v10 }
 0x380   :  { %v2065_v25 = vadd.f32 %v5906_v16, %v2064_v31  ;;  %v2101_v33 = vadd.f32 %v2100_v17, %v2086_v29 }
 0x382   :  { %v2102_v15 = vadd.f32 %v2101_v33, %v2087_v38  ;;  %v5926_v5 = vpop.f32.mrb[12].mxu1  ;;  %v2066_v46 = vadd.f32 %v5914_v1, %v2065_v25 }
 0x383   :  { %v2039_v7 = vpop.f32.mrb[13].mxu1  ;;  %v2091_v32 = vmul.f32 %v5926_v5, %v5926_v5 }
 0x384   :  { %v2067_v21 = vadd.f32 %v2066_v46, %v2039_v7  ;;  %v2089_v35 = vmul.f32 %v2039_v7, %v2039_v7  ;;  %v2103_v3 = vadd.f32 %v2102_v15, %v2088_v42  ;;  %v5929_v26 = vpop.f32.mrb[14].mxu1 }
 0x385   :  { %v2042_v34 = vpop.f32.mrb[15].mxu1  ;;  %v2092_v20 = vmul.f32 %v5929_v26, %v5929_v26 }
 0x386   :  { %v2104_v48 = vadd.f32 %v2103_v3, %v2089_v35  ;;  %v2068_v4 = vadd.f32 %v2067_v21, %v2042_v34  ;;  %v2090_v59 = vmul.f32 %v2042_v34, %v2042_v34 }
 0x388   :  { %v2069_v12 = vadd.f32 %v5926_v5, %v2068_v4  ;;  %v2105_v62 = vadd.f32 %v2104_v48, %v2090_v59 }
 0x38a   :  { %v2070_v53 = vadd.f32 %v5929_v26, %v2069_v12  ;;  %v2106_v9 = vadd.f32 %v2105_v62, %v2091_v32 }
 0x38c   :  { %v2071_v0 = vrot.slane %v2070_v53, 4  ;;  %v2107_v19 = vadd.f32 %v2106_v9, %v2092_v20 }
 0x38e   :  { %v2072_v11 = vadd.f32 %v2071_v0, %v2070_v53  ;;  %v2108_v57 = vrot.slane %v2107_v19, 4 }
 0x390   :  { %v2073_v49 = vrot.slane %v2072_v11, 2  ;;  %v2109_v37 = vadd.f32 %v2108_v57, %v2107_v19 }
 0x392   :  { %v2074_v45 = vadd.f32 %v2073_v49, %v2072_v11  ;;  %v2110_v13 = vrot.slane %v2109_v37, 2  ;;  %v3882_v49 = vld [vmem:[%s6853_s16] sm:$0xff]  }
 0x393   :  { %3825 = vmatprep.subr.bf16.mxu1 %v3882_v49 }
 0x394   :  { %v2075_v52 = vrot.slane %v2074_v45, 1  ;;  %v2111_v55 = vadd.f32 %v2110_v13, %v2109_v37  ;;  %v3883_v37 = vld [vmem:[%s6853_s16 + $0x8] sm:$0xff]   ;;  %v3885_v13 = vld [vmem:[%s6853_s16 + $0x18] sm:$0xff]  }
 0x396   :  { %v2076_v18 = vadd.f32 %v2075_v52, %v2074_v45  ;;  %v2112_v50 = vrot.slane %v2111_v55, 1  ;;  %v3884_v45 = vld [vmem:[%s6853_s16 + $0x10] sm:$0xff]   ;;  %v3886_v52 = vld [vmem:[%s6853_s16 + $0x20] sm:$0xff]  }
 0x398   :  { %v2113_v40 = vadd.f32 %v2112_v50, %v2111_v55  ;;  %v2114_v8 = vmul.f32 0.0078125, %v2076_v18  ;;  %v3887_v55 = vld [vmem:[%s6853_s16 + $0x28] sm:$0xff]   ;;  %v3888_v18 = vld [vmem:[%s6853_s16 + $0x30] sm:$0xff]   ;;  %v3889_v50 = vld [vmem:[%s6853_s16 + $0x38] sm:$0xff]  }
 0x39a   :  { %v2115_v30 = vmul.f32 0.0078125, %v2113_v40  ;;  %v2116_v58 = vmul.f32 %v2114_v8, %v2114_v8 }
 0x39c   :  { %v2117_v28 = vsub.f32 %v2115_v30, %v2116_v58 }
 0x39e   :  { %v2118_v23 = vmax.f32 %v2117_v28, 0.0 }
 0x3a0   :  { %v2119_v47 = vadd.f32 1e-05, %v2118_v23 }
 0x3a2   :  { %3894 = vrsqrt.f32 %v2119_v47 }
 0x3ac   :  { %v3895_v39 = vpop.eup %3894 }
 0x3ad   :  { %v2121_v43 = vmul.f32 %v3895_v39, %v2054_v60 }
 0x3af   :  { %v2122_v14 = vmul.f32 %v2121_v43, %v2114_v8  ;;  %v2128_v61 = vrot.slane %v2121_v43, %v7217_v6 }
 0x3b1   :  { %v2123_v24 = vsub.f32 %v2055_v2, %v2122_v14  ;;  %v2143_v17 = vmul.f32 %v2128_v61, %v2042_v34  ;;  %v2130_v31 = vmul.f32 %v2128_v61, %v5869_v54  ;;  %v2131_v29 = vmul.f32 %v2128_v61, %v5873_v22 }
 0x3b2   :  { %v2132_v38 = vmul.f32 %v5867_v41, %v2128_v61  ;;  %v2133_v25 = vmul.f32 %v5871_v56, %v2128_v61  ;;  %v2134_v33 = vmul.f32 %v2128_v61, %v5889_v63  ;;  %v2135_v42 = vmul.f32 %v2128_v61, %v5896_v27 }
 0x3b3   :  { %v2150_v15 = vrot.slane %v2123_v24, %v7217_v6  ;;  %v2136_v46 = vmul.f32 %v5886_v51, %v2128_v61  ;;  %v2137_v21 = vmul.f32 %v5894_v44, %v2128_v61  ;;  %v2138_v35 = vmul.f32 %v2128_v61, %v5909_v36 }
 0x3b4   :  { %v2139_v54 = vmul.f32 %v2128_v61, %v5916_v10  ;;  %v2140_v22 = vmul.f32 %v5906_v16, %v2128_v61  ;;  %v2141_v41 = vmul.f32 %v5914_v1, %v2128_v61  ;;  %v2142_v3 = vmul.f32 %v2128_v61, %v2039_v7 }
 0x3b5   :  { %v5957_v56 = vadd.f32 %v2150_v15, %v2143_v17  ;;  %v5959_v63 = vadd.f32 %v2150_v15, %v2130_v31  ;;  %v5961_v27 = vadd.f32 %v2150_v15, %v2131_v29  ;;  %v5963_v34 = vadd.f32 %v2150_v15, %v2132_v38 }
 0x3b6   :  { %v5965_v51 = vadd.f32 %v2150_v15, %v2133_v25  ;;  %v5967_v44 = vadd.f32 %v2150_v15, %v2134_v33  ;;  %v5969_v36 = vadd.f32 %v2150_v15, %v2135_v42  ;;  %v5971_v10 = vadd.f32 %v2150_v15, %v2136_v46 }
 0x3b7   :  { %7218 = vst [vmem:[#allocation5_spill] sm:$0xff] %v5957_v56  ;;  %7219 = vst [vmem:[#allocation6_spill] sm:$0xff] %v5959_v63  ;;  %v2168_v16 = vpack.c.bf16 %v5961_v27, %v5959_v63  ;;  %v5975_v1 = vadd.f32 %v2150_v15, %v2137_v21  ;;  %v5977_v7 = vadd.f32 %v2150_v15, %v2138_v35 }
 0x3b8   :  { %7220 = vst [vmem:[#allocation8_spill] sm:$0xff] %v5961_v27  ;;  %7221 = vst [vmem:[#allocation32_spill] sm:$0xff] %v5963_v34  ;;  %v5979_v48 = vadd.f32 %v2150_v15, %v2139_v54  ;;  %v2169_v4 = vpack.c.bf16 %v5965_v51, %v5963_v34  ;;  %v5983_v59 = vadd.f32 %v2150_v15, %v2140_v22 }
 0x3b9   :  { %7222 = vst [vmem:[#allocation27_spill] sm:$0xff] %v5965_v51  ;;  %7223 = vst [vmem:[#allocation28_spill] sm:$0xff] %v5967_v44  ;;  %v5985_v32 = vadd.f32 %v2150_v15, %v2141_v41  ;;  %3809 = vmatprep.mubr.bf16.mxu1 %v2168_v16  ;;  %v2170_v12 = vpack.c.bf16 %v5969_v36, %v5967_v44  ;;  %v5989_v62 = vadd.f32 %v2150_v15, %v2142_v3 }
 0x3ba   :  { %7224 = vst [vmem:[#allocation7_spill] sm:$0xff] %v5969_v36  ;;  %7225 = vst [vmem:[#allocation12_spill] sm:$0xff] %v5971_v10  ;;  %v2144_v20 = vmul.f32 %v5926_v5, %v2128_v61  ;;  %3810 = vmatmul.mubr.bf16.vlgmr.msra.gmra.mrb[16].mxu1 %v2169_v4  ;;  %v2145_v53 = vmul.f32 %v5929_v26, %v2128_v61  ;;  %v2171_v19 = vpack.c.bf16 %v5975_v1, %v5971_v10 }
 0x3bb   :  { %7226 = vst [vmem:[#allocation13_spill] sm:$0xff] %v5975_v1  ;;  %7227 = vst [vmem:[#allocation24_spill] sm:$0xff] %v5977_v7  ;;  %3813 = vmatprep.mubr.bf16.mxu1 %v2170_v12  ;;  %v2172_v11 = vpack.c.bf16 %v5979_v48, %v5977_v7  ;;  %v2173_v57 = vpack.c.bf16 %v5985_v32, %v5983_v59  ;;  %v2174_v5 = vpack.c.bf16 %v5957_v56, %v5989_v62 }
 0x3bc   :  { %7228 = vst [vmem:[#allocation36_spill] sm:$0xff] %v5979_v48  ;;  %7229 = vst [vmem:[#allocation35_spill] sm:$0xff] %v5983_v59  ;;  %v5993_v9 = vadd.f32 %v2150_v15, %v2144_v20  ;;  %v5995_v0 = vadd.f32 %v2150_v15, %v2145_v53  ;;  %3826 = vmatpush3.bf16.msra.mxu1 %v3882_v49 }
 0x3bd   :  { %7230 = vst [vmem:[#allocation31_spill] sm:$0xff] %v5985_v32  ;;  %7231 = vst [vmem:[#allocation11_spill] sm:$0xff] %v5989_v62  ;;  %3827 = vmatprep.subr.bf16.mxu1 %v3883_v37 }
 0x3be   :  { %7232 = vst [vmem:[#allocation9_spill] sm:$0xff] %v5993_v9  ;;  %7233 = vst [vmem:[#allocation10_spill] sm:$0xff] %v5995_v0  ;;  %v2175_v26 = vpack.c.bf16 %v5995_v0, %v5993_v9 }
 0x3c0   :  { %3828 = vmatpush3.bf16.msra.mxu1 %v3883_v37 }
 0x3c1   :  { %3829 = vmatprep.subr.bf16.mxu1 %v3884_v45 }
 0x3c2   :  { %3814 = vmatmul.mubr.bf16.gmra.mrb[20].mxu1 %v2171_v19 }
 0x3c3   :  { %3817 = vmatprep.mubr.bf16.mxu1 %v2172_v11 }
 0x3c4   :  { %3830 = vmatpush3.bf16.msra.mxu1 %v3884_v45 }
 0x3c5   :  { %3831 = vmatprep.subr.bf16.mxu1 %v3885_v13 }
 0x3c8   :  { %3832 = vmatpush3.bf16.msra.mxu1 %v3885_v13 }
 0x3c9   :  { %3833 = vmatprep.subr.bf16.mxu1 %v3886_v52 }
 0x3ca   :  { %3818 = vmatmul.mubr.bf16.gmra.mrb[24].mxu1 %v2173_v57 }
 0x3cb   :  { %3821 = vmatprep.mubr.bf16.mxu1 %v2174_v5 }
 0x3cc   :  { %3834 = vmatpush3.bf16.msra.mxu1 %v3886_v52 }
 0x3cd   :  { %3835 = vmatprep.subr.bf16.mxu1 %v3887_v55 }
 0x3d0   :  { %3836 = vmatpush3.bf16.msra.mxu1 %v3887_v55 }
 0x3d1   :  { %3837 = vmatprep.subr.bf16.mxu1 %v3888_v18 }
 0x3d2   :  { %3822 = vmatmul.mubr.bf16.gmra.mrb[28].mxu1 %v2175_v26 }
 0x3d4   :  { %3838 = vmatpush3.bf16.msra.mxu1 %v3888_v18 }
 0x3d5   :  { %3839 = vmatprep.subr.bf16.mxu1 %v3889_v50 }
 0x3d8   :  { %3840 = vmatpush3.bf16.msra.mxu1 %v3889_v50 }
 0x48d   :  { %v6031_v40 = vpop.f32.mrb[16].mxu1 }
 0x48e   :  { %v6033_v8 = vpop.f32.mrb[17].mxu1  ;;  %v2362_v60 = vmul.f32 %v6031_v40, %v6031_v40 }
 0x48f   :  { %v6035_v30 = vpop.f32.mrb[18].mxu1  ;;  %v2360_v28 = vmul.f32 %v6033_v8, %v6033_v8 }
 0x490   :  { %v6037_v58 = vpop.f32.mrb[19].mxu1  ;;  %v2363_v2 = vmul.f32 %v6035_v30, %v6035_v30 }
 0x491   :  { %v2339_v23 = vadd.f32 %v6037_v58, %v6033_v8  ;;  %v2361_v47 = vmul.f32 %v6037_v58, %v6037_v58 }
 0x493   :  { %v2340_v39 = vadd.f32 %v6031_v40, %v2339_v23  ;;  %v2376_v43 = vadd.f32 %v2361_v47, %v2360_v28 }
 0x495   :  { %v2377_v14 = vadd.f32 %v2376_v43, %v2362_v60  ;;  %v6050_v61 = vpop.f32.mrb[20].mxu1  ;;  %v2341_v24 = vadd.f32 %v6035_v30, %v2340_v39 }
 0x496   :  { %v6053_v17 = vpop.f32.mrb[21].mxu1  ;;  %v2366_v21 = vmul.f32 %v6050_v61, %v6050_v61 }
 0x497   :  { %v2342_v31 = vadd.f32 %v2341_v24, %v6053_v17  ;;  %v2364_v29 = vmul.f32 %v6053_v17, %v6053_v17  ;;  %v2378_v38 = vadd.f32 %v2377_v14, %v2363_v2  ;;  %v6058_v25 = vpop.f32.mrb[22].mxu1 }
 0x498   :  { %v6060_v33 = vpop.f32.mrb[23].mxu1  ;;  %v2367_v22 = vmul.f32 %v6058_v25, %v6058_v25 }
 0x499   :  { %v2379_v42 = vadd.f32 %v2378_v38, %v2364_v29  ;;  %v2343_v15 = vadd.f32 %v2342_v31, %v6060_v33  ;;  %v2365_v46 = vmul.f32 %v6060_v33, %v6060_v33 }
 0x49b   :  { %v2344_v35 = vadd.f32 %v6050_v61, %v2343_v15  ;;  %v2380_v54 = vadd.f32 %v2379_v42, %v2365_v46 }
 0x49d   :  { %v2381_v41 = vadd.f32 %v2380_v54, %v2366_v21  ;;  %v6070_v3 = vpop.f32.mrb[24].mxu1  ;;  %v2345_v16 = vadd.f32 %v6058_v25, %v2344_v35 }
 0x49e   :  { %v6073_v4 = vpop.f32.mrb[25].mxu1  ;;  %v2370_v49 = vmul.f32 %v6070_v3, %v6070_v3 }
 0x49f   :  { %v2346_v12 = vadd.f32 %v2345_v16, %v6073_v4  ;;  %v2368_v20 = vmul.f32 %v6073_v4, %v6073_v4  ;;  %v2382_v53 = vadd.f32 %v2381_v41, %v2367_v22  ;;  %v6078_v19 = vpop.f32.mrb[26].mxu1 }
 0x4a0   :  { %v6080_v11 = vpop.f32.mrb[27].mxu1  ;;  %v2371_v13 = vmul.f32 %v6078_v19, %v6078_v19 }
 0x4a1   :  { %v2383_v57 = vadd.f32 %v2382_v53, %v2368_v20  ;;  %v2347_v5 = vadd.f32 %v2346_v12, %v6080_v11  ;;  %v2369_v26 = vmul.f32 %v6080_v11, %v6080_v11 }
 0x4a3   :  { %v2348_v37 = vadd.f32 %v6070_v3, %v2347_v5  ;;  %v2384_v45 = vadd.f32 %v2383_v57, %v2369_v26 }
 0x4a5   :  { %v2385_v52 = vadd.f32 %v2384_v45, %v2370_v49  ;;  %v6090_v55 = vpop.f32.mrb[28].mxu1  ;;  %v2349_v18 = vadd.f32 %v6078_v19, %v2348_v37 }
 0x4a6   :  { %v6093_v50 = vpop.f32.mrb[29].mxu1  ;;  %v2374_v24 = vmul.f32 %v6090_v55, %v6090_v55 }
 0x4a7   :  { %v2350_v28 = vadd.f32 %v2349_v18, %v6093_v50  ;;  %v2372_v23 = vmul.f32 %v6093_v50, %v6093_v50  ;;  %v2386_v47 = vadd.f32 %v2385_v52, %v2371_v13  ;;  %v6098_v60 = vpop.f32.mrb[30].mxu1 }
 0x4a8   :  { %v6100_v39 = vpop.f32.mrb[31].mxu1  ;;  %v2375_v38 = vmul.f32 %v6098_v60, %v6098_v60 }
 0x4a9   :  { %v2387_v43 = vadd.f32 %v2386_v47, %v2372_v23  ;;  %v2351_v2 = vadd.f32 %v2350_v28, %v6100_v39  ;;  %v2373_v14 = vmul.f32 %v6100_v39, %v6100_v39  ;;  %v2544_v28 = vld [vmem:[%s6854_s13] sm:$0xff] }
 0x4aa   :  { %v6115_v23 = vrot.slane %v2544_v28, %v7217_v6  ;;  %v2546_v47 = vld [vmem:[#allocation2 + $0x7] sm:$0xff] }
 0x4ab   :  { %v2352_v31 = vadd.f32 %v6090_v55, %v2351_v2  ;;  %v2388_v29 = vadd.f32 %v2387_v43, %v2373_v14  ;;  %v7234_v43 = vld [vmem:[#allocation3_spill] sm:$0xff] }
 0x4ac   :  { %v7235_v2 = vsub.s32 1, %v7234_v43 }
 0x4ad   :  { %v2353_v42 = vadd.f32 %v6098_v60, %v2352_v31  ;;  %v2389_v15 = vadd.f32 %v2388_v29, %v2374_v24  ;;  %v2554_v24 = vld [vmem:[#allocation2 + $0x247] sm:$0xff]  ;;  %v7236_v31 = vsub.s32 2, %v7234_v43 }
 0x4ae   :  { %v6119_v14 = vrot.slane %v2544_v28, %v7235_v2 }
 0x4af   :  { %v2354_v46 = vrot.slane %v2353_v42, 4  ;;  %v2390_v21 = vadd.f32 %v2389_v15, %v2375_v38  ;;  %v6123_v29 = vrot.slane %v2544_v28, %v7236_v31  ;;  %v2566_v38 = vmul.f32 %v6115_v23, %v2546_v47 }
 0x4b0   :  { %v7241_v47 = vsub.s32 7, %v7234_v43  ;;  %v7243_v31 = vsub.s32 5, %v7234_v43 }
 0x4b1   :  { %v2355_v35 = vadd.f32 %v2354_v46, %v2353_v42  ;;  %v2391_v54 = vrot.slane %v2390_v21, 4  ;;  %v3904_v42 = vld [vmem:[#allocation2 + $0x18] sm:$0xff]  ;;  %v2574_v46 = vmul.f32 %v6115_v23, %v2554_v24  ;;  %v2338_v24 = vld [vmem:[%s6856_s12] sm:$0x1] }
 0x4b2   :  { %v2602_v15 = vmul.f32 %v3904_v42, %v6119_v14  ;;  %v6147_v2 = vrot.slane %v2544_v28, %v7241_v47 }
 0x4b3   :  { %v2356_v22 = vrot.slane %v2355_v35, 2  ;;  %v2392_v41 = vadd.f32 %v2391_v54, %v2390_v21  ;;  %v2634_v21 = vld [vmem:[#allocation2 + $0x9] sm:$0xff]  ;;  %v2337_v54 = vld [vmem:[%s6855_s11] sm:$0x1] }
 0x4b4   :  { %7242 = vst [vmem:[#allocation26_spill] sm:$0xff] %v6147_v2 }
 0x4b5   :  { %v2357_v16 = vadd.f32 %v2356_v22, %v2355_v35  ;;  %v2393_v12 = vrot.slane %v2392_v41, 2  ;;  %v2642_v35 = vld [vmem:[#allocation2 + $0x249] sm:$0xff]  ;;  %v2618_v22 = vadd.f32 %v2602_v15, %v2566_v38  ;;  %v6154_v38 = vrot.slane %v2544_v28, %v7243_v31 }
 0x4b7   :  { %v2358_v20 = vrot.slane %v2357_v16, 1  ;;  %v2394_v53 = vadd.f32 %v2393_v12, %v2392_v41  ;;  %v2654_v41 = vmul.f32 %v6123_v29, %v2634_v21  ;;  %v2626_v12 = vadd.f32 %v2602_v15, %v2574_v46  ;;  %7244 = vst [vmem:[#allocation17_spill] sm:$0xff] %v6154_v38 }
 0x4b9   :  { %v2359_v57 = vadd.f32 %v2358_v20, %v2357_v16  ;;  %v2395_v5 = vrot.slane %v2394_v53, 1  ;;  %v2662_v20 = vmul.f32 %v6123_v29, %v2642_v35  ;;  %v6157_v21 = vadd.f32 %v2654_v41, %v2618_v22 }
 0x4bb   :  { %v2396_v26 = vadd.f32 %v2395_v5, %v2394_v53  ;;  %v2397_v49 = vmul.f32 0.0078125, %v2359_v57  ;;  %v2857_v53 = vld [vmem:[#allocation2 + $0x367] sm:$0xff]  ;;  %v6159_v35 = vadd.f32 %v2662_v20, %v2626_v12 }
 0x4bc   :  { %v2849_v5 = vld [vmem:[#allocation2 + $0x127] sm:$0xff] }
 0x4bd   :  { %v2398_v37 = vmul.f32 0.0078125, %v2396_v26  ;;  %v2399_v45 = vmul.f32 %v2397_v49, %v2397_v49  ;;  %v7237_v26 = vsub.s32 3, %v7234_v43 }
 0x4bf   :  { %v2400_v13 = vsub.f32 %v2398_v37, %v2399_v45  ;;  %v6135_v37 = vrot.slane %v2544_v28, %v7237_v26  ;;  %v7238_v45 = vsub.s32 4, %v7234_v43  ;;  %v6168_v26 = vmul.f32 %v3904_v42, %v6147_v2 }
 0x4c1   :  { %v2401_v52 = vmax.f32 %v2400_v13, 0.0  ;;  %v6139_v13 = vrot.slane %v2544_v28, %v7238_v45  ;;  %7247 = vst [vmem:[#allocation16_spill] sm:$0xff] %v6168_v26 }
 0x4c3   :  { %v2402_v18 = vadd.f32 1e-05, %v2401_v52  ;;  %v7239_v52 = vsub.s32 6, %v7234_v43 }
 0x4c5   :  { %3896 = vrsqrt.f32 %v2402_v18  ;;  %v6143_v18 = vrot.slane %v2544_v28, %v7239_v52 }
 0x4c7   :  { %7240 = vst [vmem:[#allocation29_spill] sm:$0xff] %v6143_v18 }
 0x4cf   :  { %v3897_v16 = vpop.eup %3896 }
 0x4d0   :  { %v2404_v57 = vmul.f32 %v3897_v16, %v2337_v54  ;;  %v6162_v54 = vmul.f32 %v6143_v18, %v2849_v5  ;;  %v6165_v16 = vmul.f32 %v6143_v18, %v2857_v53 }
 0x4d2   :  { %v2405_v15 = vmul.f32 %v2404_v57, %v2397_v49  ;;  %v2411_v46 = vrot.slane %v2404_v57, %v7217_v6  ;;  %7245 = vst [vmem:[#allocation14_spill] sm:$0xff] %v6162_v54  ;;  %7246 = vst [vmem:[#allocation18_spill] sm:$0xff] %v6165_v16 }
 0x4d4   :  { %v2406_v45 = vsub.f32 %v2338_v24, %v2405_v15  ;;  %v2426_v28 = vmul.f32 %v2411_v46, %v6100_v39  ;;  %v2413_v49 = vmul.f32 %v2411_v46, %v6033_v8  ;;  %v2414_v43 = vmul.f32 %v2411_v46, %v6037_v58 }
 0x4d5   :  { %v2415_v22 = vmul.f32 %v6031_v40, %v2411_v46  ;;  %v2416_v41 = vmul.f32 %v6035_v30, %v2411_v46  ;;  %v2417_v12 = vmul.f32 %v2411_v46, %v6053_v17  ;;  %v2418_v20 = vmul.f32 %v2411_v46, %v6060_v33 }
 0x4d6   :  { %v2433_v53 = vrot.slane %v2406_v45, %v7217_v6  ;;  %v2419_v42 = vmul.f32 %v6050_v61, %v2411_v46  ;;  %v2420_v57 = vmul.f32 %v6058_v25, %v2411_v46  ;;  %v2421_v39 = vmul.f32 %v2411_v46, %v6073_v4 }
 0x4d7   :  { %v2422_v8 = vmul.f32 %v2411_v46, %v6080_v11  ;;  %v2423_v58 = vmul.f32 %v6070_v3, %v2411_v46  ;;  %v2424_v40 = vmul.f32 %v6078_v19, %v2411_v46  ;;  %v2425_v30 = vmul.f32 %v2411_v46, %v6093_v50 }
 0x4d8   :  { %v2448_v5 = vadd.f32 %v2433_v53, %v2426_v28  ;;  %v2427_v17 = vmul.f32 %v6090_v55, %v2411_v46  ;;  %v2428_v33 = vmul.f32 %v6098_v60, %v2411_v46  ;;  %v2435_v52 = vadd.f32 %v2433_v53, %v2413_v49 }
 0x4d9   :  { %v2436_v47 = vadd.f32 %v2433_v53, %v2414_v43  ;;  %v2437_v61 = vadd.f32 %v2433_v53, %v2415_v22  ;;  %v2438_v24 = vadd.f32 %v2433_v53, %v2416_v41  ;;  %v2439_v25 = vadd.f32 %v2433_v53, %v2417_v12 }
 0x4da   :  { %v2464_v31 = vmax.f32 %v2448_v5, 0.0  ;;  %v2440_v4 = vadd.f32 %v2433_v53, %v2418_v20  ;;  %v2441_v15 = vadd.f32 %v2433_v53, %v2419_v42  ;;  %v2442_v11 = vadd.f32 %v2433_v53, %v2420_v57 }
 0x4db   :  { %v2443_v45 = vadd.f32 %v2433_v53, %v2421_v39  ;;  %v2444_v3 = vadd.f32 %v2433_v53, %v2422_v8  ;;  %v2445_v0 = vadd.f32 %v2433_v53, %v2423_v58  ;;  %v2446_v19 = vadd.f32 %v2433_v53, %v2424_v40 }
 0x4dc   :  { %v6187_v9 = vmin.f32 %v2464_v31, 6.0  ;;  %v2447_v50 = vadd.f32 %v2433_v53, %v2425_v30  ;;  %v2449_v28 = vadd.f32 %v2433_v53, %v2427_v17  ;;  %v2450_v55 = vadd.f32 %v2433_v53, %v2428_v33 }
 0x4dd   :  { %v2451_v56 = vmax.f32 %v2435_v52, 0.0  ;;  %v2452_v60 = vmax.f32 %v2436_v47, 0.0  ;;  %v2453_v46 = vmax.f32 %v2437_v61, 0.0  ;;  %v2454_v49 = vmax.f32 %v2438_v24, 0.0 }
 0x4de   :  { %7248 = vst [vmem:[#allocation19_spill] sm:$0xff] %v6187_v9  ;;  %2541 = vst [vmem:[#allocation2 + $0x308] sm:$0xff] %v6187_v9  ;;  %v2455_v43 = vmax.f32 %v2439_v25, 0.0  ;;  %v2456_v22 = vmax.f32 %v2440_v4, 0.0  ;;  %v2457_v41 = vmax.f32 %v2441_v15, 0.0  ;;  %v2458_v12 = vmax.f32 %v2442_v11, 0.0 }
 0x4df   :  { %v2459_v20 = vmax.f32 %v2443_v45, 0.0  ;;  %v2460_v42 = vmax.f32 %v2444_v3, 0.0  ;;  %v2461_v57 = vmax.f32 %v2445_v0, 0.0  ;;  %v2462_v39 = vmax.f32 %v2446_v19, 0.0 }
 0x4e0   :  { %v2463_v8 = vmax.f32 %v2447_v50, 0.0  ;;  %v2465_v58 = vmax.f32 %v2449_v28, 0.0  ;;  %v2466_v40 = vmax.f32 %v2450_v55, 0.0  ;;  %v2467_v30 = vmin.f32 %v2451_v56, 6.0 }
 0x4e1   :  { %v6190_v5 = vmin.f32 %v2452_v60, 6.0  ;;  %v6192_v53 = vmin.f32 %v2453_v46, 6.0  ;;  %v6194_v17 = vmin.f32 %v2454_v49, 6.0  ;;  %v6196_v33 = vmin.f32 %v2455_v43, 6.0 }
 0x4e2   :  { %v6198_v52 = vmin.f32 %v2456_v22, 6.0  ;;  %v6200_v47 = vmin.f32 %v2457_v41, 6.0  ;;  %v6202_v61 = vmin.f32 %v2458_v12, 6.0  ;;  %v6204_v0 = vmin.f32 %v2459_v20, 6.0  ;;  %2528 = vst [vmem:[#allocation2 + $0x28] sm:$0xff] %v2467_v30 }
 0x4e3   :  { %7249 = vst [vmem:[#allocation21_spill] sm:$0xff] %v6190_v5  ;;  %7250 = vst [vmem:[#allocation20_spill] sm:$0xff] %v6192_v53  ;;  %v6206_v24 = vmin.f32 %v2460_v42, 6.0  ;;  %v6208_v56 = vmin.f32 %v2461_v57, 6.0  ;;  %v6210_v25 = vmin.f32 %v2462_v39, 6.0  ;;  %v6212_v31 = vmin.f32 %v2463_v8, 6.0 }
 0x4e4   :  { %7251 = vst [vmem:[#allocation25_spill] sm:$0xff] %v6194_v17  ;;  %7252 = vst [vmem:[#allocation23_spill] sm:$0xff] %v6196_v33  ;;  %v6218_v4 = vmin.f32 %v2465_v58, 6.0  ;;  %v6220_v15 = vmin.f32 %v2466_v40, 6.0  ;;  %v2603_v11 = vmul.f32 %v6119_v14, %v2467_v30  ;;  %v2604_v45 = vmul.f32 %v6119_v14, %v6190_v5 }
 0x4e5   :  { %7253 = vst [vmem:[#allocation22_spill] sm:$0xff] %v6198_v52  ;;  %7254 = vst [vmem:[#allocation34_spill] sm:$0xff] %v6200_v47  ;;  %v6233_v3 = vld [vmem:[#allocation2 + $0x307] sm:$0xff]  ;;  %v2605_v19 = vmul.f32 %v6119_v14, %v6192_v53  ;;  %v2606_v50 = vmul.f32 %v6119_v14, %v6194_v17  ;;  %v2607_v28 = vmul.f32 %v6119_v14, %v6196_v33 }
 0x4e6   :  { %7255 = vst [vmem:[#allocation15_spill] sm:$0xff] %v6202_v61  ;;  %7256 = vst [vmem:[#allocation33_spill] sm:$0xff] %v6204_v0  ;;  %v2608_v55 = vmul.f32 %v6119_v14, %v6198_v52  ;;  %v6243_v60 = vld [vmem:[#allocation2 + $0x309] sm:$0xff]  ;;  %v2580_v46 = vmul.f32 %v6115_v23, %v6233_v3  ;;  %v2609_v49 = vmul.f32 %v6119_v14, %v6200_v47 }
 0x4e7   :  { %7257 = vst [vmem:[#allocation30_spill] sm:$0xff] %v6206_v24  ;;  %7258 = vst [vmem:[#allocation3_spill] sm:$0xff] %v6208_v56  ;;  %v2611_v43 = vmul.f32 %v6119_v14, %v6204_v0  ;;  %v2612_v22 = vmul.f32 %v6119_v14, %v6206_v24  ;;  %v2613_v41 = vmul.f32 %v6119_v14, %v6208_v56 }
 0x4e8   :  { %7259 = vst [vmem:[#allocation37_spill] sm:$0xff] %v6210_v25  ;;  %7260 = vst [vmem:[#allocation38_spill] sm:$0xff] %v6212_v31  ;;  %v2614_v12 = vmul.f32 %v6119_v14, %v6210_v25  ;;  %v2615_v20 = vmul.f32 %v6119_v14, %v6212_v31  ;;  %v2616_v42 = vmul.f32 %v6119_v14, %v6187_v9 }
 0x4e9   :  { %2529 = vst [vmem:[#allocation2 + $0x48] sm:$0xff] %v6190_v5  ;;  %2530 = vst [vmem:[#allocation2 + $0x68] sm:$0xff] %v6192_v53  ;;  %v2617_v57 = vmul.f32 %v6119_v14, %v6218_v4  ;;  %v2668_v39 = vmul.f32 %v6123_v29, %v6243_v60  ;;  %v6269_v8 = vmul.f32 %v6135_v37, %v6233_v3  ;;  %v2547_v40 = vld [vmem:[#allocation2 + $0x27] sm:$0xff] }
 0x4ea   :  { %2531 = vst [vmem:[#allocation2 + $0x88] sm:$0xff] %v6194_v17  ;;  %2532 = vst [vmem:[#allocation2 + $0xa8] sm:$0xff] %v6196_v33  ;;  %v6272_v58 = vmul.f32 %v6139_v13, %v2467_v30  ;;  %v2632_v62 = vadd.f32 %v2616_v42, %v2580_v46  ;;  %v6274_v32 = vld [vmem:[#allocation2 + $0x29] sm:$0xff]  ;;  %v6278_v59 = vmul.f32 %v6139_v13, %v6190_v5 }
 0x4eb   :  { %7261 = vst [vmem:[#allocation39_spill] sm:$0xff] %v6218_v4  ;;  %7262 = vst [vmem:[#allocation40_spill] sm:$0xff] %v6220_v15  ;;  %v6282_v14 = vmul.f32 %v6139_v13, %v6192_v53  ;;  %v6286_v48 = vmul.f32 %v6139_v13, %v6194_v17  ;;  %v2567_v46 = vmul.f32 %v6115_v23, %v2547_v40 }
 0x4ec   :  { %2533 = vst [vmem:[#allocation2 + $0xc8] sm:$0xff] %v6198_v52  ;;  %2534 = vst [vmem:[#allocation2 + $0xe8] sm:$0xff] %v6200_v47  ;;  %v2655_v42 = vmul.f32 %v6123_v29, %v6274_v32  ;;  %v6298_v10 = vmul.f32 %v6135_v37, %v2547_v40  ;;  %v6302_v36 = vmul.f32 %v6139_v13, %v6196_v33 }
 0x4ed   :  { %2535 = vst [vmem:[#allocation2 + $0x108] sm:$0xff] %v6202_v61  ;;  %2536 = vst [vmem:[#allocation2 + $0x268] sm:$0xff] %v6204_v0  ;;  %v6316_v6 = vadd.f32 %v2668_v39, %v2632_v62  ;;  %v2619_v16 = vadd.f32 %v2603_v11, %v2567_v46 }
 0x4ee   :  { %2537 = vst [vmem:[#allocation2 + $0x288] sm:$0xff] %v6206_v24  ;;  %2538 = vst [vmem:[#allocation2 + $0x2a8] sm:$0xff] %v6208_v56 }
 0x4ef   :  { %2539 = vst [vmem:[#allocation2 + $0x2c8] sm:$0xff] %v6210_v25  ;;  %2540 = vst [vmem:[#allocation2 + $0x2e8] sm:$0xff] %v6212_v31 }
 0x4f0   :  { %7263 = vst [vmem:[#allocation41_spill] sm:$0xff] %v6233_v3  ;;  %7264 = vst [vmem:[#allocation42_spill] sm:$0xff] %v6243_v60  ;;  %v6288_v7 = vld [vmem:[#allocation2 + $0x47] sm:$0xff] }
 0x4f1   :  { %2542 = vst [vmem:[#allocation2 + $0x328] sm:$0xff] %v6218_v4  ;;  %2543 = vst [vmem:[#allocation2 + $0x348] sm:$0xff] %v6220_v15  ;;  %v6290_v30 = vld [vmem:[#allocation2 + $0x67] sm:$0xff]  ;;  %v2568_v27 = vmul.f32 %v6115_v23, %v6288_v7 }
 0x4f2   :  { %7265 = vst [vmem:[#allocation43_spill] sm:$0xff] %v6272_v58  ;;  %7266 = vst [vmem:[#allocation44_spill] sm:$0xff] %v6274_v32  ;;  %v6292_v1 = vld [vmem:[#allocation2 + $0x87] sm:$0xff]  ;;  %v2569_v63 = vmul.f32 %v6115_v23, %v6290_v30 }
 0x4f3   :  { %7267 = vst [vmem:[#allocation45_spill] sm:$0xff] %v6278_v59  ;;  %7268 = vst [vmem:[#allocation46_spill] sm:$0xff] %v6282_v14  ;;  %v6304_v44 = vld [vmem:[#allocation2 + $0xa7] sm:$0xff]  ;;  %v2570_v40 = vmul.f32 %v6115_v23, %v6292_v1  ;;  %v2620_v38 = vadd.f32 %v2604_v45, %v2568_v27 }
 0x4f4   :  { %7269 = vst [vmem:[#allocation47_spill] sm:$0xff] %v6286_v48  ;;  %7270 = vst [vmem:[#allocation48_spill] sm:$0xff] %v6302_v36  ;;  %v6306_v51 = vld [vmem:[#allocation2 + $0xc7] sm:$0xff]  ;;  %v2571_v53 = vmul.f32 %v6115_v23, %v6304_v44  ;;  %v2621_v36 = vadd.f32 %v2605_v19, %v2569_v63 }
 0x4f5   :  { %v6308_v34 = vld [vmem:[#allocation2 + $0xe7] sm:$0xff]  ;;  %v2572_v2 = vmul.f32 %v6115_v23, %v6306_v51  ;;  %v2622_v58 = vadd.f32 %v2606_v50, %v2570_v40  ;;  %v2671_v40 = vadd.f32 %v2655_v42, %v2619_v16  ;;  %v2711_v16 = vmul.f32 %v6135_v37, %v6306_v51 }
 0x4f6   :  { %v6318_v26 = vld [vmem:[#allocation2 + $0x267] sm:$0xff]  ;;  %v2573_v5 = vmul.f32 %v6115_v23, %v6308_v34  ;;  %v2623_v15 = vadd.f32 %v2607_v28, %v2571_v53 }
 0x4f7   :  { %v6320_v33 = vld [vmem:[#allocation2 + $0x287] sm:$0xff]  ;;  %v2575_v3 = vmul.f32 %v6115_v23, %v6318_v26  ;;  %v2624_v4 = vadd.f32 %v2608_v55, %v2572_v2 }
 0x4f8   :  { %v6322_v17 = vld [vmem:[#allocation2 + $0x2a7] sm:$0xff]  ;;  %v2576_v18 = vmul.f32 %v6115_v23, %v6320_v33  ;;  %v2625_v27 = vadd.f32 %v2609_v49, %v2573_v5 }
 0x4f9   :  { %v6330_v54 = vld [vmem:[#allocation2 + $0x2c7] sm:$0xff]  ;;  %v2577_v60 = vmul.f32 %v6115_v23, %v6322_v17  ;;  %v2627_v25 = vadd.f32 %v2611_v43, %v2575_v3 }
 0x4fa   :  { %v6332_v62 = vld [vmem:[#allocation2 + $0x2e7] sm:$0xff]  ;;  %v2578_v32 = vmul.f32 %v6115_v23, %v6330_v54  ;;  %v2628_v56 = vadd.f32 %v2612_v22, %v2576_v18  ;;  %v2717_v42 = vmul.f32 %v6135_v37, %v6330_v54 }
 0x4fb   :  { %v6334_v39 = vld [vmem:[#allocation2 + $0x327] sm:$0xff]  ;;  %v2579_v11 = vmul.f32 %v6115_v23, %v6332_v62 }
 0x4fc   :  { %v2581_v46 = vmul.f32 %v6115_v23, %v6334_v39  ;;  %v6348_v48 = vld [vmem:[#allocation2 + $0x49] sm:$0xff]  ;;  %v2629_v23 = vadd.f32 %v2613_v41, %v2577_v60  ;;  %v2630_v63 = vadd.f32 %v2614_v12, %v2578_v32 }
 0x4fd   :  { %7271 = vst [vmem:[#allocation49_spill] sm:$0xff] %v6348_v48  ;;  %v6350_v14 = vld [vmem:[#allocation2 + $0x69] sm:$0xff]  ;;  %v2631_v50 = vadd.f32 %v2615_v20, %v2579_v11  ;;  %v2656_v3 = vmul.f32 %v6123_v29, %v6348_v48 }
 0x4fe   :  { %7272 = vst [vmem:[#allocation50_spill] sm:$0xff] %v6350_v14  ;;  %v6352_v59 = vld [vmem:[#allocation2 + $0x89] sm:$0xff]  ;;  %v2633_v53 = vadd.f32 %v2617_v57, %v2581_v46  ;;  %v2657_v32 = vmul.f32 %v6123_v29, %v6350_v14 }
 0x4ff   :  { %7273 = vst [vmem:[#allocation51_spill] sm:$0xff] %v6352_v59  ;;  %v6354_v45 = vld [vmem:[#allocation2 + $0xa9] sm:$0xff]  ;;  %v2658_v18 = vmul.f32 %v6123_v29, %v6352_v59  ;;  %v2672_v11 = vadd.f32 %v2656_v3, %v2620_v38  ;;  %v2710_v38 = vmul.f32 %v6135_v37, %v6304_v44 }
 0x500   :  { %7274 = vst [vmem:[#allocation52_spill] sm:$0xff] %v6354_v45  ;;  %v6356_v9 = vld [vmem:[#allocation2 + $0xc9] sm:$0xff]  ;;  %v2659_v55 = vmul.f32 %v6123_v29, %v6354_v45  ;;  %v2673_v46 = vadd.f32 %v2657_v32, %v2621_v36  ;;  %v2708_v36 = vmul.f32 %v6135_v37, %v6290_v30 }
 0x501   :  { %7275 = vst [vmem:[#allocation53_spill] sm:$0xff] %v6356_v9  ;;  %v6358_v31 = vld [vmem:[#allocation2 + $0xe9] sm:$0xff]  ;;  %v2660_v60 = vmul.f32 %v6123_v29, %v6356_v9 }
 0x502   :  { %7276 = vst [vmem:[#allocation54_spill] sm:$0xff] %v6358_v31  ;;  %v6360_v19 = vld [vmem:[#allocation2 + $0x269] sm:$0xff]  ;;  %v2661_v49 = vmul.f32 %v6123_v29, %v6358_v31  ;;  %v2674_v31 = vadd.f32 %v2658_v18, %v2622_v58  ;;  %v2716_v58 = vmul.f32 %v6135_v37, %v6322_v17 }
 0x503   :  { %7277 = vst [vmem:[#allocation55_spill] sm:$0xff] %v6360_v19  ;;  %v6362_v24 = vld [vmem:[#allocation2 + $0x289] sm:$0xff]  ;;  %v2663_v43 = vmul.f32 %v6123_v29, %v6360_v19  ;;  %v2675_v19 = vadd.f32 %v2659_v55, %v2623_v15  ;;  %v2676_v9 = vadd.f32 %v2660_v60, %v2624_v4  ;;  %v2714_v4 = vmul.f32 %v6135_v37, %v6318_v26 }
 0x504   :  { %7278 = vst [vmem:[#allocation56_spill] sm:$0xff] %v6362_v24  ;;  %v6364_v0 = vld [vmem:[#allocation2 + $0x2a9] sm:$0xff]  ;;  %v2664_v22 = vmul.f32 %v6123_v29, %v6362_v24  ;;  %v2677_v45 = vadd.f32 %v2661_v49, %v2625_v27  ;;  %v2715_v15 = vmul.f32 %v6135_v37, %v6320_v33  ;;  %v2718_v27 = vmul.f32 %v6135_v37, %v6332_v62 }
 0x505   :  { %7279 = vst [vmem:[#allocation57_spill] sm:$0xff] %v6364_v0  ;;  %v6366_v2 = vld [vmem:[#allocation2 + $0x2c9] sm:$0xff]  ;;  %v2665_v41 = vmul.f32 %v6123_v29, %v6364_v0  ;;  %v2679_v24 = vadd.f32 %v2663_v43, %v2627_v25  ;;  %v2722_v26 = vadd.f32 %v6298_v10, %v6157_v21  ;;  %v2726_v32 = vadd.f32 %v2710_v38, %v2674_v31  ;;  %v7284_v21 = vld [vmem:[#allocation34_spill] sm:$0xff]  ;;  %v7294_v38 = vld [vmem:[#allocation43_spill] sm:$0xff] }
 0x506   :  { %7280 = vst [vmem:[#allocation58_spill] sm:$0xff] %v6366_v2  ;;  %v6368_v5 = vld [vmem:[#allocation2 + $0x2e9] sm:$0xff]  ;;  %v2666_v12 = vmul.f32 %v6123_v29, %v6366_v2  ;;  %v2680_v59 = vadd.f32 %v2664_v22, %v2628_v56  ;;  %v2712_v56 = vmul.f32 %v6135_v37, %v6308_v34  ;;  %v2727_v18 = vadd.f32 %v2711_v16, %v2675_v19  ;;  %v7285_v19 = vld [vmem:[#allocation15_spill] sm:$0xff] }
 0x507   :  { %7281 = vst [vmem:[#allocation59_spill] sm:$0xff] %v6368_v5  ;;  %v6370_v28 = vld [vmem:[#allocation2 + $0x329] sm:$0xff]  ;;  %v2667_v20 = vmul.f32 %v6123_v29, %v6368_v5  ;;  %v2681_v14 = vadd.f32 %v2665_v41, %v2629_v23  ;;  %v2707_v5 = vmul.f32 %v6135_v37, %v6288_v7  ;;  %v2720_v23 = vmul.f32 %v6135_v37, %v6334_v39 }
 0x508   :  { %7282 = vst [vmem:[#allocation60_spill] sm:$0xff] %v6370_v28  ;;  %v2669_v57 = vmul.f32 %v6123_v29, %v6370_v28  ;;  %v6396_v0 = vld [vmem:[#allocation2 + $0x107] sm:$0xff]  ;;  %v2682_v48 = vadd.f32 %v2666_v12, %v2630_v63  ;;  %v2709_v29 = vmul.f32 %v6135_v37, %v6292_v1  ;;  %v2728_v55 = vadd.f32 %v2712_v56, %v2676_v9  ;;  %v7295_v56 = vld [vmem:[#allocation45_spill] sm:$0xff] }
 0x509   :  { %v2683_v2 = vadd.f32 %v2667_v20, %v2631_v50  ;;  %v6400_v47 = vld [vmem:[#allocation2 + $0x347] sm:$0xff]  ;;  %v2713_v25 = vmul.f32 %v6135_v37, %v6396_v0  ;;  %v2723_v50 = vadd.f32 %v2707_v5, %v2671_v40  ;;  %v2730_v49 = vadd.f32 %v2714_v4, %v6159_v35  ;;  %v7296_v4 = vld [vmem:[#allocation46_spill] sm:$0xff] }
 0x50a   :  { %v2685_v61 = vadd.f32 %v2669_v57, %v2633_v53  ;;  %7283 = vst [vmem:[#allocation61_spill] sm:$0xff] %v6400_v47  ;;  %v2721_v63 = vmul.f32 %v6135_v37, %v6400_v47  ;;  %v2724_v53 = vadd.f32 %v2708_v36, %v2672_v11  ;;  %v2725_v3 = vadd.f32 %v2709_v29, %v2673_v46  ;;  %v7291_v5 = vld [vmem:[#allocation19_spill] sm:$0xff]  ;;  %v7293_v36 = vld [vmem:[#allocation40_spill] sm:$0xff] }
 0x50b   :  { %v2729_v60 = vadd.f32 %v2713_v25, %v2677_v45  ;;  %v2731_v43 = vadd.f32 %v2715_v15, %v2679_v24  ;;  %v2732_v22 = vadd.f32 %v2716_v58, %v2680_v59  ;;  %v2733_v41 = vadd.f32 %v2717_v42, %v2681_v14  ;;  %v7286_v45 = vld [vmem:[#allocation33_spill] sm:$0xff]  ;;  %v7287_v59 = vld [vmem:[#allocation30_spill] sm:$0xff]  ;;  %v7288_v24 = vld [vmem:[#allocation3_spill] sm:$0xff] }
 0x50c   :  { %v2734_v12 = vadd.f32 %v2718_v27, %v2682_v48  ;;  %v2735_v20 = vadd.f32 %v6269_v8, %v2683_v2  ;;  %v2736_v37 = vadd.f32 %v2720_v23, %v6316_v6  ;;  %v2737_v57 = vadd.f32 %v2721_v63, %v2685_v61  ;;  %v7289_v6 = vld [vmem:[#allocation37_spill] sm:$0xff]  ;;  %v7290_v14 = vld [vmem:[#allocation38_spill] sm:$0xff]  ;;  %v7292_v11 = vld [vmem:[#allocation39_spill] sm:$0xff] }
 0x50d   :  { %v2763_v10 = vmul.f32 %v6139_v13, %v6198_v52  ;;  %v2764_v31 = vmul.f32 %v6139_v13, %v7284_v21  ;;  %v2765_v9 = vmul.f32 %v6139_v13, %v7285_v19  ;;  %v2766_v35 = vmul.f32 %v6139_v13, %v7286_v45  ;;  %v7297_v58 = vld [vmem:[#allocation47_spill] sm:$0xff]  ;;  %v7298_v27 = vld [vmem:[#allocation48_spill] sm:$0xff] }
 0x50e   :  { %v2767_v48 = vmul.f32 %v6139_v13, %v7287_v59  ;;  %v2768_v8 = vmul.f32 %v6139_v13, %v7288_v24  ;;  %v2769_v61 = vmul.f32 %v6139_v13, %v7289_v6  ;;  %v2770_v2 = vmul.f32 %v6139_v13, %v7290_v14  ;;  %v6460_v59 = vld [vmem:[#allocation2 + $0x109] sm:$0xff] }
 0x50f   :  { %v2771_v40 = vmul.f32 %v6139_v13, %v7291_v5  ;;  %v2772_v46 = vmul.f32 %v6139_v13, %v7292_v11  ;;  %v2773_v29 = vmul.f32 %v6139_v13, %v7293_v36  ;;  %v2774_v16 = vadd.f32 %v7294_v38, %v2722_v26  ;;  %7299 = vst [vmem:[#allocation33_spill] sm:$0xff] %v6460_v59 }
 0x510   :  { %v2775_v25 = vadd.f32 %v7295_v56, %v2723_v50  ;;  %v2776_v15 = vadd.f32 %v7296_v4, %v2724_v53  ;;  %v2777_v42 = vadd.f32 %v7297_v58, %v2725_v3  ;;  %v2778_v23 = vadd.f32 %v7298_v27, %v2726_v32  ;;  %v6462_v50 = vld [vmem:[#allocation2 + $0x349] sm:$0xff] }
 0x511   :  { %v2779_v63 = vadd.f32 %v2763_v10, %v2727_v18  ;;  %v2780_v45 = vadd.f32 %v2764_v31, %v2728_v55  ;;  %v2781_v14 = vadd.f32 %v2765_v9, %v2729_v60  ;;  %v2782_v5 = vadd.f32 %v2766_v35, %v2730_v49  ;;  %v7300_v53 = vld [vmem:[#allocation44_spill] sm:$0xff]  ;;  %v7301_v56 = vld [vmem:[#allocation17_spill] sm:$0xff]  ;;  %v7303_v18 = vld [vmem:[#allocation50_spill] sm:$0xff] }
 0x512   :  { %v2783_v6 = vadd.f32 %v2767_v48, %v2731_v43  ;;  %v2784_v24 = vadd.f32 %v2768_v8, %v2732_v22  ;;  %v2785_v11 = vadd.f32 %v2769_v61, %v2733_v41  ;;  %v2786_v13 = vadd.f32 %v2770_v2, %v2734_v12  ;;  %v7302_v4 = vld [vmem:[#allocation49_spill] sm:$0xff]  ;;  %v7304_v60 = vld [vmem:[#allocation51_spill] sm:$0xff]  ;;  %v7305_v43 = vld [vmem:[#allocation52_spill] sm:$0xff] }
 0x513   :  { %v2787_v36 = vadd.f32 %v2771_v40, %v2735_v20  ;;  %v2788_v26 = vadd.f32 %v2772_v46, %v2736_v37  ;;  %v2789_v38 = vadd.f32 %v2773_v29, %v2737_v57  ;;  %v2810_v3 = vmul.f32 %v7301_v56, %v7300_v53  ;;  %v7306_v41 = vld [vmem:[#allocation53_spill] sm:$0xff]  ;;  %v7307_v20 = vld [vmem:[#allocation54_spill] sm:$0xff]  ;;  %v7308_v10 = vld [vmem:[#allocation55_spill] sm:$0xff] }
 0x514   :  { %v2811_v32 = vmul.f32 %v7301_v56, %v7302_v4  ;;  %v2812_v55 = vmul.f32 %v7301_v56, %v7303_v18  ;;  %v2813_v49 = vmul.f32 %v7301_v56, %v7304_v60  ;;  %v2814_v22 = vmul.f32 %v7301_v56, %v7305_v43  ;;  %v7309_v9 = vld [vmem:[#allocation56_spill] sm:$0xff]  ;;  %v7310_v48 = vld [vmem:[#allocation57_spill] sm:$0xff]  ;;  %v7311_v61 = vld [vmem:[#allocation58_spill] sm:$0xff] }
 0x515   :  { %v2815_v12 = vmul.f32 %v7301_v56, %v7306_v41  ;;  %v2816_v37 = vmul.f32 %v7301_v56, %v7307_v20  ;;  %v2817_v57 = vmul.f32 %v7301_v56, %v6460_v59  ;;  %v2818_v31 = vmul.f32 %v7301_v56, %v7308_v10  ;;  %v7312_v40 = vld [vmem:[#allocation59_spill] sm:$0xff]  ;;  %v7313_v29 = vld [vmem:[#allocation42_spill] sm:$0xff] }
 0x516   :  { %v2819_v35 = vmul.f32 %v7301_v56, %v7309_v9  ;;  %v2820_v8 = vmul.f32 %v7301_v56, %v7310_v48  ;;  %v2821_v2 = vmul.f32 %v7301_v56, %v7311_v61  ;;  %v2822_v46 = vmul.f32 %v7301_v56, %v7312_v40 }
 0x517   :  { %v2823_v58 = vmul.f32 %v7301_v56, %v7313_v29  ;;  %v2824_v27 = vmul.f32 %v7301_v56, %v6370_v28  ;;  %v2825_v53 = vmul.f32 %v7301_v56, %v6462_v50  ;;  %v2826_v10 = vadd.f32 %v2810_v3, %v2774_v16  ;;  %v7314_v28 = vld [vmem:[#allocation29_spill] sm:$0xff] }
 0x518   :  { %v2827_v9 = vadd.f32 %v2811_v32, %v2775_v25  ;;  %v2828_v59 = vadd.f32 %v2812_v55, %v2776_v15  ;;  %v2829_v20 = vadd.f32 %v2813_v49, %v2777_v42  ;;  %v2830_v48 = vadd.f32 %v2814_v22, %v2778_v23  ;;  %v7319_v22 = vld [vmem:[#allocation21_spill] sm:$0xff] }
 0x519   :  { %v2831_v41 = vadd.f32 %v2815_v12, %v2779_v63  ;;  %v2832_v43 = vadd.f32 %v2816_v37, %v2780_v45  ;;  %v2833_v61 = vadd.f32 %v2817_v57, %v2781_v14  ;;  %v2834_v60 = vadd.f32 %v2818_v31, %v2782_v5  ;;  %v7321_v12 = vld [vmem:[#allocation20_spill] sm:$0xff]  ;;  %v7326_v37 = vld [vmem:[#allocation15_spill] sm:$0xff]  ;;  %v7327_v57 = vld [vmem:[#allocation30_spill] sm:$0xff] }
 0x51a   :  { %v2835_v4 = vadd.f32 %v2819_v35, %v2783_v6  ;;  %v2836_v40 = vadd.f32 %v2820_v8, %v2784_v24  ;;  %v2837_v18 = vadd.f32 %v2821_v2, %v2785_v11  ;;  %v2838_v19 = vadd.f32 %v2822_v46, %v2786_v13  ;;  %v7315_v11 = vld [vmem:[#allocation41_spill] sm:$0xff] }
 0x51b   :  { %v2839_v29 = vadd.f32 %v2823_v58, %v2787_v36  ;;  %v2840_v21 = vadd.f32 %v2824_v27, %v2788_v26  ;;  %v2841_v52 = vadd.f32 %v2825_v53, %v2789_v38  ;;  %v2862_v47 = vmul.f32 %v7314_v28, %v6288_v7  ;;  %v7316_v36 = vld [vmem:[#allocation61_spill] sm:$0xff]  ;;  %v7333_v27 = vld [vmem:[#allocation40_spill] sm:$0xff] }
 0x51c   :  { %v2863_v16 = vmul.f32 %v7314_v28, %v6290_v30  ;;  %v2864_v25 = vmul.f32 %v7314_v28, %v6292_v1  ;;  %v2865_v14 = vmul.f32 %v7314_v28, %v6304_v44  ;;  %v2866_v24 = vmul.f32 %v7314_v28, %v6306_v51 }
 0x51d   :  { %v2867_v6 = vmul.f32 %v7314_v28, %v6308_v34  ;;  %v2868_v5 = vmul.f32 %v7314_v28, %v6396_v0  ;;  %v2870_v7 = vmul.f32 %v7314_v28, %v6320_v33  ;;  %v2871_v30 = vmul.f32 %v7314_v28, %v6322_v17 }
 0x51e   :  { %v2872_v1 = vmul.f32 %v7314_v28, %v6330_v54  ;;  %v2873_v44 = vmul.f32 %v7314_v28, %v6332_v62  ;;  %v2874_v51 = vmul.f32 %v7314_v28, %v7315_v11  ;;  %v2875_v34 = vmul.f32 %v7314_v28, %v6334_v39  ;;  %v7317_v54 = vld [vmem:[#allocation14_spill] sm:$0xff] }
 0x51f   :  { %v2876_v0 = vmul.f32 %v7314_v28, %v7316_v36  ;;  %v2878_v15 = vadd.f32 %v2862_v47, %v2826_v10  ;;  %v2879_v33 = vadd.f32 %v2863_v16, %v2827_v9  ;;  %v2880_v42 = vadd.f32 %v2864_v25, %v2828_v59  ;;  %v7318_v39 = vld [vmem:[#allocation18_spill] sm:$0xff]  ;;  %v7328_v9 = vld [vmem:[#allocation3_spill] sm:$0xff] }
 0x520   :  { %v2881_v23 = vadd.f32 %v2865_v14, %v2829_v20  ;;  %v2882_v17 = vadd.f32 %v2866_v24, %v2830_v48  ;;  %v2883_v63 = vadd.f32 %v2867_v6, %v2831_v41  ;;  %v2884_v45 = vadd.f32 %v2868_v5, %v2832_v43  ;;  %v7320_v28 = vld [vmem:[#allocation26_spill] sm:$0xff]  ;;  %v7322_v20 = vld [vmem:[#allocation25_spill] sm:$0xff]  ;;  %v7323_v41 = vld [vmem:[#allocation23_spill] sm:$0xff] }
 0x521   :  { %v2885_v13 = vadd.f32 %v7317_v54, %v2833_v61  ;;  %v2886_v26 = vadd.f32 %v2870_v7, %v2834_v60  ;;  %v2887_v62 = vadd.f32 %v2871_v30, %v2835_v4  ;;  %v2888_v38 = vadd.f32 %v2872_v1, %v2836_v40  ;;  %v7324_v4 = vld [vmem:[#allocation22_spill] sm:$0xff]  ;;  %v7329_v48 = vld [vmem:[#allocation37_spill] sm:$0xff]  ;;  %v7331_v40 = vld [vmem:[#allocation19_spill] sm:$0xff] }
 0x522   :  { %v2889_v56 = vadd.f32 %v2873_v44, %v2837_v18  ;;  %v2890_v3 = vadd.f32 %v2874_v51, %v2838_v19  ;;  %v2891_v32 = vadd.f32 %v2875_v34, %v2839_v29  ;;  %v2892_v55 = vadd.f32 %v2876_v0, %v2840_v21  ;;  %v7325_v19 = vld [vmem:[#allocation34_spill] sm:$0xff]  ;;  %v7332_v29 = vld [vmem:[#allocation39_spill] sm:$0xff]  ;;  %v7334_v7 = vld [vmem:[#allocation16_spill] sm:$0xff] }
 0x523   :  { %v2893_v49 = vadd.f32 %v7318_v39, %v2841_v52  ;;  %v2914_v47 = vmul.f32 %v7320_v28, %v7319_v22  ;;  %v2915_v59 = vmul.f32 %v7320_v28, %v7321_v12  ;;  %v2916_v43 = vmul.f32 %v7320_v28, %v7322_v20  ;;  %v7330_v61 = vld [vmem:[#allocation38_spill] sm:$0xff]  ;;  %v6558_v1 = vld [vmem:[%s6854_s13 + $0x8] ss:$0 sm:$0xff]  ;;  %v7337_v54 = vld [vmem:[#allocation51_spill] sm:$0xff] }
 0x524   :  { %v2917_v60 = vmul.f32 %v7320_v28, %v7323_v41  ;;  %v2918_v18 = vmul.f32 %v7320_v28, %v7324_v4  ;;  %v2919_v21 = vmul.f32 %v7320_v28, %v7325_v19  ;;  %v2920_v52 = vmul.f32 %v7320_v28, %v7326_v37  ;;  %v7340_v12 = vld [vmem:[#allocation54_spill] sm:$0xff]  ;;  %v7341_v4 = vld [vmem:[#allocation33_spill] sm:$0xff] }
 0x525   :  { %v2922_v31 = vmul.f32 %v7320_v28, %v7327_v57  ;;  %v2923_v35 = vmul.f32 %v7320_v28, %v7328_v9  ;;  %v2924_v8 = vmul.f32 %v7320_v28, %v7329_v48  ;;  %v2925_v2 = vmul.f32 %v7320_v28, %v7330_v61 }
 0x526   :  { %v2926_v46 = vmul.f32 %v7320_v28, %v7331_v40  ;;  %v2927_v58 = vmul.f32 %v7320_v28, %v7332_v29  ;;  %v2928_v53 = vmul.f32 %v7320_v28, %v7333_v27  ;;  %v2930_v10 = vadd.f32 %v2914_v47, %v2878_v15  ;;  %v2953_v28 = vld [vmem:[#allocation2 + $0x129] sm:$0xff] }
 0x527   :  { %v2931_v16 = vadd.f32 %v2915_v59, %v2879_v33  ;;  %v2932_v25 = vadd.f32 %v2916_v43, %v2880_v42  ;;  %v2933_v14 = vadd.f32 %v2917_v60, %v2881_v23  ;;  %v2934_v24 = vadd.f32 %v2918_v18, %v2882_v17  ;;  %v7335_v42 = vld [vmem:[#allocation50_spill] sm:$0xff]  ;;  %v7336_v17 = vld [vmem:[#allocation49_spill] sm:$0xff] }
 0x528   :  { %v2935_v6 = vadd.f32 %v2919_v21, %v2883_v63  ;;  %v2936_v5 = vadd.f32 %v2920_v52, %v2884_v45  ;;  %v2937_v30 = vadd.f32 %v7334_v7, %v2885_v13  ;;  %v2938_v44 = vadd.f32 %v2922_v31, %v2886_v26 }
 0x529   :  { %v2939_v11 = vadd.f32 %v2923_v35, %v2887_v62  ;;  %v2940_v51 = vadd.f32 %v2924_v8, %v2888_v38  ;;  %v2941_v34 = vadd.f32 %v2925_v2, %v2889_v56  ;;  %v2942_v36 = vadd.f32 %v2926_v46, %v2890_v3  ;;  %v7338_v62 = vld [vmem:[#allocation52_spill] sm:$0xff] }
 0x52a   :  { %v6560_v0 = vadd.f32 %v2927_v58, %v2891_v32  ;;  %v6562_v15 = vadd.f32 %v2928_v53, %v2892_v55  ;;  %v6565_v33 = vadd.f32 %v7334_v7, %v2893_v49  ;;  %v2967_v23 = vmul.f32 %v6558_v1, %v7335_v42  ;;  %v7339_v55 = vld [vmem:[#allocation53_spill] sm:$0xff]  ;;  %v7342_v8 = vld [vmem:[#allocation56_spill] sm:$0xff]  ;;  %v7345_v42 = vld [vmem:[#allocation59_spill] sm:$0xff] }
 0x52b   :  { %v2966_v63 = vmul.f32 %v6558_v1, %v7336_v17  ;;  %v2968_v13 = vmul.f32 %v6558_v1, %v7337_v54  ;;  %v2969_v38 = vmul.f32 %v6558_v1, %v7338_v62  ;;  %v2970_v39 = vmul.f32 %v6558_v1, %v7339_v55  ;;  %v7343_v58 = vld [vmem:[#allocation57_spill] sm:$0xff] }
 0x52c   :  { %v6571_v45 = vadd.f32 %v2967_v23, %v2931_v16  ;;  %v2971_v59 = vmul.f32 %v6558_v1, %v7340_v12  ;;  %v2972_v18 = vmul.f32 %v6558_v1, %v7341_v4  ;;  %v2973_v19 = vmul.f32 %v6558_v1, %v2953_v28 }
 0x52d   :  { %v6575_v26 = vadd.f32 %v2966_v63, %v2930_v10  ;;  %v6579_v56 = vadd.f32 %v2968_v13, %v2932_v25  ;;  %v6587_v49 = vadd.f32 %v2969_v38, %v2933_v14  ;;  %v6594_v20 = vadd.f32 %v2970_v39, %v2934_v24  ;;  %v7344_v14 = vld [vmem:[#allocation58_spill] sm:$0xff] }
 0x52e   :  { %v3022_v32 = vmul.f32 %v6571_v45, %v6571_v45  ;;  %v6602_v21 = vadd.f32 %v2971_v59, %v2935_v6  ;;  %v6607_v31 = vadd.f32 %v2972_v18, %v2936_v5  ;;  %v2974_v61 = vmul.f32 %v6558_v1, %v7342_v8  ;;  %v7346_v13 = vld [vmem:[#allocation42_spill] sm:$0xff] }
 0x52f   :  { %v3000_v3 = vadd.f32 %v6571_v45, %v6575_v26  ;;  %v3021_v47 = vmul.f32 %v6575_v26, %v6575_v26  ;;  %v3023_v41 = vmul.f32 %v6579_v56, %v6579_v56  ;;  %v3024_v52 = vmul.f32 %v6587_v49, %v6587_v49 }
 0x530   :  { %v3025_v35 = vmul.f32 %v6594_v20, %v6594_v20  ;;  %v6614_v2 = vadd.f32 %v2973_v19, %v2937_v30  ;;  %v3026_v46 = vmul.f32 %v6602_v21, %v6602_v21  ;;  %v2975_v27 = vmul.f32 %v6558_v1, %v7343_v58 }
 0x531   :  { %v3001_v22 = vadd.f32 %v3000_v3, %v6579_v56  ;;  %v3037_v60 = vadd.f32 %v3022_v32, %v3021_v47  ;;  %v6621_v53 = vadd.f32 %v2974_v61, %v2938_v44  ;;  %v3027_v16 = vmul.f32 %v6607_v31, %v6607_v31  ;;  %v2961_v3 = vld [vmem:[#allocation2 + $0x369] sm:$0xff] }
 0x532   :  { %v2976_v24 = vmul.f32 %v6558_v1, %v7344_v14  ;;  %v6628_v6 = vadd.f32 %v2975_v27, %v2939_v11  ;;  %v3028_v7 = vmul.f32 %v6614_v2, %v6614_v2  ;;  %v2977_v44 = vmul.f32 %v6558_v1, %v7345_v42 }
 0x533   :  { %v3002_v43 = vadd.f32 %v3001_v22, %v6587_v49  ;;  %v3038_v57 = vadd.f32 %v3037_v60, %v3023_v41  ;;  %v3029_v63 = vmul.f32 %v6621_v53, %v6621_v53  ;;  %v2978_v11 = vmul.f32 %v6558_v1, %v7346_v13 }
 0x534   :  { %v6635_v23 = vadd.f32 %v2976_v24, %v2940_v51  ;;  %v6642_v62 = vadd.f32 %v2977_v44, %v2941_v34  ;;  %v3030_v32 = vmul.f32 %v6628_v6, %v6628_v6  ;;  %v7347_v51 = vld [vmem:[#allocation60_spill] sm:$0xff]  ;;  %v2981_v34 = vmul.f32 %v6558_v1, %v2961_v3 }
 0x535   :  { %v3003_v37 = vadd.f32 %v3002_v43, %v6594_v20  ;;  %v3039_v48 = vadd.f32 %v3038_v57, %v3024_v52  ;;  %v2979_v39 = vmul.f32 %v6558_v1, %v7347_v51  ;;  %v6649_v22 = vadd.f32 %v2978_v11, %v2942_v36  ;;  %v2999_v11 = vld [vmem:[%s6858_s15] sm:$0x1]  ;;  %v7348_v3 = vld [vmem:[#allocation4_spill] sm:$0xff] }
 0x536   :  { %v3031_v47 = vmul.f32 %v6635_v23, %v6635_v23  ;;  %v2980_v59 = vmul.f32 %v6558_v1, %v6462_v50  ;;  %v3032_v60 = vmul.f32 %v6642_v62, %v6642_v62  ;;  %v6667_v52 = vadd.f32 %v2981_v34, %v6565_v33 }
 0x537   :  { %v3004_v9 = vadd.f32 %v3003_v37, %v6602_v21  ;;  %v3040_v29 = vadd.f32 %v3039_v48, %v3025_v35  ;;  %v2995_v43 = vadd.f32 %v2979_v39, %v6560_v0  ;;  %v3033_v19 = vmul.f32 %v6649_v22, %v6649_v22 }
 0x538   :  { %v6662_v4 = vadd.f32 %v2980_v59, %v6562_v15  ;;  %v3036_v48 = vmul.f32 %v6667_v52, %v6667_v52 }
 0x539   :  { %v3005_v40 = vadd.f32 %v3004_v9, %v6607_v31  ;;  %v3041_v25 = vadd.f32 %v3040_v29, %v3026_v46  ;;  %v3034_v1 = vmul.f32 %v2995_v43, %v2995_v43 }
 0x53a   :  { %v3035_v9 = vmul.f32 %v6662_v4, %v6662_v4 }
 0x53b   :  { %v3006_v10 = vadd.f32 %v3005_v40, %v6614_v2  ;;  %v3042_v30 = vadd.f32 %v3041_v25, %v3027_v16 }
 0x53d   :  { %v3007_v5 = vadd.f32 %v3006_v10, %v6621_v53  ;;  %v3043_v54 = vadd.f32 %v3042_v30, %v3028_v7 }
 0x53f   :  { %v3008_v17 = vadd.f32 %v3007_v5, %v6628_v6  ;;  %v3044_v55 = vadd.f32 %v3043_v54, %v3029_v63  ;;  %v2998_v63 = vld [vmem:[%s6857_s14] sm:$0x1] }
 0x541   :  { %v3009_v38 = vadd.f32 %v3008_v17, %v6635_v23  ;;  %v3045_v12 = vadd.f32 %v3044_v55, %v3030_v32 }
 0x543   :  { %v3010_v28 = vadd.f32 %v3009_v38, %v6642_v62  ;;  %v3046_v36 = vadd.f32 %v3045_v12, %v3031_v47 }
 0x545   :  { %v3011_v41 = vadd.f32 %v3010_v28, %v6649_v22  ;;  %v3047_v37 = vadd.f32 %v3046_v36, %v3032_v60 }
 0x547   :  { %v3012_v18 = vadd.f32 %v3011_v41, %v2995_v43  ;;  %v3048_v0 = vadd.f32 %v3047_v37, %v3033_v19 }
 0x549   :  { %v3013_v50 = vadd.f32 %v3012_v18, %v6662_v4  ;;  %v3049_v35 = vadd.f32 %v3048_v0, %v3034_v1 }
 0x54b   :  { %v3014_v57 = vadd.f32 %v3013_v50, %v6667_v52  ;;  %v3050_v8 = vadd.f32 %v3049_v35, %v3035_v9 }
 0x54d   :  { %v3015_v15 = vrot.slane %v3014_v57, 4  ;;  %v3051_v40 = vadd.f32 %v3050_v8, %v3036_v48 }
 0x54f   :  { %v3016_v61 = vadd.f32 %v3015_v15, %v3014_v57  ;;  %v3052_v33 = vrot.slane %v3051_v40, 4 }
 0x551   :  { %v3017_v46 = vrot.slane %v3016_v61, 2  ;;  %v3053_v58 = vadd.f32 %v3052_v33, %v3051_v40 }
 0x553   :  { %v3018_v29 = vadd.f32 %v3017_v46, %v3016_v61  ;;  %v3054_v10 = vrot.slane %v3053_v58, 2 }
 0x555   :  { %v3019_v27 = vrot.slane %v3018_v29, 1  ;;  %v3055_v25 = vadd.f32 %v3054_v10, %v3053_v58 }
 0x557   :  { %v3020_v16 = vadd.f32 %v3019_v27, %v3018_v29  ;;  %v3056_v24 = vrot.slane %v3055_v25, 1 }
 0x559   :  { %v3058_v14 = vmul.f32 0.0078125, %v3020_v16  ;;  %v3057_v5 = vadd.f32 %v3056_v24, %v3055_v25 }
 0x55b   :  { %v3060_v7 = vmul.f32 %v3058_v14, %v3058_v14  ;;  %v3059_v30 = vmul.f32 0.0078125, %v3057_v5 }
 0x55d   :  { %v3061_v42 = vsub.f32 %v3059_v30, %v3060_v7 }
 0x55f   :  { %v3062_v44 = vmax.f32 %v3061_v42, 0.0 }
 0x561   :  { %v3063_v17 = vadd.f32 1e-05, %v3062_v44 }
 0x563   :  { %3898 = vrsqrt.f32 %v3063_v17 }
 0x56d   :  { %v3899_v54 = vpop.eup %3898 }
 0x56e   :  { %v3065_v13 = vmul.f32 %v3899_v54, %v2998_v63 }
 0x570   :  { %v3066_v38 = vmul.f32 %v3065_v13, %v3058_v14  ;;  %v3072_v32 = vrot.slane %v3065_v13, %v7348_v3 }
 0x572   :  { %v3067_v55 = vsub.f32 %v2999_v11, %v3066_v38  ;;  %v3074_v51 = vmul.f32 %v3072_v32, %v6575_v26  ;;  %v3075_v39 = vmul.f32 %v3072_v32, %v6571_v45  ;;  %v3076_v28 = vmul.f32 %v3072_v32, %v6579_v56 }
 0x573   :  { %v3077_v47 = vmul.f32 %v3072_v32, %v6587_v49  ;;  %v3078_v12 = vmul.f32 %v3072_v32, %v6594_v20  ;;  %v3079_v34 = vmul.f32 %v3072_v32, %v6602_v21  ;;  %v3080_v59 = vmul.f32 %v3072_v32, %v6607_v31 }
 0x574   :  { %v3094_v41 = vrot.slane %v3067_v55, %v7348_v3  ;;  %v3081_v60 = vmul.f32 %v3072_v32, %v6614_v2  ;;  %v3082_v36 = vmul.f32 %v3072_v32, %v6621_v53  ;;  %v3083_v26 = vmul.f32 %v3072_v32, %v6628_v6 }
 0x575   :  { %v3084_v45 = vmul.f32 %v3072_v32, %v6635_v23  ;;  %v3085_v56 = vmul.f32 %v3072_v32, %v6642_v62  ;;  %v3086_v49 = vmul.f32 %v3072_v32, %v6649_v22  ;;  %v3087_v18 = vmul.f32 %v3072_v32, %v2995_v43 }
 0x576   :  { %v3096_v20 = vadd.f32 %v3094_v41, %v3074_v51  ;;  %v3097_v19 = vadd.f32 %v3094_v41, %v3075_v39  ;;  %v3098_v21 = vadd.f32 %v3094_v41, %v3076_v28  ;;  %v3099_v37 = vadd.f32 %v3094_v41, %v3077_v47 }
 0x577   :  { %v3100_v31 = vadd.f32 %v3094_v41, %v3078_v12  ;;  %v3101_v50 = vadd.f32 %v3094_v41, %v3079_v34  ;;  %v3102_v1 = vadd.f32 %v3094_v41, %v3080_v59  ;;  %v3103_v0 = vadd.f32 %v3094_v41, %v3081_v60 }
 0x578   :  { %v3112_v2 = vmax.f32 %v3096_v20, 0.0  ;;  %v3113_v57 = vmax.f32 %v3097_v19, 0.0  ;;  %v3114_v53 = vmax.f32 %v3098_v21, 0.0  ;;  %v3115_v9 = vmax.f32 %v3099_v37, 0.0 }
 0x579   :  { %v3116_v6 = vmax.f32 %v3100_v31, 0.0  ;;  %v3117_v35 = vmax.f32 %v3101_v50, 0.0  ;;  %v3118_v23 = vmax.f32 %v3102_v1, 0.0  ;;  %v3119_v15 = vmax.f32 %v3103_v0, 0.0 }
 0x57a   :  { %v3128_v62 = vmin.f32 %v3112_v2, 6.0  ;;  %v3129_v48 = vmin.f32 %v3113_v57, 6.0  ;;  %v3130_v22 = vmin.f32 %v3114_v53, 6.0  ;;  %v3131_v43 = vmin.f32 %v3115_v9, 6.0 }
 0x57b   :  { %v3132_v8 = vmin.f32 %v3116_v6, 6.0  ;;  %v3133_v61 = vmin.f32 %v3117_v35, 6.0  ;;  %v3134_v40 = vmin.f32 %v3118_v23, 6.0  ;;  %v3135_v46 = vmin.f32 %v3119_v15, 6.0 }
 0x57c   :  { %v3144_v33 = vpack.c.bf16 %v3129_v48, %v3128_v62  ;;  %v3145_v29 = vpack.c.bf16 %v3131_v43, %v3130_v22  ;;  %v3104_v58 = vadd.f32 %v3094_v41, %v3082_v36  ;;  %v3105_v27 = vadd.f32 %v3094_v41, %v3083_v26 }
 0x57d   :  { %v3146_v10 = vpack.c.bf16 %v3133_v61, %v3132_v8  ;;  %v3147_v16 = vpack.c.bf16 %v3135_v46, %v3134_v40  ;;  %v3106_v25 = vadd.f32 %v3094_v41, %v3084_v45  ;;  %v3107_v14 = vadd.f32 %v3094_v41, %v3085_v56 }
 0x57e   :  { %3841 = vmatprep.mubr.bf16.mxu1 %v3144_v33  ;;  %v3120_v24 = vmax.f32 %v3104_v58, 0.0  ;;  %v3121_v5 = vmax.f32 %v3105_v27, 0.0  ;;  %v3108_v7 = vadd.f32 %v3094_v41, %v3086_v49  ;;  %v3109_v30 = vadd.f32 %v3094_v41, %v3087_v18 }
 0x57f   :  { %3842 = vmatmul.mubr.bf16.vlgmr.msra.gmra.mrb[32].mxu1 %v3145_v29  ;;  %v3122_v42 = vmax.f32 %v3106_v25, 0.0  ;;  %v3123_v44 = vmax.f32 %v3107_v14, 0.0  ;;  %v3088_v17 = vmul.f32 %v3072_v32, %v6662_v4  ;;  %v3089_v63 = vmul.f32 %v3072_v32, %v6667_v52 }
 0x580   :  { %3845 = vmatprep.mubr.bf16.mxu1 %v3146_v10  ;;  %v3136_v54 = vmin.f32 %v3120_v24, 6.0  ;;  %v3137_v13 = vmin.f32 %v3121_v5, 6.0  ;;  %v3124_v11 = vmax.f32 %v3108_v7, 0.0  ;;  %v3125_v38 = vmax.f32 %v3109_v30, 0.0 }
 0x581   :  { %v3138_v55 = vmin.f32 %v3122_v42, 6.0  ;;  %v3139_v51 = vmin.f32 %v3123_v44, 6.0  ;;  %v3110_v39 = vadd.f32 %v3094_v41, %v3088_v17  ;;  %v3111_v28 = vadd.f32 %v3094_v41, %v3089_v63 }
 0x582   :  { %v3148_v47 = vpack.c.bf16 %v3137_v13, %v3136_v54  ;;  %v3140_v12 = vmin.f32 %v3124_v11, 6.0  ;;  %v3141_v34 = vmin.f32 %v3125_v38, 6.0 }
 0x583   :  { %v3149_v59 = vpack.c.bf16 %v3139_v51, %v3138_v55  ;;  %v3126_v60 = vmax.f32 %v3110_v39, 0.0  ;;  %v3127_v36 = vmax.f32 %v3111_v28, 0.0 }
 0x584   :  { %v3150_v26 = vpack.c.bf16 %v3141_v34, %v3140_v12 }
 0x585   :  { %v3142_v45 = vmin.f32 %v3126_v60, 6.0  ;;  %v3143_v4 = vmin.f32 %v3127_v36, 6.0 }
 0x587   :  { %3846 = vmatmul.mubr.bf16.gmra.mrb[36].mxu1 %v3147_v16  ;;  %v3151_v52 = vpack.c.bf16 %v3143_v4, %v3142_v45 }
 0x588   :  { %3849 = vmatprep.mubr.bf16.mxu1 %v3148_v47 }
 0x58f   :  { %3850 = vmatmul.mubr.bf16.gmra.mrb[40].mxu1 %v3149_v59 }
 0x590   :  { %3853 = vmatprep.mubr.bf16.mxu1 %v3150_v26 }
 0x597   :  { %3854 = vmatmul.mubr.bf16.gmra.mrb[44].mxu1 %v3151_v52 }
 0x652   :  { %v6698_v32 = vpop.f32.mrb[32].mxu1 }
 0x653   :  { %v6700_v56 = vpop.f32.mrb[33].mxu1  ;;  %v3338_v21 = vmul.f32 %v6698_v32, %v6698_v32 }
 0x654   :  { %v6702_v41 = vpop.f32.mrb[34].mxu1  ;;  %v3336_v18 = vmul.f32 %v6700_v56, %v6700_v56 }
 0x655   :  { %v6704_v49 = vpop.f32.mrb[35].mxu1  ;;  %v3339_v50 = vmul.f32 %v6702_v41, %v6702_v41 }
 0x656   :  { %v3315_v20 = vadd.f32 %v6704_v49, %v6700_v56  ;;  %v3337_v19 = vmul.f32 %v6704_v49, %v6704_v49 }
 0x658   :  { %v3316_v37 = vadd.f32 %v6698_v32, %v3315_v20  ;;  %v3352_v31 = vadd.f32 %v3337_v19, %v3336_v18 }
 0x65a   :  { %v3353_v1 = vadd.f32 %v3352_v31, %v3338_v21  ;;  %v6717_v0 = vpop.f32.mrb[36].mxu1  ;;  %v3317_v2 = vadd.f32 %v6702_v41, %v3316_v37 }
 0x65b   :  { %v6720_v57 = vpop.f32.mrb[37].mxu1  ;;  %v3342_v22 = vmul.f32 %v6717_v0, %v6717_v0 }
 0x65c   :  { %v3318_v53 = vadd.f32 %v3317_v2, %v6720_v57  ;;  %v3340_v9 = vmul.f32 %v6720_v57, %v6720_v57  ;;  %v3354_v6 = vadd.f32 %v3353_v1, %v3339_v50  ;;  %v6725_v35 = vpop.f32.mrb[38].mxu1 }
 0x65d   :  { %v6727_v23 = vpop.f32.mrb[39].mxu1  ;;  %v3343_v61 = vmul.f32 %v6725_v35, %v6725_v35 }
 0x65e   :  { %v3355_v15 = vadd.f32 %v3354_v6, %v3340_v9  ;;  %v3319_v62 = vadd.f32 %v3318_v53, %v6727_v23  ;;  %v3341_v48 = vmul.f32 %v6727_v23, %v6727_v23 }
 0x660   :  { %v3320_v43 = vadd.f32 %v6717_v0, %v3319_v62  ;;  %v3356_v8 = vadd.f32 %v3355_v15, %v3341_v48 }
 0x662   :  { %v3357_v40 = vadd.f32 %v3356_v8, %v3342_v22  ;;  %v6737_v46 = vpop.f32.mrb[40].mxu1  ;;  %v3321_v33 = vadd.f32 %v6725_v35, %v3320_v43  ;;  %v3313_v8 = vld [vmem:[%s6859_s17] sm:$0x1] }
 0x663   :  { %v6740_v29 = vpop.f32.mrb[41].mxu1  ;;  %v3346_v7 = vmul.f32 %v6737_v46, %v6737_v46 }
 0x664   :  { %v3322_v58 = vadd.f32 %v3321_v33, %v6740_v29  ;;  %v3344_v27 = vmul.f32 %v6740_v29, %v6740_v29  ;;  %v3358_v10 = vadd.f32 %v3357_v40, %v3343_v61  ;;  %v6745_v16 = vpop.f32.mrb[42].mxu1  ;;  %v3314_v33 = vld [vmem:[%s6860_s18] sm:$0x1] }
 0x665   :  { %v6747_v25 = vpop.f32.mrb[43].mxu1  ;;  %v3347_v44 = vmul.f32 %v6745_v16, %v6745_v16 }
 0x666   :  { %v3359_v14 = vadd.f32 %v3358_v10, %v3344_v27  ;;  %v3323_v24 = vadd.f32 %v3322_v58, %v6747_v25  ;;  %v3345_v5 = vmul.f32 %v6747_v25, %v6747_v25 }
 0x668   :  { %v3324_v30 = vadd.f32 %v6737_v46, %v3323_v24  ;;  %v3360_v42 = vadd.f32 %v3359_v14, %v3345_v5 }
 0x66a   :  { %v3361_v17 = vadd.f32 %v3360_v42, %v3346_v7  ;;  %v3855_v63 = vpop.f32.mrb[44].mxu1  ;;  %v3325_v54 = vadd.f32 %v6745_v16, %v3324_v30 }
 0x66b   :  { %v3298_v13 = vpop.f32.mrb[45].mxu1  ;;  %v3350_v34 = vmul.f32 %v3855_v63, %v3855_v63 }
 0x66c   :  { %v3326_v11 = vadd.f32 %v3325_v54, %v3298_v13  ;;  %v3348_v38 = vmul.f32 %v3298_v13, %v3298_v13  ;;  %v3362_v55 = vadd.f32 %v3361_v17, %v3347_v44  ;;  %v3856_v51 = vpop.f32.mrb[46].mxu1 }
 0x66d   :  { %v3301_v39 = vpop.f32.mrb[47].mxu1  ;;  %v3351_v36 = vmul.f32 %v3856_v51, %v3856_v51 }
 0x66e   :  { %v3363_v28 = vadd.f32 %v3362_v55, %v3348_v38  ;;  %v3327_v47 = vadd.f32 %v3326_v11, %v3301_v39  ;;  %v3349_v12 = vmul.f32 %v3301_v39, %v3301_v39 }
 0x670   :  { %v3328_v59 = vadd.f32 %v3855_v63, %v3327_v47  ;;  %v3364_v60 = vadd.f32 %v3363_v28, %v3349_v12 }
 0x672   :  { %v3329_v26 = vadd.f32 %v3856_v51, %v3328_v59  ;;  %v3365_v45 = vadd.f32 %v3364_v60, %v3350_v34 }
 0x674   :  { %v3330_v4 = vrot.slane %v3329_v26, 4  ;;  %v3366_v52 = vadd.f32 %v3365_v45, %v3351_v36  ;;  %v7351_v45 = vld [vmem:[#allocation32_spill] sm:$0xff] }
 0x676   :  { %v3331_v18 = vadd.f32 %v3330_v4, %v3329_v26  ;;  %v3367_v20 = vrot.slane %v3366_v52, 4  ;;  %v7350_v26 = vld [vmem:[#allocation8_spill] sm:$0xff] }
 0x678   :  { %v3332_v19 = vrot.slane %v3331_v18, 2  ;;  %v3368_v21 = vadd.f32 %v3367_v20, %v3366_v52  ;;  %v7352_v52 = vld [vmem:[#allocation27_spill] sm:$0xff]  ;;  %v7353_v20 = vld [vmem:[#allocation28_spill] sm:$0xff] }
 0x67a   :  { %v3333_v37 = vadd.f32 %v3332_v19, %v3331_v18  ;;  %v3369_v31 = vrot.slane %v3368_v21, 2 }
 0x67c   :  { %v3334_v50 = vrot.slane %v3333_v37, 1  ;;  %v3370_v1 = vadd.f32 %v3369_v31, %v3368_v21  ;;  %v7354_v21 = vld [vmem:[#allocation7_spill] sm:$0xff]  ;;  %v7355_v31 = vld [vmem:[#allocation12_spill] sm:$0xff] }
 0x67e   :  { %v3335_v2 = vadd.f32 %v3334_v50, %v3333_v37  ;;  %v3371_v53 = vrot.slane %v3370_v1, 1 }
 0x680   :  { %v3372_v9 = vadd.f32 %v3371_v53, %v3370_v1  ;;  %v3373_v6 = vmul.f32 0.0078125, %v3335_v2  ;;  %v7356_v1 = vld [vmem:[#allocation13_spill] sm:$0xff]  ;;  %v7357_v53 = vld [vmem:[#allocation24_spill] sm:$0xff] }
 0x682   :  { %v3374_v15 = vmul.f32 0.0078125, %v3372_v9  ;;  %v3375_v62 = vmul.f32 %v3373_v6, %v3373_v6 }
 0x684   :  { %v3376_v48 = vsub.f32 %v3374_v15, %v3375_v62  ;;  %v7359_v62 = vld [vmem:[#allocation35_spill] sm:$0xff] }
 0x686   :  { %v3377_v22 = vmax.f32 %v3376_v48, 0.0 }
 0x688   :  { %v3378_v43 = vadd.f32 1e-05, %v3377_v22  ;;  %v7360_v22 = vld [vmem:[#allocation31_spill] sm:$0xff] }
 0x68a   :  { %3900 = vrsqrt.f32 %v3378_v43 }
 0x694   :  { %v3901_v61 = vpop.eup %3900 }
 0x695   :  { %v3380_v40 = vmul.f32 %v3901_v61, %v3313_v8  ;;  %v7361_v8 = vld [vmem:[#allocation11_spill] sm:$0xff] }
 0x697   :  { %v3381_v58 = vmul.f32 %v3380_v40, %v3373_v6  ;;  %v3387_v27 = vrot.slane %v3380_v40, %v7348_v3  ;;  %v7358_v6 = vld [vmem:[#allocation36_spill] sm:$0xff]  ;;  %v7362_v40 = vld [vmem:[#allocation5_spill] sm:$0xff] }
 0x699   :  { %v3382_v10 = vsub.f32 %v3314_v33, %v3381_v58  ;;  %v3389_v14 = vmul.f32 %v3387_v27, %v6700_v56  ;;  %v3390_v24 = vmul.f32 %v3387_v27, %v6704_v49  ;;  %v3391_v5 = vmul.f32 %v6698_v32, %v3387_v27  ;;  %v7363_v58 = vld [vmem:[#allocation9_spill] sm:$0xff] }
 0x69a   :  { %v3392_v7 = vmul.f32 %v6702_v41, %v3387_v27  ;;  %v3393_v30 = vmul.f32 %v3387_v27, %v6720_v57  ;;  %v3394_v42 = vmul.f32 %v3387_v27, %v6727_v23  ;;  %v3395_v44 = vmul.f32 %v6717_v0, %v3387_v27 }
 0x69b   :  { %v3396_v17 = vmul.f32 %v6725_v35, %v3387_v27  ;;  %v3397_v54 = vmul.f32 %v3387_v27, %v6740_v29  ;;  %v3398_v11 = vmul.f32 %v3387_v27, %v6747_v25  ;;  %v3399_v56 = vmul.f32 %v6737_v46, %v3387_v27 }
 0x69c   :  { %v3400_v49 = vmul.f32 %v6745_v16, %v3387_v27  ;;  %v3401_v38 = vmul.f32 %v3387_v27, %v3298_v13  ;;  %v3402_v32 = vmul.f32 %v3387_v27, %v3301_v39  ;;  %v3403_v55 = vmul.f32 %v3855_v63, %v3387_v27  ;;  %v7349_v63 = vld [vmem:[#allocation6_spill] sm:$0xff] }
 0x69d   :  { %v3404_v41 = vmul.f32 %v3856_v51, %v3387_v27  ;;  %v3409_v57 = vrot.slane %v3382_v10, %v7348_v3  ;;  %v7364_v10 = vld [vmem:[#allocation10_spill] sm:$0xff] }
 0x69f   :  { %v3411_v28 = vadd.f32 %v3409_v57, %v3389_v14  ;;  %v3412_v23 = vadd.f32 %v3409_v57, %v3390_v24  ;;  %v3413_v47 = vadd.f32 %v3409_v57, %v3391_v5  ;;  %v3414_v0 = vadd.f32 %v3409_v57, %v3392_v7 }
 0x6a0   :  { %v3415_v12 = vadd.f32 %v3409_v57, %v3393_v30  ;;  %v3416_v35 = vadd.f32 %v3409_v57, %v3394_v42  ;;  %v3417_v34 = vadd.f32 %v3409_v57, %v3395_v44  ;;  %v3418_v29 = vadd.f32 %v3409_v57, %v3396_v17 }
 0x6a1   :  { %v3419_v59 = vadd.f32 %v3409_v57, %v3397_v54  ;;  %v3420_v25 = vadd.f32 %v3409_v57, %v3398_v11  ;;  %v3421_v60 = vadd.f32 %v3409_v57, %v3399_v56  ;;  %v3422_v46 = vadd.f32 %v3409_v57, %v3400_v49 }
 0x6a2   :  { %v3423_v36 = vadd.f32 %v3409_v57, %v3401_v38  ;;  %v3424_v16 = vadd.f32 %v3409_v57, %v3402_v32  ;;  %v3425_v13 = vadd.f32 %v3409_v57, %v3403_v55  ;;  %v3426_v39 = vadd.f32 %v3409_v57, %v3404_v41 }
 0x6a3   :  { %v3427_v51 = vadd.f32 %v3411_v28, %v7349_v63  ;;  %v3428_v3 = vadd.f32 %v3412_v23, %v7350_v26  ;;  %v3429_v4 = vadd.f32 %v3413_v47, %v7351_v45  ;;  %v3430_v18 = vadd.f32 %v3414_v0, %v7352_v52 }
 0x6a4   :  { %v3431_v19 = vadd.f32 %v3415_v12, %v7353_v20  ;;  %v3432_v37 = vadd.f32 %v3416_v35, %v7354_v21  ;;  %v3433_v50 = vadd.f32 %v3417_v34, %v7355_v31  ;;  %v3434_v2 = vadd.f32 %v3418_v29, %v7356_v1 }
 0x6a5   :  { %v3435_v9 = vadd.f32 %v3419_v59, %v7357_v53  ;;  %v3436_v15 = vadd.f32 %v3420_v25, %v7358_v6  ;;  %v3437_v48 = vadd.f32 %v3421_v60, %v7359_v62  ;;  %v3438_v43 = vadd.f32 %v3422_v46, %v7360_v22  ;;  %3443 = vst [vmem:[%s6861_s19] sm:$0xff] %v3427_v51 }
 0x6a6   :  { %3444 = vst [vmem:[%s6861_s19 + $0x8] sm:$0xff] %v3428_v3  ;;  %3445 = vst [vmem:[%s6861_s19 + $0x10] sm:$0xff] %v3429_v4  ;;  %v3439_v61 = vadd.f32 %v3423_v36, %v7361_v8  ;;  %v3440_v33 = vadd.f32 %v3424_v16, %v7362_v40  ;;  %v3441_v27 = vadd.f32 %v3425_v13, %v7363_v58 }
 0x6a7   :  { %3446 = vst [vmem:[%s6861_s19 + $0x18] sm:$0xff] %v3430_v18  ;;  %v3442_v14 = vadd.f32 %v3426_v39, %v7364_v10  ;;  %3447 = vst [vmem:[%s6861_s19 + $0x20] sm:$0xff] %v3431_v19 }
 0x6a8   :  { %3448 = vst [vmem:[%s6861_s19 + $0x28] sm:$0xff] %v3432_v37  ;;  %3449 = vst [vmem:[%s6861_s19 + $0x30] sm:$0xff] %v3433_v50 }
 0x6a9   :  { %3450 = vst [vmem:[%s6861_s19 + $0x38] sm:$0xff] %v3434_v2  ;;  %3451 = vst [vmem:[%s6861_s19 + $0x40] sm:$0xff] %v3435_v9 }
 0x6aa   :  { %3452 = vst [vmem:[%s6861_s19 + $0x48] sm:$0xff] %v3436_v15  ;;  %3453 = vst [vmem:[%s6861_s19 + $0x50] sm:$0xff] %v3437_v48 }
 0x6ab   :  { %3454 = vst [vmem:[%s6861_s19 + $0x58] sm:$0xff] %v3438_v43  ;;  %3455 = vst [vmem:[%s6861_s19 + $0x60] sm:$0xff] %v3439_v61 }
 0x6ac   :  { %3456 = vst [vmem:[%s6861_s19 + $0x68] sm:$0xff] %v3440_v33  ;;  %3457 = vst [vmem:[%s6861_s19 + $0x70] sm:$0xff] %v3441_v27 }
 0x6ad   :  { %3458 = vst [vmem:[%s6861_s19 + $0x78] sm:$0xff] %v3442_v14 }

</bundles_post_ra>
